<compile_context>
chip_gen: v7x
topology: tpu7x:2x2x1
jax: 0.10.0
libtpu: 0.0.40
codegen_flags: <defaults>
</compile_context>

<pallas_src>
import math
import functools

import jax
import jax.numpy as jnp
from jax.experimental import pallas as pl
from jax.experimental.pallas import tpu as pltpu

INPUT_SIZE = 2
D_MODEL = 64
NHEAD = 2
HEAD_DIM = D_MODEL // NHEAD
DFF = 2048
NUM_LAYERS = 2
LN_EPS = 1e-5
DEC_PAD = 128          # decode output padded to a full lane width (real width is 2)


def _const_spec(shape):
    """BlockSpec covering the whole array, identical for every grid step."""
    n = len(shape)
    return pl.BlockSpec(shape, lambda i, _n=n: (0,) * _n)


def _layer_norm(x, w, b):
    mu = jnp.mean(x, axis=-1, keepdims=True)
    var = jnp.mean((x - mu) ** 2, axis=-1, keepdims=True)
    return (x - mu) * jax.lax.rsqrt(var + LN_EPS) * w + b


# --------------------------------------------------------------------------------------
# Fused kernel: one grid step == one block of BBLK batch elements through the whole model.
# --------------------------------------------------------------------------------------
def fused_kernel(BBLK, S, S_pad,
                 x_ref, encw_ref, encb_ref,
                 wqkv_ref, bqkv_ref, wo_ref,
                 w1_ref, b1_ref, w2_ref,
                 vec_ref, dw_ref, db_ref,
                 o_ref):
    R = BBLK * S_pad
    x = x_ref[...]                                                   # (R, INPUT_SIZE) f32

    # ---- input projection on the VPU (K=2 -> broadcast FMAs; keeps the MXU free).
    #      sqrt(d_model) and the positional encoding are already folded into encw/encb.
    y = x[:, 0:1] * encw_ref[0:1, :]
    for i in range(1, INPUT_SIZE):
        y = y + x[:, i:i + 1] * encw_ref[i:i + 1, :]
    h = y + encb_ref[...]                                            # (R, D) f32

    # additive key-mask for the sublane-padding positions (static, tiny)
    if S_pad != S:
        kpos = jax.lax.broadcasted_iota(jnp.int32, (1, 1, S_pad), 2)
        mask_bias = jnp.where(kpos < S, 0.0, -1e30).astype(jnp.float32)
    else:
        mask_bias = None

    scale = jnp.float32(1.0 / math.sqrt(HEAD_DIM))

    # ---- encoder layers (statically unrolled, post-norm, ReLU FFN) ----
    for l in range(NUM_LAYERS):
        vec = vec_ref[l]                                             # (6, D) f32
        bo, b2 = vec[0:1, :], vec[1:2, :]
        ln1w, ln1b = vec[2:3, :], vec[3:4, :]
        ln2w, ln2b = vec[4:5, :], vec[5:6, :]

        # fused QKV projection: one lane-dense (R, 3*D) matmul
        qkv = jnp.dot(h.astype(jnp.bfloat16), wqkv_ref[l],
                      preferred_element_type=jnp.float32) + bqkv_ref[l]       # (R, 3D) f32
        qkv3 = qkv.reshape(BBLK, S_pad, 3 * D_MODEL)                          # split leading dim

        ctx_heads = []
        for hd in range(NHEAD):
            q = qkv3[:, :, hd * HEAD_DIM:(hd + 1) * HEAD_DIM]                 # (BBLK, S_pad, Hd)
            k = qkv3[:, :, D_MODEL + hd * HEAD_DIM:D_MODEL + (hd + 1) * HEAD_DIM]
            v = qkv3[:, :, 2 * D_MODEL + hd * HEAD_DIM:2 * D_MODEL + (hd + 1) * HEAD_DIM]

            s = jnp.einsum('bqd,bkd->bqk', q, k,
                           preferred_element_type=jnp.float32) * scale        # (BBLK, S_pad, S_pad)
            if mask_bias is not None:
                s = s + mask_bias
            s = s - jnp.max(s, axis=-1, keepdims=True)
            p = jnp.exp(s)
            p = p * pl.reciprocal(jnp.sum(p, axis=-1, keepdims=True), approx=True)

            ctx = jnp.einsum('bqk,bkd->bqd', p, v,
                             preferred_element_type=jnp.float32)               # (BBLK, S_pad, Hd)
            ctx_heads.append(ctx.reshape(R, HEAD_DIM))

        ctx = jnp.concatenate(ctx_heads, axis=-1)                              # (R, D) f32
        attn = jnp.dot(ctx.astype(jnp.bfloat16), wo_ref[l],
                       preferred_element_type=jnp.float32) + bo                # (R, D)

        x1 = _layer_norm(h + attn, ln1w, ln1b)

        hff = jnp.dot(x1.astype(jnp.bfloat16), w1_ref[l],
                      preferred_element_type=jnp.float32) + b1_ref[l]          # (R, DFF)
        hff = jnp.maximum(hff, 0.0)
        ff = jnp.dot(hff.astype(jnp.bfloat16), w2_ref[l],
                     preferred_element_type=jnp.float32) + b2                  # (R, D)

        h = _layer_norm(x1 + ff, ln2w, ln2b)

    # ---- decode head for every row (sublane/lane-dense (8,128) store); glue takes row S-1 ----
    out = jnp.dot(h, dw_ref[...], preferred_element_type=jnp.float32) + db_ref[...]   # (R, DEC_PAD)
    o_ref[...] = out.reshape(BBLK, S_pad, DEC_PAD)


# --------------------------------------------------------------------------------------
# Glue: parameters, positional encoding, packing, forward pass
# --------------------------------------------------------------------------------------
def positional_encoding(seq, d_model):
    pos = jnp.arange(seq, dtype=jnp.float32)[:, None]                          # (S, 1)
    div = jnp.exp(jnp.arange(0, d_model, 2, dtype=jnp.float32)
                  * (-math.log(10000.0) / d_model))                            # (D/2,)
    ang = pos * div                                                            # (S, D/2)
    pe = jnp.zeros((seq, d_model), jnp.float32)
    pe = pe.at[:, 0::2].set(jnp.sin(ang))
    pe = pe.at[:, 1::2].set(jnp.cos(ang))
    return pe


def init_params(key):
    initrange = 0.1
    keys = iter(jax.random.split(key, 4 + 8 * NUM_LAYERS))

    def u(shape, scale):
        return jax.random.uniform(next(keys), shape, jnp.float32, -scale, scale)

    params = {
        "enc_w": u((INPUT_SIZE, D_MODEL), initrange),              # Linear(2,64).weight^T
        "enc_b": u((1, D_MODEL), 1.0 / math.sqrt(INPUT_SIZE)),
        "dec_w": u((D_MODEL, 2), initrange),                       # Linear(64,2).weight^T
        "dec_b": jnp.zeros((1, 2), jnp.float32),
        "layers": [],
    }
    sc_d = 1.0 / math.sqrt(D_MODEL)
    for _ in range(NUM_LAYERS):
        params["layers"].append({
            "wq": u((D_MODEL, D_MODEL), sc_d), "bq": jnp.zeros((1, D_MODEL), jnp.float32),
            "wk": u((D_MODEL, D_MODEL), sc_d), "bk": jnp.zeros((1, D_MODEL), jnp.float32),
            "wv": u((D_MODEL, D_MODEL), sc_d), "bv": jnp.zeros((1, D_MODEL), jnp.float32),
            "wo": u((D_MODEL, D_MODEL), sc_d), "bo": jnp.zeros((1, D_MODEL), jnp.float32),
            "ln1w": jnp.ones((1, D_MODEL), jnp.float32),
            "ln1b": jnp.zeros((1, D_MODEL), jnp.float32),
            "w1": u((D_MODEL, DFF), sc_d), "b1": jnp.zeros((1, DFF), jnp.float32),
            "w2": u((DFF, D_MODEL), 1.0 / math.sqrt(DFF)),
            "b2": jnp.zeros((1, D_MODEL), jnp.float32),
            "ln2w": jnp.ones((1, D_MODEL), jnp.float32),
            "ln2b": jnp.zeros((1, D_MODEL), jnp.float32),
        })
    return params


def pack_params(params):
    """Stack per-layer weights, fuse QKV, pack the small f32 vectors, cast matmul weights to bf16.

    NOTE: weights are stored (in, out) and applied as x @ W (self-consistent with init_params);
    loading real PyTorch (out, in) weights would require a transpose + Q/K/V split fix.
    """
    layers = params["layers"]
    bf16 = jnp.bfloat16

    def cat_cols(*xs):
        return jnp.concatenate(xs, axis=1)

    wqkv = jnp.stack([cat_cols(lp["wq"], lp["wk"], lp["wv"]) for lp in layers]).astype(bf16)  # (L,D,3D)
    bqkv = jnp.stack([cat_cols(lp["bq"], lp["bk"], lp["bv"]) for lp in layers])               # (L,1,3D)
    wo = jnp.stack([lp["wo"] for lp in layers]).astype(bf16)                                  # (L,D,D)
    w1 = jnp.stack([lp["w1"] for lp in layers]).astype(bf16)                                  # (L,D,DFF)
    b1 = jnp.stack([lp["b1"] for lp in layers])                                               # (L,1,DFF)
    w2 = jnp.stack([lp["w2"] for lp in layers]).astype(bf16)                                  # (L,DFF,D)
    vecs = jnp.stack([jnp.concatenate(
        [lp["bo"], lp["b2"], lp["ln1w"], lp["ln1b"], lp["ln2w"], lp["ln2b"]], axis=0)
        for lp in layers])                                                                    # (L,6,D)
    dec_w = jnp.zeros((D_MODEL, DEC_PAD), jnp.float32).at[:, :2].set(params["dec_w"])
    dec_b = jnp.zeros((1, DEC_PAD), jnp.float32).at[:, :2].set(params["dec_b"])
    return dict(wqkv=wqkv, bqkv=bqkv, wo=wo, w1=w1, b1=b1, w2=w2, vecs=vecs,
                dec_w=dec_w, dec_b=dec_b)


def transformer_forward(src, params):
    """src: (B, S, input_size)  ->  (B, 2)   (matches TransformerModel.forward)."""
    B, S, _ = src.shape
    S_pad = ((S + 7) // 8) * 8                       # sublane-multiple token count
    NBLK = 2 if (B % 2 == 0 and B >= 2) else 1       # 2-way parallel grid => both v7x TensorCores
    BBLK = B // NBLK
    R = BBLK * S_pad                                 # rows per grid step (batch folded into M)

    x = src.astype(jnp.float32)
    if S_pad != S:
        x = jnp.pad(x, ((0, 0), (0, S_pad - S), (0, 0)))
    x = x.reshape(B * S_pad, INPUT_SIZE)

    # fold sqrt(d_model) and the positional encoding into the input projection
    sqrt_d = math.sqrt(D_MODEL)
    pe = positional_encoding(S, D_MODEL)
    if S_pad != S:
        pe = jnp.pad(pe, ((0, S_pad - S), (0, 0)))
    enc_w = params["enc_w"] * sqrt_d                                   # (INPUT_SIZE, D)
    enc_b = jnp.tile(params["enc_b"] * sqrt_d + pe, (BBLK, 1))         # (R, D)

    p = pack_params(params)
    weight_args = (enc_w, enc_b, p["wqkv"], p["bqkv"], p["wo"],
                   p["w1"], p["b1"], p["w2"], p["vecs"],
                   p["dec_w"], p["dec_b"])

    out = pl.pallas_call(
        functools.partial(fused_kernel, BBLK, S, S_pad),
        out_shape=jax.ShapeDtypeStruct((B, S_pad, DEC_PAD), jnp.float32),
        grid=(NBLK,),
        in_specs=[pl.BlockSpec((R, INPUT_SIZE), lambda i: (i, 0))]
                 + [_const_spec(a.shape) for a in weight_args],
        out_specs=pl.BlockSpec((BBLK, S_pad, DEC_PAD), lambda i: (i, 0, 0)),
        compiler_params=pltpu.CompilerParams(dimension_semantics=("parallel",)),
    )(x, *weight_args)

    # decode head output of the last real token; strip the lane padding of the decode head
    return out[:, S - 1, :2]


if __name__ == "__main__":
    B, S = 4, 7  # seq <= max_len (7) of the PositionalEncoding buffer
    key = jax.random.PRNGKey(0)
    k_data, k_params = jax.random.split(key)

    src = jax.random.normal(k_data, (B, S, INPUT_SIZE), dtype=jnp.float32)
    params = init_params(k_params)

    fwd = jax.jit(transformer_forward)
    out = fwd(src, params)
    out = jax.block_until_ready(out)

    assert out.shape == (B, 2) and out.dtype == jnp.float32
    assert bool(jnp.all(jnp.isfinite(out)))
    print("KERNEL_OK")
</pallas_src>

<mosaic_0001>
module attributes {stable_mosaic.version = 11 : i64} {
  func.func @fused_kernel(%arg0: i32, %arg1: memref<16x2xf32, #tpu.memory_space<vmem>>, %arg2: memref<2x64xf32, #tpu.memory_space<vmem>>, %arg3: memref<16x64xf32, #tpu.memory_space<vmem>>, %arg4: memref<2x64x192xbf16, #tpu.memory_space<vmem>>, %arg5: memref<2x1x192xf32, #tpu.memory_space<vmem>>, %arg6: memref<2x64x64xbf16, #tpu.memory_space<vmem>>, %arg7: memref<2x64x2048xbf16, #tpu.memory_space<vmem>>, %arg8: memref<2x1x2048xf32, #tpu.memory_space<vmem>>, %arg9: memref<2x2048x64xbf16, #tpu.memory_space<vmem>>, %arg10: memref<2x6x64xf32, #tpu.memory_space<vmem>>, %arg11: memref<64x128xf32, #tpu.memory_space<vmem>>, %arg12: memref<1x128xf32, #tpu.memory_space<vmem>>, %arg13: memref<2x8x128xf32, #tpu.memory_space<vmem>>) attributes {dimension_semantics = [#tpu.dimension_semantics<parallel>], iteration_bounds = array<i64: 2>, scalar_prefetch = 0 : i64, scratch_operands = 0 : i64, tpu.core_type = #tpu.core_type<tc>, window_params = [{transform_indices = @transform_0, window_bounds = array<i64: 16, 2>}, {pipeline_mode = #tpu.pipeline_mode<synchronous>, transform_indices = @transform_1, window_bounds = array<i64: 2, 64>}, {pipeline_mode = #tpu.pipeline_mode<synchronous>, transform_indices = @transform_2, window_bounds = array<i64: 16, 64>}, {pipeline_mode = #tpu.pipeline_mode<synchronous>, transform_indices = @transform_3, window_bounds = array<i64: 2, 64, 192>}, {pipeline_mode = #tpu.pipeline_mode<synchronous>, transform_indices = @transform_4, window_bounds = array<i64: 2, 1, 192>}, {pipeline_mode = #tpu.pipeline_mode<synchronous>, transform_indices = @transform_5, window_bounds = array<i64: 2, 64, 64>}, {pipeline_mode = #tpu.pipeline_mode<synchronous>, transform_indices = @transform_6, window_bounds = array<i64: 2, 64, 2048>}, {pipeline_mode = #tpu.pipeline_mode<synchronous>, transform_indices = @transform_7, window_bounds = array<i64: 2, 1, 2048>}, {pipeline_mode = #tpu.pipeline_mode<synchronous>, transform_indices = @transform_8, window_bounds = array<i64: 2, 2048, 64>}, {pipeline_mode = #tpu.pipeline_mode<synchronous>, transform_indices = @transform_9, window_bounds = array<i64: 2, 6, 64>}, {pipeline_mode = #tpu.pipeline_mode<synchronous>, transform_indices = @transform_10, window_bounds = array<i64: 64, 128>}, {pipeline_mode = #tpu.pipeline_mode<synchronous>, transform_indices = @transform_11, window_bounds = array<i64: 1, 128>}, {transform_indices = @transform_12, window_bounds = array<i64: 2, 8, 128>}]} {
    %c0 = arith.constant 0 : index
    %c0_0 = arith.constant 0 : index
    %0 = vector.load %arg1[%c0, %c0_0] : memref<16x2xf32, #tpu.memory_space<vmem>>, vector<16x2xf32>
    %1 = vector.extract_strided_slice %0 {offsets = [0, 0], sizes = [16, 1], strides = [1, 1]} : vector<16x2xf32> to vector<16x1xf32>
    %c0_1 = arith.constant 0 : index
    %c0_2 = arith.constant 0 : index
    %2 = vector.load %arg2[%c0_1, %c0_2] : memref<2x64xf32, #tpu.memory_space<vmem>>, vector<1x64xf32>
    %3 = vector.broadcast %1 : vector<16x1xf32> to vector<16x64xf32>
    %4 = vector.broadcast %2 : vector<1x64xf32> to vector<16x64xf32>
    %5 = arith.mulf %3, %4 : vector<16x64xf32>
    %6 = vector.extract_strided_slice %0 {offsets = [0, 1], sizes = [16, 1], strides = [1, 1]} : vector<16x2xf32> to vector<16x1xf32>
    %c1 = arith.constant 1 : index
    %c0_3 = arith.constant 0 : index
    %7 = vector.load %arg2[%c1, %c0_3] : memref<2x64xf32, #tpu.memory_space<vmem>>, vector<1x64xf32>
    %8 = vector.broadcast %6 : vector<16x1xf32> to vector<16x64xf32>
    %9 = vector.broadcast %7 : vector<1x64xf32> to vector<16x64xf32>
    %10 = arith.mulf %8, %9 : vector<16x64xf32>
    %11 = arith.addf %5, %10 : vector<16x64xf32>
    %c0_4 = arith.constant 0 : index
    %c0_5 = arith.constant 0 : index
    %12 = vector.load %arg3[%c0_4, %c0_5] : memref<16x64xf32, #tpu.memory_space<vmem>>, vector<16x64xf32>
    %13 = arith.addf %11, %12 : vector<16x64xf32>
    %14 = tpu.iota {dimensions = array<i32: 2>} : vector<1x1x8xi32>
    %c7_i32 = arith.constant 7 : i32
    %15 = vector.broadcast %c7_i32 : i32 to vector<1x1x8xi32>
    %16 = arith.cmpi slt, %14, %15 : vector<1x1x8xi32>
    %cst = arith.constant 0.000000e+00 : f32
    %cst_6 = arith.constant -1.000000e+30 : f32
    %17 = vector.broadcast %cst : f32 to vector<1x1x8xf32>
    %18 = vector.broadcast %cst_6 : f32 to vector<1x1x8xf32>
    %19 = arith.select %16, %17, %18 : vector<1x1x8xi1>, vector<1x1x8xf32>
    %c0_7 = arith.constant 0 : index
    %c0_8 = arith.constant 0 : index
    %c0_9 = arith.constant 0 : index
    %20 = vector.load %arg10[%c0_7, %c0_8, %c0_9] : memref<2x6x64xf32, #tpu.memory_space<vmem>>, vector<1x6x64xf32>
    %21 = vector.shape_cast %20 : vector<1x6x64xf32> to vector<6x64xf32>
    %22 = vector.extract_strided_slice %21 {offsets = [0, 0], sizes = [1, 64], strides = [1, 1]} : vector<6x64xf32> to vector<1x64xf32>
    %23 = vector.extract_strided_slice %21 {offsets = [1, 0], sizes = [1, 64], strides = [1, 1]} : vector<6x64xf32> to vector<1x64xf32>
    %24 = vector.extract_strided_slice %21 {offsets = [2, 0], sizes = [1, 64], strides = [1, 1]} : vector<6x64xf32> to vector<1x64xf32>
    %25 = vector.extract_strided_slice %21 {offsets = [3, 0], sizes = [1, 64], strides = [1, 1]} : vector<6x64xf32> to vector<1x64xf32>
    %26 = vector.extract_strided_slice %21 {offsets = [4, 0], sizes = [1, 64], strides = [1, 1]} : vector<6x64xf32> to vector<1x64xf32>
    %27 = vector.extract_strided_slice %21 {offsets = [5, 0], sizes = [1, 64], strides = [1, 1]} : vector<6x64xf32> to vector<1x64xf32>
    %28 = arith.truncf %13 : vector<16x64xf32> to vector<16x64xbf16>
    %c0_10 = arith.constant 0 : index
    %c0_11 = arith.constant 0 : index
    %c0_12 = arith.constant 0 : index
    %29 = vector.load %arg4[%c0_10, %c0_11, %c0_12] : memref<2x64x192xbf16, #tpu.memory_space<vmem>>, vector<1x64x192xbf16>
    %30 = vector.shape_cast %29 : vector<1x64x192xbf16> to vector<64x192xbf16>
    %cst_13 = arith.constant dense<0.000000e+00> : vector<16x192xf32>
    %31 = tpu.matmul %28, %30, %cst_13 {dimension_numbers = #tpu.dot_dimension_numbers<[1], [0], [0], [1], [0, 0, 1, 1], [], []>} : vector<16x64xbf16>, vector<64x192xbf16>, vector<16x192xf32> -> vector<16x192xf32>
    %c0_14 = arith.constant 0 : index
    %c0_15 = arith.constant 0 : index
    %c0_16 = arith.constant 0 : index
    %32 = vector.load %arg5[%c0_14, %c0_15, %c0_16] : memref<2x1x192xf32, #tpu.memory_space<vmem>>, vector<1x1x192xf32>
    %33 = vector.shape_cast %32 : vector<1x1x192xf32> to vector<1x192xf32>
    %34 = vector.broadcast %33 : vector<1x192xf32> to vector<16x192xf32>
    %35 = arith.addf %31, %34 : vector<16x192xf32>
    %36 = vector.shape_cast %35 : vector<16x192xf32> to vector<2x8x192xf32>
    %37 = vector.extract_strided_slice %36 {offsets = [0, 0, 0], sizes = [2, 8, 32], strides = [1, 1, 1]} : vector<2x8x192xf32> to vector<2x8x32xf32>
    %38 = vector.extract_strided_slice %36 {offsets = [0, 0, 64], sizes = [2, 8, 32], strides = [1, 1, 1]} : vector<2x8x192xf32> to vector<2x8x32xf32>
    %39 = vector.extract_strided_slice %36 {offsets = [0, 0, 128], sizes = [2, 8, 32], strides = [1, 1, 1]} : vector<2x8x192xf32> to vector<2x8x32xf32>
    "tpu.trace_start"() <{level = 10 : i32, message = "bqd,bkd->bqk"}> : () -> ()
    %cst_17 = arith.constant dense<0.000000e+00> : vector<2x8x8xf32>
    %40 = tpu.matmul %37, %38, %cst_17 {dimension_numbers = #tpu.dot_dimension_numbers<[2], [2], [1], [1], [0, 0, 0, 1, 1, 1], [0], [0]>} : vector<2x8x32xf32>, vector<2x8x32xf32>, vector<2x8x8xf32> -> vector<2x8x8xf32>
    "tpu.trace_stop"() : () -> ()
    %cst_18 = arith.constant 0.176776692 : f32
    %41 = vector.broadcast %cst_18 : f32 to vector<2x8x8xf32>
    %42 = arith.mulf %40, %41 : vector<2x8x8xf32>
    %43 = vector.broadcast %19 : vector<1x1x8xf32> to vector<2x8x8xf32>
    %44 = arith.addf %42, %43 : vector<2x8x8xf32>
    %cst_19 = arith.constant dense<0xFF800000> : vector<2x8xf32>
    %45 = vector.multi_reduction <maximumf>, %44, %cst_19 [2] : vector<2x8x8xf32> to vector<2x8xf32>
    %46 = vector.shape_cast %45 : vector<2x8xf32> to vector<2x8x1xf32>
    %47 = vector.broadcast %46 : vector<2x8x1xf32> to vector<2x8x8xf32>
    %48 = arith.subf %44, %47 : vector<2x8x8xf32>
    %49 = math.exp %48 : vector<2x8x8xf32>
    %cst_20 = arith.constant dense<0.000000e+00> : vector<2x8xf32>
    %50 = vector.multi_reduction <add>, %49, %cst_20 [2] : vector<2x8x8xf32> to vector<2x8xf32>
    %51 = vector.shape_cast %50 : vector<2x8xf32> to vector<2x8x1xf32>
    %52 = tpu.reciprocal %51 {approx = true} : vector<2x8x1xf32> -> vector<2x8x1xf32>
    %53 = vector.broadcast %52 : vector<2x8x1xf32> to vector<2x8x8xf32>
    %54 = arith.mulf %49, %53 : vector<2x8x8xf32>
    "tpu.trace_start"() <{level = 10 : i32, message = "bqk,bkd->bqd"}> : () -> ()
    %cst_21 = arith.constant dense<0.000000e+00> : vector<2x8x32xf32>
    %55 = tpu.matmul %54, %39, %cst_21 {dimension_numbers = #tpu.dot_dimension_numbers<[2], [1], [1], [2], [0, 0, 0, 1, 1, 2], [0], [0]>} : vector<2x8x8xf32>, vector<2x8x32xf32>, vector<2x8x32xf32> -> vector<2x8x32xf32>
    "tpu.trace_stop"() : () -> ()
    %56 = vector.shape_cast %55 : vector<2x8x32xf32> to vector<16x32xf32>
    %57 = vector.extract_strided_slice %36 {offsets = [0, 0, 32], sizes = [2, 8, 32], strides = [1, 1, 1]} : vector<2x8x192xf32> to vector<2x8x32xf32>
    %58 = vector.extract_strided_slice %36 {offsets = [0, 0, 96], sizes = [2, 8, 32], strides = [1, 1, 1]} : vector<2x8x192xf32> to vector<2x8x32xf32>
    %59 = vector.extract_strided_slice %36 {offsets = [0, 0, 160], sizes = [2, 8, 32], strides = [1, 1, 1]} : vector<2x8x192xf32> to vector<2x8x32xf32>
    "tpu.trace_start"() <{level = 10 : i32, message = "bqd,bkd->bqk"}> : () -> ()
    %cst_22 = arith.constant dense<0.000000e+00> : vector<2x8x8xf32>
    %60 = tpu.matmul %57, %58, %cst_22 {dimension_numbers = #tpu.dot_dimension_numbers<[2], [2], [1], [1], [0, 0, 0, 1, 1, 1], [0], [0]>} : vector<2x8x32xf32>, vector<2x8x32xf32>, vector<2x8x8xf32> -> vector<2x8x8xf32>
    "tpu.trace_stop"() : () -> ()
    %cst_23 = arith.constant 0.176776692 : f32
    %61 = vector.broadcast %cst_23 : f32 to vector<2x8x8xf32>
    %62 = arith.mulf %60, %61 : vector<2x8x8xf32>
    %63 = vector.broadcast %19 : vector<1x1x8xf32> to vector<2x8x8xf32>
    %64 = arith.addf %62, %63 : vector<2x8x8xf32>
    %cst_24 = arith.constant dense<0xFF800000> : vector<2x8xf32>
    %65 = vector.multi_reduction <maximumf>, %64, %cst_24 [2] : vector<2x8x8xf32> to vector<2x8xf32>
    %66 = vector.shape_cast %65 : vector<2x8xf32> to vector<2x8x1xf32>
    %67 = vector.broadcast %66 : vector<2x8x1xf32> to vector<2x8x8xf32>
    %68 = arith.subf %64, %67 : vector<2x8x8xf32>
    %69 = math.exp %68 : vector<2x8x8xf32>
    %cst_25 = arith.constant dense<0.000000e+00> : vector<2x8xf32>
    %70 = vector.multi_reduction <add>, %69, %cst_25 [2] : vector<2x8x8xf32> to vector<2x8xf32>
    %71 = vector.shape_cast %70 : vector<2x8xf32> to vector<2x8x1xf32>
    %72 = tpu.reciprocal %71 {approx = true} : vector<2x8x1xf32> -> vector<2x8x1xf32>
    %73 = vector.broadcast %72 : vector<2x8x1xf32> to vector<2x8x8xf32>
    %74 = arith.mulf %69, %73 : vector<2x8x8xf32>
    "tpu.trace_start"() <{level = 10 : i32, message = "bqk,bkd->bqd"}> : () -> ()
    %cst_26 = arith.constant dense<0.000000e+00> : vector<2x8x32xf32>
    %75 = tpu.matmul %74, %59, %cst_26 {dimension_numbers = #tpu.dot_dimension_numbers<[2], [1], [1], [2], [0, 0, 0, 1, 1, 2], [0], [0]>} : vector<2x8x8xf32>, vector<2x8x32xf32>, vector<2x8x32xf32> -> vector<2x8x32xf32>
    "tpu.trace_stop"() : () -> ()
    %76 = vector.shape_cast %75 : vector<2x8x32xf32> to vector<16x32xf32>
    %77 = tpu.concatenate %56, %76 in 1 : vector<16x32xf32>, vector<16x32xf32> -> vector<16x64xf32>
    %78 = arith.truncf %77 : vector<16x64xf32> to vector<16x64xbf16>
    %c0_27 = arith.constant 0 : index
    %c0_28 = arith.constant 0 : index
    %c0_29 = arith.constant 0 : index
    %79 = vector.load %arg6[%c0_27, %c0_28, %c0_29] : memref<2x64x64xbf16, #tpu.memory_space<vmem>>, vector<1x64x64xbf16>
    %80 = vector.shape_cast %79 : vector<1x64x64xbf16> to vector<64x64xbf16>
    %cst_30 = arith.constant dense<0.000000e+00> : vector<16x64xf32>
    %81 = tpu.matmul %78, %80, %cst_30 {dimension_numbers = #tpu.dot_dimension_numbers<[1], [0], [0], [1], [0, 0, 1, 1], [], []>} : vector<16x64xbf16>, vector<64x64xbf16>, vector<16x64xf32> -> vector<16x64xf32>
    %82 = vector.broadcast %22 : vector<1x64xf32> to vector<16x64xf32>
    %83 = arith.addf %81, %82 : vector<16x64xf32>
    %84 = arith.addf %13, %83 : vector<16x64xf32>
    %cst_31 = arith.constant dense<0.000000e+00> : vector<16xf32>
    %85 = vector.multi_reduction <add>, %84, %cst_31 [1] : vector<16x64xf32> to vector<16xf32>
    %86 = vector.shape_cast %85 : vector<16xf32> to vector<16x1xf32>
    %cst_32 = arith.constant 6.400000e+01 : f32
    %87 = vector.broadcast %cst_32 : f32 to vector<16x1xf32>
    %88 = arith.divf %86, %87 : vector<16x1xf32>
    %89 = vector.broadcast %88 : vector<16x1xf32> to vector<16x64xf32>
    %90 = arith.subf %84, %89 : vector<16x64xf32>
    %91 = arith.mulf %90, %90 : vector<16x64xf32>
    %cst_33 = arith.constant dense<0.000000e+00> : vector<16xf32>
    %92 = vector.multi_reduction <add>, %91, %cst_33 [1] : vector<16x64xf32> to vector<16xf32>
    %93 = vector.shape_cast %92 : vector<16xf32> to vector<16x1xf32>
    %cst_34 = arith.constant 6.400000e+01 : f32
    %94 = vector.broadcast %cst_34 : f32 to vector<16x1xf32>
    %95 = arith.divf %93, %94 : vector<16x1xf32>
    %96 = vector.broadcast %88 : vector<16x1xf32> to vector<16x64xf32>
    %97 = arith.subf %84, %96 : vector<16x64xf32>
    %cst_35 = arith.constant 9.99999974E-6 : f32
    %98 = vector.broadcast %cst_35 : f32 to vector<16x1xf32>
    %99 = arith.addf %95, %98 : vector<16x1xf32>
    %100 = math.rsqrt %99 : vector<16x1xf32>
    %101 = vector.broadcast %100 : vector<16x1xf32> to vector<16x64xf32>
    %102 = arith.mulf %97, %101 : vector<16x64xf32>
    %103 = vector.broadcast %24 : vector<1x64xf32> to vector<16x64xf32>
    %104 = arith.mulf %102, %103 : vector<16x64xf32>
    %105 = vector.broadcast %25 : vector<1x64xf32> to vector<16x64xf32>
    %106 = arith.addf %104, %105 : vector<16x64xf32>
    %107 = arith.truncf %106 : vector<16x64xf32> to vector<16x64xbf16>
    %c0_36 = arith.constant 0 : index
    %c0_37 = arith.constant 0 : index
    %c0_38 = arith.constant 0 : index
    %108 = vector.load %arg7[%c0_36, %c0_37, %c0_38] : memref<2x64x2048xbf16, #tpu.memory_space<vmem>>, vector<1x64x2048xbf16>
    %109 = vector.shape_cast %108 : vector<1x64x2048xbf16> to vector<64x2048xbf16>
    %cst_39 = arith.constant dense<0.000000e+00> : vector<16x2048xf32>
    %110 = tpu.matmul %107, %109, %cst_39 {dimension_numbers = #tpu.dot_dimension_numbers<[1], [0], [0], [1], [0, 0, 1, 1], [], []>} : vector<16x64xbf16>, vector<64x2048xbf16>, vector<16x2048xf32> -> vector<16x2048xf32>
    %c0_40 = arith.constant 0 : index
    %c0_41 = arith.constant 0 : index
    %c0_42 = arith.constant 0 : index
    %111 = vector.load %arg8[%c0_40, %c0_41, %c0_42] : memref<2x1x2048xf32, #tpu.memory_space<vmem>>, vector<1x1x2048xf32>
    %112 = vector.shape_cast %111 : vector<1x1x2048xf32> to vector<1x2048xf32>
    %113 = vector.broadcast %112 : vector<1x2048xf32> to vector<16x2048xf32>
    %114 = arith.addf %110, %113 : vector<16x2048xf32>
    %cst_43 = arith.constant 0.000000e+00 : f32
    %115 = vector.broadcast %cst_43 : f32 to vector<16x2048xf32>
    %116 = arith.maximumf %114, %115 : vector<16x2048xf32>
    %117 = arith.truncf %116 : vector<16x2048xf32> to vector<16x2048xbf16>
    %c0_44 = arith.constant 0 : index
    %c0_45 = arith.constant 0 : index
    %c0_46 = arith.constant 0 : index
    %118 = vector.load %arg9[%c0_44, %c0_45, %c0_46] : memref<2x2048x64xbf16, #tpu.memory_space<vmem>>, vector<1x2048x64xbf16>
    %119 = vector.shape_cast %118 : vector<1x2048x64xbf16> to vector<2048x64xbf16>
    %cst_47 = arith.constant dense<0.000000e+00> : vector<16x64xf32>
    %120 = tpu.matmul %117, %119, %cst_47 {dimension_numbers = #tpu.dot_dimension_numbers<[1], [0], [0], [1], [0, 0, 1, 1], [], []>} : vector<16x2048xbf16>, vector<2048x64xbf16>, vector<16x64xf32> -> vector<16x64xf32>
    %121 = vector.broadcast %23 : vector<1x64xf32> to vector<16x64xf32>
    %122 = arith.addf %120, %121 : vector<16x64xf32>
    %123 = arith.addf %106, %122 : vector<16x64xf32>
    %cst_48 = arith.constant dense<0.000000e+00> : vector<16xf32>
    %124 = vector.multi_reduction <add>, %123, %cst_48 [1] : vector<16x64xf32> to vector<16xf32>
    %125 = vector.shape_cast %124 : vector<16xf32> to vector<16x1xf32>
    %cst_49 = arith.constant 6.400000e+01 : f32
    %126 = vector.broadcast %cst_49 : f32 to vector<16x1xf32>
    %127 = arith.divf %125, %126 : vector<16x1xf32>
    %128 = vector.broadcast %127 : vector<16x1xf32> to vector<16x64xf32>
    %129 = arith.subf %123, %128 : vector<16x64xf32>
    %130 = arith.mulf %129, %129 : vector<16x64xf32>
    %cst_50 = arith.constant dense<0.000000e+00> : vector<16xf32>
    %131 = vector.multi_reduction <add>, %130, %cst_50 [1] : vector<16x64xf32> to vector<16xf32>
    %132 = vector.shape_cast %131 : vector<16xf32> to vector<16x1xf32>
    %cst_51 = arith.constant 6.400000e+01 : f32
    %133 = vector.broadcast %cst_51 : f32 to vector<16x1xf32>
    %134 = arith.divf %132, %133 : vector<16x1xf32>
    %135 = vector.broadcast %127 : vector<16x1xf32> to vector<16x64xf32>
    %136 = arith.subf %123, %135 : vector<16x64xf32>
    %cst_52 = arith.constant 9.99999974E-6 : f32
    %137 = vector.broadcast %cst_52 : f32 to vector<16x1xf32>
    %138 = arith.addf %134, %137 : vector<16x1xf32>
    %139 = math.rsqrt %138 : vector<16x1xf32>
    %140 = vector.broadcast %139 : vector<16x1xf32> to vector<16x64xf32>
    %141 = arith.mulf %136, %140 : vector<16x64xf32>
    %142 = vector.broadcast %26 : vector<1x64xf32> to vector<16x64xf32>
    %143 = arith.mulf %141, %142 : vector<16x64xf32>
    %144 = vector.broadcast %27 : vector<1x64xf32> to vector<16x64xf32>
    %145 = arith.addf %143, %144 : vector<16x64xf32>
    %c1_53 = arith.constant 1 : index
    %c0_54 = arith.constant 0 : index
    %c0_55 = arith.constant 0 : index
    %146 = vector.load %arg10[%c1_53, %c0_54, %c0_55] : memref<2x6x64xf32, #tpu.memory_space<vmem>>, vector<1x6x64xf32>
    %147 = vector.shape_cast %146 : vector<1x6x64xf32> to vector<6x64xf32>
    %148 = vector.extract_strided_slice %147 {offsets = [0, 0], sizes = [1, 64], strides = [1, 1]} : vector<6x64xf32> to vector<1x64xf32>
    %149 = vector.extract_strided_slice %147 {offsets = [1, 0], sizes = [1, 64], strides = [1, 1]} : vector<6x64xf32> to vector<1x64xf32>
    %150 = vector.extract_strided_slice %147 {offsets = [2, 0], sizes = [1, 64], strides = [1, 1]} : vector<6x64xf32> to vector<1x64xf32>
    %151 = vector.extract_strided_slice %147 {offsets = [3, 0], sizes = [1, 64], strides = [1, 1]} : vector<6x64xf32> to vector<1x64xf32>
    %152 = vector.extract_strided_slice %147 {offsets = [4, 0], sizes = [1, 64], strides = [1, 1]} : vector<6x64xf32> to vector<1x64xf32>
    %153 = vector.extract_strided_slice %147 {offsets = [5, 0], sizes = [1, 64], strides = [1, 1]} : vector<6x64xf32> to vector<1x64xf32>
    %154 = arith.truncf %145 : vector<16x64xf32> to vector<16x64xbf16>
    %c1_56 = arith.constant 1 : index
    %c0_57 = arith.constant 0 : index
    %c0_58 = arith.constant 0 : index
    %155 = vector.load %arg4[%c1_56, %c0_57, %c0_58] : memref<2x64x192xbf16, #tpu.memory_space<vmem>>, vector<1x64x192xbf16>
    %156 = vector.shape_cast %155 : vector<1x64x192xbf16> to vector<64x192xbf16>
    %cst_59 = arith.constant dense<0.000000e+00> : vector<16x192xf32>
    %157 = tpu.matmul %154, %156, %cst_59 {dimension_numbers = #tpu.dot_dimension_numbers<[1], [0], [0], [1], [0, 0, 1, 1], [], []>} : vector<16x64xbf16>, vector<64x192xbf16>, vector<16x192xf32> -> vector<16x192xf32>
    %c1_60 = arith.constant 1 : index
    %c0_61 = arith.constant 0 : index
    %c0_62 = arith.constant 0 : index
    %158 = vector.load %arg5[%c1_60, %c0_61, %c0_62] : memref<2x1x192xf32, #tpu.memory_space<vmem>>, vector<1x1x192xf32>
    %159 = vector.shape_cast %158 : vector<1x1x192xf32> to vector<1x192xf32>
    %160 = vector.broadcast %159 : vector<1x192xf32> to vector<16x192xf32>
    %161 = arith.addf %157, %160 : vector<16x192xf32>
    %162 = vector.shape_cast %161 : vector<16x192xf32> to vector<2x8x192xf32>
    %163 = vector.extract_strided_slice %162 {offsets = [0, 0, 0], sizes = [2, 8, 32], strides = [1, 1, 1]} : vector<2x8x192xf32> to vector<2x8x32xf32>
    %164 = vector.extract_strided_slice %162 {offsets = [0, 0, 64], sizes = [2, 8, 32], strides = [1, 1, 1]} : vector<2x8x192xf32> to vector<2x8x32xf32>
    %165 = vector.extract_strided_slice %162 {offsets = [0, 0, 128], sizes = [2, 8, 32], strides = [1, 1, 1]} : vector<2x8x192xf32> to vector<2x8x32xf32>
    "tpu.trace_start"() <{level = 10 : i32, message = "bqd,bkd->bqk"}> : () -> ()
    %cst_63 = arith.constant dense<0.000000e+00> : vector<2x8x8xf32>
    %166 = tpu.matmul %163, %164, %cst_63 {dimension_numbers = #tpu.dot_dimension_numbers<[2], [2], [1], [1], [0, 0, 0, 1, 1, 1], [0], [0]>} : vector<2x8x32xf32>, vector<2x8x32xf32>, vector<2x8x8xf32> -> vector<2x8x8xf32>
    "tpu.trace_stop"() : () -> ()
    %cst_64 = arith.constant 0.176776692 : f32
    %167 = vector.broadcast %cst_64 : f32 to vector<2x8x8xf32>
    %168 = arith.mulf %166, %167 : vector<2x8x8xf32>
    %169 = vector.broadcast %19 : vector<1x1x8xf32> to vector<2x8x8xf32>
    %170 = arith.addf %168, %169 : vector<2x8x8xf32>
    %cst_65 = arith.constant dense<0xFF800000> : vector<2x8xf32>
    %171 = vector.multi_reduction <maximumf>, %170, %cst_65 [2] : vector<2x8x8xf32> to vector<2x8xf32>
    %172 = vector.shape_cast %171 : vector<2x8xf32> to vector<2x8x1xf32>
    %173 = vector.broadcast %172 : vector<2x8x1xf32> to vector<2x8x8xf32>
    %174 = arith.subf %170, %173 : vector<2x8x8xf32>
    %175 = math.exp %174 : vector<2x8x8xf32>
    %cst_66 = arith.constant dense<0.000000e+00> : vector<2x8xf32>
    %176 = vector.multi_reduction <add>, %175, %cst_66 [2] : vector<2x8x8xf32> to vector<2x8xf32>
    %177 = vector.shape_cast %176 : vector<2x8xf32> to vector<2x8x1xf32>
    %178 = tpu.reciprocal %177 {approx = true} : vector<2x8x1xf32> -> vector<2x8x1xf32>
    %179 = vector.broadcast %178 : vector<2x8x1xf32> to vector<2x8x8xf32>
    %180 = arith.mulf %175, %179 : vector<2x8x8xf32>
    "tpu.trace_start"() <{level = 10 : i32, message = "bqk,bkd->bqd"}> : () -> ()
    %cst_67 = arith.constant dense<0.000000e+00> : vector<2x8x32xf32>
    %181 = tpu.matmul %180, %165, %cst_67 {dimension_numbers = #tpu.dot_dimension_numbers<[2], [1], [1], [2], [0, 0, 0, 1, 1, 2], [0], [0]>} : vector<2x8x8xf32>, vector<2x8x32xf32>, vector<2x8x32xf32> -> vector<2x8x32xf32>
    "tpu.trace_stop"() : () -> ()
    %182 = vector.shape_cast %181 : vector<2x8x32xf32> to vector<16x32xf32>
    %183 = vector.extract_strided_slice %162 {offsets = [0, 0, 32], sizes = [2, 8, 32], strides = [1, 1, 1]} : vector<2x8x192xf32> to vector<2x8x32xf32>
    %184 = vector.extract_strided_slice %162 {offsets = [0, 0, 96], sizes = [2, 8, 32], strides = [1, 1, 1]} : vector<2x8x192xf32> to vector<2x8x32xf32>
    %185 = vector.extract_strided_slice %162 {offsets = [0, 0, 160], sizes = [2, 8, 32], strides = [1, 1, 1]} : vector<2x8x192xf32> to vector<2x8x32xf32>
    "tpu.trace_start"() <{level = 10 : i32, message = "bqd,bkd->bqk"}> : () -> ()
    %cst_68 = arith.constant dense<0.000000e+00> : vector<2x8x8xf32>
    %186 = tpu.matmul %183, %184, %cst_68 {dimension_numbers = #tpu.dot_dimension_numbers<[2], [2], [1], [1], [0, 0, 0, 1, 1, 1], [0], [0]>} : vector<2x8x32xf32>, vector<2x8x32xf32>, vector<2x8x8xf32> -> vector<2x8x8xf32>
    "tpu.trace_stop"() : () -> ()
    %cst_69 = arith.constant 0.176776692 : f32
    %187 = vector.broadcast %cst_69 : f32 to vector<2x8x8xf32>
    %188 = arith.mulf %186, %187 : vector<2x8x8xf32>
    %189 = vector.broadcast %19 : vector<1x1x8xf32> to vector<2x8x8xf32>
    %190 = arith.addf %188, %189 : vector<2x8x8xf32>
    %cst_70 = arith.constant dense<0xFF800000> : vector<2x8xf32>
    %191 = vector.multi_reduction <maximumf>, %190, %cst_70 [2] : vector<2x8x8xf32> to vector<2x8xf32>
    %192 = vector.shape_cast %191 : vector<2x8xf32> to vector<2x8x1xf32>
    %193 = vector.broadcast %192 : vector<2x8x1xf32> to vector<2x8x8xf32>
    %194 = arith.subf %190, %193 : vector<2x8x8xf32>
    %195 = math.exp %194 : vector<2x8x8xf32>
    %cst_71 = arith.constant dense<0.000000e+00> : vector<2x8xf32>
    %196 = vector.multi_reduction <add>, %195, %cst_71 [2] : vector<2x8x8xf32> to vector<2x8xf32>
    %197 = vector.shape_cast %196 : vector<2x8xf32> to vector<2x8x1xf32>
    %198 = tpu.reciprocal %197 {approx = true} : vector<2x8x1xf32> -> vector<2x8x1xf32>
    %199 = vector.broadcast %198 : vector<2x8x1xf32> to vector<2x8x8xf32>
    %200 = arith.mulf %195, %199 : vector<2x8x8xf32>
    "tpu.trace_start"() <{level = 10 : i32, message = "bqk,bkd->bqd"}> : () -> ()
    %cst_72 = arith.constant dense<0.000000e+00> : vector<2x8x32xf32>
    %201 = tpu.matmul %200, %185, %cst_72 {dimension_numbers = #tpu.dot_dimension_numbers<[2], [1], [1], [2], [0, 0, 0, 1, 1, 2], [0], [0]>} : vector<2x8x8xf32>, vector<2x8x32xf32>, vector<2x8x32xf32> -> vector<2x8x32xf32>
    "tpu.trace_stop"() : () -> ()
    %202 = vector.shape_cast %201 : vector<2x8x32xf32> to vector<16x32xf32>
    %203 = tpu.concatenate %182, %202 in 1 : vector<16x32xf32>, vector<16x32xf32> -> vector<16x64xf32>
    %204 = arith.truncf %203 : vector<16x64xf32> to vector<16x64xbf16>
    %c1_73 = arith.constant 1 : index
    %c0_74 = arith.constant 0 : index
    %c0_75 = arith.constant 0 : index
    %205 = vector.load %arg6[%c1_73, %c0_74, %c0_75] : memref<2x64x64xbf16, #tpu.memory_space<vmem>>, vector<1x64x64xbf16>
    %206 = vector.shape_cast %205 : vector<1x64x64xbf16> to vector<64x64xbf16>
    %cst_76 = arith.constant dense<0.000000e+00> : vector<16x64xf32>
    %207 = tpu.matmul %204, %206, %cst_76 {dimension_numbers = #tpu.dot_dimension_numbers<[1], [0], [0], [1], [0, 0, 1, 1], [], []>} : vector<16x64xbf16>, vector<64x64xbf16>, vector<16x64xf32> -> vector<16x64xf32>
    %208 = vector.broadcast %148 : vector<1x64xf32> to vector<16x64xf32>
    %209 = arith.addf %207, %208 : vector<16x64xf32>
    %210 = arith.addf %145, %209 : vector<16x64xf32>
    %cst_77 = arith.constant dense<0.000000e+00> : vector<16xf32>
    %211 = vector.multi_reduction <add>, %210, %cst_77 [1] : vector<16x64xf32> to vector<16xf32>
    %212 = vector.shape_cast %211 : vector<16xf32> to vector<16x1xf32>
    %cst_78 = arith.constant 6.400000e+01 : f32
    %213 = vector.broadcast %cst_78 : f32 to vector<16x1xf32>
    %214 = arith.divf %212, %213 : vector<16x1xf32>
    %215 = vector.broadcast %214 : vector<16x1xf32> to vector<16x64xf32>
    %216 = arith.subf %210, %215 : vector<16x64xf32>
    %217 = arith.mulf %216, %216 : vector<16x64xf32>
    %cst_79 = arith.constant dense<0.000000e+00> : vector<16xf32>
    %218 = vector.multi_reduction <add>, %217, %cst_79 [1] : vector<16x64xf32> to vector<16xf32>
    %219 = vector.shape_cast %218 : vector<16xf32> to vector<16x1xf32>
    %cst_80 = arith.constant 6.400000e+01 : f32
    %220 = vector.broadcast %cst_80 : f32 to vector<16x1xf32>
    %221 = arith.divf %219, %220 : vector<16x1xf32>
    %222 = vector.broadcast %214 : vector<16x1xf32> to vector<16x64xf32>
    %223 = arith.subf %210, %222 : vector<16x64xf32>
    %cst_81 = arith.constant 9.99999974E-6 : f32
    %224 = vector.broadcast %cst_81 : f32 to vector<16x1xf32>
    %225 = arith.addf %221, %224 : vector<16x1xf32>
    %226 = math.rsqrt %225 : vector<16x1xf32>
    %227 = vector.broadcast %226 : vector<16x1xf32> to vector<16x64xf32>
    %228 = arith.mulf %223, %227 : vector<16x64xf32>
    %229 = vector.broadcast %150 : vector<1x64xf32> to vector<16x64xf32>
    %230 = arith.mulf %228, %229 : vector<16x64xf32>
    %231 = vector.broadcast %151 : vector<1x64xf32> to vector<16x64xf32>
    %232 = arith.addf %230, %231 : vector<16x64xf32>
    %233 = arith.truncf %232 : vector<16x64xf32> to vector<16x64xbf16>
    %c1_82 = arith.constant 1 : index
    %c0_83 = arith.constant 0 : index
    %c0_84 = arith.constant 0 : index
    %234 = vector.load %arg7[%c1_82, %c0_83, %c0_84] : memref<2x64x2048xbf16, #tpu.memory_space<vmem>>, vector<1x64x2048xbf16>
    %235 = vector.shape_cast %234 : vector<1x64x2048xbf16> to vector<64x2048xbf16>
    %cst_85 = arith.constant dense<0.000000e+00> : vector<16x2048xf32>
    %236 = tpu.matmul %233, %235, %cst_85 {dimension_numbers = #tpu.dot_dimension_numbers<[1], [0], [0], [1], [0, 0, 1, 1], [], []>} : vector<16x64xbf16>, vector<64x2048xbf16>, vector<16x2048xf32> -> vector<16x2048xf32>
    %c1_86 = arith.constant 1 : index
    %c0_87 = arith.constant 0 : index
    %c0_88 = arith.constant 0 : index
    %237 = vector.load %arg8[%c1_86, %c0_87, %c0_88] : memref<2x1x2048xf32, #tpu.memory_space<vmem>>, vector<1x1x2048xf32>
    %238 = vector.shape_cast %237 : vector<1x1x2048xf32> to vector<1x2048xf32>
    %239 = vector.broadcast %238 : vector<1x2048xf32> to vector<16x2048xf32>
    %240 = arith.addf %236, %239 : vector<16x2048xf32>
    %cst_89 = arith.constant 0.000000e+00 : f32
    %241 = vector.broadcast %cst_89 : f32 to vector<16x2048xf32>
    %242 = arith.maximumf %240, %241 : vector<16x2048xf32>
    %243 = arith.truncf %242 : vector<16x2048xf32> to vector<16x2048xbf16>
    %c1_90 = arith.constant 1 : index
    %c0_91 = arith.constant 0 : index
    %c0_92 = arith.constant 0 : index
    %244 = vector.load %arg9[%c1_90, %c0_91, %c0_92] : memref<2x2048x64xbf16, #tpu.memory_space<vmem>>, vector<1x2048x64xbf16>
    %245 = vector.shape_cast %244 : vector<1x2048x64xbf16> to vector<2048x64xbf16>
    %cst_93 = arith.constant dense<0.000000e+00> : vector<16x64xf32>
    %246 = tpu.matmul %243, %245, %cst_93 {dimension_numbers = #tpu.dot_dimension_numbers<[1], [0], [0], [1], [0, 0, 1, 1], [], []>} : vector<16x2048xbf16>, vector<2048x64xbf16>, vector<16x64xf32> -> vector<16x64xf32>
    %247 = vector.broadcast %149 : vector<1x64xf32> to vector<16x64xf32>
    %248 = arith.addf %246, %247 : vector<16x64xf32>
    %249 = arith.addf %232, %248 : vector<16x64xf32>
    %cst_94 = arith.constant dense<0.000000e+00> : vector<16xf32>
    %250 = vector.multi_reduction <add>, %249, %cst_94 [1] : vector<16x64xf32> to vector<16xf32>
    %251 = vector.shape_cast %250 : vector<16xf32> to vector<16x1xf32>
    %cst_95 = arith.constant 6.400000e+01 : f32
    %252 = vector.broadcast %cst_95 : f32 to vector<16x1xf32>
    %253 = arith.divf %251, %252 : vector<16x1xf32>
    %254 = vector.broadcast %253 : vector<16x1xf32> to vector<16x64xf32>
    %255 = arith.subf %249, %254 : vector<16x64xf32>
    %256 = arith.mulf %255, %255 : vector<16x64xf32>
    %cst_96 = arith.constant dense<0.000000e+00> : vector<16xf32>
    %257 = vector.multi_reduction <add>, %256, %cst_96 [1] : vector<16x64xf32> to vector<16xf32>
    %258 = vector.shape_cast %257 : vector<16xf32> to vector<16x1xf32>
    %cst_97 = arith.constant 6.400000e+01 : f32
    %259 = vector.broadcast %cst_97 : f32 to vector<16x1xf32>
    %260 = arith.divf %258, %259 : vector<16x1xf32>
    %261 = vector.broadcast %253 : vector<16x1xf32> to vector<16x64xf32>
    %262 = arith.subf %249, %261 : vector<16x64xf32>
    %cst_98 = arith.constant 9.99999974E-6 : f32
    %263 = vector.broadcast %cst_98 : f32 to vector<16x1xf32>
    %264 = arith.addf %260, %263 : vector<16x1xf32>
    %265 = math.rsqrt %264 : vector<16x1xf32>
    %266 = vector.broadcast %265 : vector<16x1xf32> to vector<16x64xf32>
    %267 = arith.mulf %262, %266 : vector<16x64xf32>
    %268 = vector.broadcast %152 : vector<1x64xf32> to vector<16x64xf32>
    %269 = arith.mulf %267, %268 : vector<16x64xf32>
    %270 = vector.broadcast %153 : vector<1x64xf32> to vector<16x64xf32>
    %271 = arith.addf %269, %270 : vector<16x64xf32>
    %c0_99 = arith.constant 0 : index
    %c0_100 = arith.constant 0 : index
    %272 = vector.load %arg11[%c0_99, %c0_100] : memref<64x128xf32, #tpu.memory_space<vmem>>, vector<64x128xf32>
    %cst_101 = arith.constant dense<0.000000e+00> : vector<16x128xf32>
    %273 = tpu.matmul %271, %272, %cst_101 {dimension_numbers = #tpu.dot_dimension_numbers<[1], [0], [0], [1], [0, 0, 1, 1], [], []>} : vector<16x64xf32>, vector<64x128xf32>, vector<16x128xf32> -> vector<16x128xf32>
    %c0_102 = arith.constant 0 : index
    %c0_103 = arith.constant 0 : index
    %274 = vector.load %arg12[%c0_102, %c0_103] : memref<1x128xf32, #tpu.memory_space<vmem>>, vector<1x128xf32>
    %275 = vector.broadcast %274 : vector<1x128xf32> to vector<16x128xf32>
    %276 = arith.addf %273, %275 : vector<16x128xf32>
    %277 = vector.shape_cast %276 : vector<16x128xf32> to vector<2x8x128xf32>
    %c0_104 = arith.constant 0 : index
    %c0_105 = arith.constant 0 : index
    %c0_106 = arith.constant 0 : index
    %278 = vector.load %arg13[%c0_104, %c0_105, %c0_106] : memref<2x8x128xf32, #tpu.memory_space<vmem>>, vector<2x8x128xf32>
    tpu.vector_store %arg13[%c0_104, %c0_105, %c0_106], %277 {strides = array<i32>} : memref<2x8x128xf32, #tpu.memory_space<vmem>>, vector<2x8x128xf32>,
    return
  }
  func.func @transform_0(%arg0: i32) -> (i32, i32) {
    %c0_i32 = arith.constant 0 : i32
    %c0_i32_0 = arith.constant 0 : i32
    return %arg0, %c0_i32 : i32, i32
  }
  func.func @transform_1(%arg0: i32) -> (i32, i32) {
    %c0_i32 = arith.constant 0 : i32
    %c0_i32_0 = arith.constant 0 : i32
    %c0_i32_1 = arith.constant 0 : i32
    return %c0_i32, %c0_i32_0 : i32, i32
  }
  func.func @transform_2(%arg0: i32) -> (i32, i32) {
    %c0_i32 = arith.constant 0 : i32
    %c0_i32_0 = arith.constant 0 : i32
    %c0_i32_1 = arith.constant 0 : i32
    return %c0_i32, %c0_i32_0 : i32, i32
  }
  func.func @transform_3(%arg0: i32) -> (i32, i32, i32) {
    %c0_i32 = arith.constant 0 : i32
    %c0_i32_0 = arith.constant 0 : i32
    %c0_i32_1 = arith.constant 0 : i32
    %c0_i32_2 = arith.constant 0 : i32
    return %c0_i32, %c0_i32_0, %c0_i32_1 : i32, i32, i32
  }
  func.func @transform_4(%arg0: i32) -> (i32, i32, i32) {
    %c0_i32 = arith.constant 0 : i32
    %c0_i32_0 = arith.constant 0 : i32
    %c0_i32_1 = arith.constant 0 : i32
    %c0_i32_2 = arith.constant 0 : i32
    return %c0_i32, %c0_i32_0, %c0_i32_1 : i32, i32, i32
  }
  func.func @transform_5(%arg0: i32) -> (i32, i32, i32) {
    %c0_i32 = arith.constant 0 : i32
    %c0_i32_0 = arith.constant 0 : i32
    %c0_i32_1 = arith.constant 0 : i32
    %c0_i32_2 = arith.constant 0 : i32
    return %c0_i32, %c0_i32_0, %c0_i32_1 : i32, i32, i32
  }
  func.func @transform_6(%arg0: i32) -> (i32, i32, i32) {
    %c0_i32 = arith.constant 0 : i32
    %c0_i32_0 = arith.constant 0 : i32
    %c0_i32_1 = arith.constant 0 : i32
    %c0_i32_2 = arith.constant 0 : i32
    return %c0_i32, %c0_i32_0, %c0_i32_1 : i32, i32, i32
  }
  func.func @transform_7(%arg0: i32) -> (i32, i32, i32) {
    %c0_i32 = arith.constant 0 : i32
    %c0_i32_0 = arith.constant 0 : i32
    %c0_i32_1 = arith.constant 0 : i32
    %c0_i32_2 = arith.constant 0 : i32
    return %c0_i32, %c0_i32_0, %c0_i32_1 : i32, i32, i32
  }
  func.func @transform_8(%arg0: i32) -> (i32, i32, i32) {
    %c0_i32 = arith.constant 0 : i32
    %c0_i32_0 = arith.constant 0 : i32
    %c0_i32_1 = arith.constant 0 : i32
    %c0_i32_2 = arith.constant 0 : i32
    return %c0_i32, %c0_i32_0, %c0_i32_1 : i32, i32, i32
  }
  func.func @transform_9(%arg0: i32) -> (i32, i32, i32) {
    %c0_i32 = arith.constant 0 : i32
    %c0_i32_0 = arith.constant 0 : i32
    %c0_i32_1 = arith.constant 0 : i32
    %c0_i32_2 = arith.constant 0 : i32
    return %c0_i32, %c0_i32_0, %c0_i32_1 : i32, i32, i32
  }
  func.func @transform_10(%arg0: i32) -> (i32, i32) {
    %c0_i32 = arith.constant 0 : i32
    %c0_i32_0 = arith.constant 0 : i32
    %c0_i32_1 = arith.constant 0 : i32
    return %c0_i32, %c0_i32_0 : i32, i32
  }
  func.func @transform_11(%arg0: i32) -> (i32, i32) {
    %c0_i32 = arith.constant 0 : i32
    %c0_i32_0 = arith.constant 0 : i32
    %c0_i32_1 = arith.constant 0 : i32
    return %c0_i32, %c0_i32_0 : i32, i32
  }
  func.func @transform_12(%arg0: i32) -> (i32, i32, i32) {
    %c0_i32 = arith.constant 0 : i32
    %c0_i32_0 = arith.constant 0 : i32
    %c0_i32_1 = arith.constant 0 : i32
    return %arg0, %c0_i32, %c0_i32_0 : i32, i32, i32
  }
}

</mosaic_0001>

<bundles_post_ra>
// kernel: transformer_forward.1
= control target key start
LH: loop header
LB: loop body
LE: loop exit
PB: predicated region body
PF: predicated region fallthrough
CT: control target
= control target key end

     0   :  { %s8748_s21 = smov 0   ;;  %s10501_s0 = inlined_call_operand.vmem [shape: f32[32,2], index: 0, kind: input, shape index: {}]   ;;  %s10502_s1 = inlined_call_operand.vmem [shape: f32[2,64], index: 1, kind: input, shape index: {}]   ;;  %s10503_s2 = inlined_call_operand.vmem [shape: f32[16,64], index: 2, kind: input, shape index: {}]   ;;  %s10504_s3 = inlined_call_operand.vmem [shape: bf16[2,64,192], index: 3, kind: input, shape index: {}]   ;;  %s10505_s4 = inlined_call_operand.vmem [shape: f32[2,1,192], index: 4, kind: input, shape index: {}]   ;;  %s10506_s5 = inlined_call_operand.vmem [shape: bf16[2,64,64], index: 5, kind: input, shape index: {}]   ;;  %s10507_s6 = inlined_call_operand.vmem [shape: bf16[2,64,2048], index: 6, kind: input, shape index: {}]   ;;  %s10508_s7 = inlined_call_operand.vmem [shape: f32[2,1,2048], index: 7, kind: input, shape index: {}]   ;;  %s10509_s8 = inlined_call_operand.vmem [shape: bf16[2,2048,64], index: 8, kind: input, shape index: {}]   ;;  %s10510_s9 = inlined_call_operand.vmem [shape: f32[2,6,64], index: 9, kind: input, shape index: {}]   ;;  %s10511_s10 = inlined_call_operand.vmem [shape: f32[64,128], index: 10, kind: input, shape index: {}]   ;;  %s10512_s11 = inlined_call_operand.vmem [shape: f32[1,128], index: 11, kind: input, shape index: {}]   ;;  %s10513_s12 = inlined_call_operand.vmem [shape: f32[4,8,128], index: 12, kind: output, shape index: {}]  }
   0x1 LB: > { %s6949_s22 = sadd.s32 4294967295, %s8673_s21   ;;  %p6953_p0 = scmp.ge.s32.totalorder %s8673_s21, 1  ;;  %s8673_s21 = sphi %s8748_s21, %s22_s21  }
   0x2   : > { %p363_p1 = scmp.lt.s32.totalorder %s8673_s21, 3 }
   0x4   : > { %p364_p2 = pnand %p6953_p0, %p363_p1 }
   0x5   : > { %s6954_s23 = sshll.u32 (!%p364_p2), %s6949_s22, 1  ;;  %v8675_v0 = vmov (!%p364_p2), 1   ;;  %v8676_v1 = vmov (!%p364_p2), 0   ;;  %v8329_v2 = vld [vmem:[%s10504_s3 + $0x4] ss:$8 sps:$4 sm:$0xff] (!%p364_p2)   ;;  %vm524_vm0 = vcmask (!%p364_p2), 523264   ;;  %v458_v30 = vlaneseq (!%p364_p2) }
   0x6   : > { %367 = sbr.rel (%p364_p2) target bundleno = 6620 (0x19dc), region = 68  ;;  %8317 = vset.pattern.permute.xlu1 (!%p364_p2), %v8675_v0  ;;  %8316 = vset.pattern.permute.xlu0 (!%p364_p2), %v8676_v1  ;;  %p406_p3 = scmp.lt.s32.totalorder (!%p364_p2), %s6954_s23, 3  ;;  %v8331_v3 = vld [vmem:[%s10504_s3] ss:$8 sps:$4 sm:$0xff] (!%p364_p2)   ;;  %v8332_v4 = vld [vmem:[%s10504_s3 + $0x14] ss:$8 sps:$4 sm:$0xff] (!%p364_p2)  }
   0x7   : > { %560 = vmatprep.mubr.bf16.mxu0 (!%p364_p2), %v8676_v1  ;;  %528 = vmatprep.subr.bf16.mxu0 (!%p364_p2), %v8329_v2  ;;  %v8334_v7 = vld [vmem:[%s10504_s3 + $0x10] ss:$8 sps:$4 sm:$0xff] (!%p364_p2)   ;;  %v8335_v8 = vld [vmem:[%s10504_s3 + $0x24] ss:$8 sps:$4 sm:$0xff] (!%p364_p2)   ;;  %v8337_v9 = vld [vmem:[%s10504_s3 + $0x20] ss:$8 sps:$4 sm:$0xff] (!%p364_p2)  }
   0x8   : > { %529 = vmatpush1.bf16.msra.mxu0 (!%p364_p2), %v8331_v3  ;;  %v8338_v10 = vld [vmem:[%s10504_s3 + $0x34] ss:$8 sps:$4 sm:$0xff] (!%p364_p2)   ;;  %v8340_v11 = vld [vmem:[%s10504_s3 + $0x30] ss:$8 sps:$4 sm:$0xff] (!%p364_p2)   ;;  %v6959_v12 = vld [vmem:[%s10502_s1 + $0x1] ss:$0 sm:$0xff] (!%p364_p2) }
   0x9   : > { %530 = vmatprep.subr.bf16.mxu0 (!%p364_p2), %v8332_v4  ;;  %v6958_v13 = vld [vmem:[%s10502_s1] ss:$0 sm:$0xff] (!%p364_p2)  ;;  %v455_v20 = vld [vmem:[%s10503_s2 + $0x8] sm:$0xff] (!%p364_p2)  ;;  %v8677_v29 = vmov (!%p364_p2), 0.0   ;;  %v8811_v31 = vshrl.u32 (!%p364_p2), %v458_v30, 7  ;;  %vm8678_vm1 = vmmov (!%p364_p2), 0  }
   0xa   : > { %v454_v18 = vld [vmem:[%s10503_s2] sm:$0xff] (!%p364_p2)  ;;  %8161 = vmatprep.subr.mxu1 (!%p364_p2), %v8677_v29  ;;  %8163 = vmatprep.mubr.msk.f32.mxu1 (!%p364_p2), %vm8678_vm1, %v8677_v29  ;;  %s8679_s22 = smov (!%p364_p2), 64   ;;  %vm574_vm2 = vcmask (!%p364_p2), 261120   ;;  %v459_v47 = vand.u32 (!%p364_p2), 127, %v458_v30  ;;  %v8680_v49 = vmov (!%p364_p2), -1e+30  }
   0xb   : > { %v8818_v32 = vsub.s32 (!%p364_p2), 0, %v8811_v31  ;;  %v472_v33 = vld [vmem:[%s10505_s4] sm:$0x3] (!%p364_p2)  ;;  %v8825_v35 = vsub.s32 (!%p364_p2), 1, %v8811_v31  ;;  %vm730_vm4 = vcmask (!%p364_p2), 64512   ;;  %s8681_s24 = smov (!%p364_p2), 32  }
   0xc   : > { %531 = vmatpush1.bf16.msra.mxu0 (!%p364_p2), %v8334_v7  ;;  %vm460_vm3 = vcmp.lt.s32.totalorder (!%p364_p2), %v459_v47, 7  ;;  %s8682_s25 = smov (!%p364_p2), 96  }
   0xd   : > { %s10515_s23 = smov (!%p406_p3, %s6954_s23), 3  ;;  %532 = vmatprep.subr.bf16.mxu0 %v8335_v8  ;;  %v477_v34 = vrot.slane %v472_v33, %v8818_v32  ;;  %v481_v39 = vrot.slane %v472_v33, %v8825_v35  ;;  %v8846_v50 = vsel %vm460_vm3, 0.0, %v8680_v49 }
   0xe   : > { %s6955_s28 = sshll.u32 %s10515_s23, 3 }
   0xf   : > { %s409_s13 = scalar_lea.vmem %s10501_s0, %s6955_s28 }
  0x10   : > { %v418_v5 = vld [vmem:[%s409_s13] sm:$0xff]  ;;  %v419_v6 = vld [vmem:[%s409_s13 + $0x8] sm:$0xff]  ;;  %533 = vmatpush1.bf16.msra.mxu0 %v8337_v9 }
  0x11   : > { %439 = vperm.xlu1 %8317, %v418_v5   ;;  %423 = vperm.xlu0 %8316, %v418_v5  }
  0x12   : > { %534 = vmatprep.subr.bf16.mxu0 %v8338_v10 }
  0x14   : > { %535 = vmatpush1.bf16.msra.mxu0 %v8340_v11 }
  0x15   : > { %443 = vperm.xlu1 %8317, %v419_v6   ;;  %428 = vperm.xlu0 %8316, %v419_v6  }
  0x16   : > { %8186 = vmatprep.subr.mxu0 %v8677_v29 }
  0x19   : > { %8328 = vset.pattern.permute.xlu0 %v8675_v0 }
  0x90   : > { %v440_v14 = vpop.permute.xlu1 %439  ;;  %v424_v15 = vpop.permute.xlu0 %423 }
  0x91   : > { %v450_v16 = vmul.f32 %v6959_v12, %v440_v14  ;;  %v435_v17 = vmul.f32 %v6958_v13, %v424_v15 }
  0x93   : > { %v452_v22 = vadd.f32 %v450_v16, %v435_v17 }
  0x94   : > { %v444_v19 = vpop.permute.xlu1 %443  ;;  %v429_v21 = vpop.permute.xlu0 %428 }
  0x95   : > { %v451_v23 = vmul.f32 %v6959_v12, %v444_v19  ;;  %v436_v24 = vmul.f32 %v6958_v13, %v429_v21  ;;  %v8802_v26 = vadd.f32 %v454_v18, %v452_v22 }
  0x97   : > { %v453_v25 = vadd.f32 %v451_v23, %v436_v24 }
  0x99   : > { %v8804_v27 = vadd.f32 %v455_v20, %v453_v25 }
  0x9b   : > { %v463_v28 = vpack.c.bf16 %v8804_v27, %v8802_v26 }
  0x9d   : > { %6968 = vmatmul.mubr.msk.bf16.vlgmr.msra.gmra.mrb[0].mxu0 %vm524_vm0, %v463_v28 }
  0x9e   : > { %8188 = vmatprep.mubr.msk.f32.mxu0 %vm8678_vm1, %v8677_v29 }
 0x170   : > { %v562_v36 = vpop.f32.mrb[0].mxu0 }
 0x171   : > { %v563_v37 = vadd.f32 %v562_v36, %v477_v34  ;;  %v564_v38 = vpop.f32.mrb[1].mxu0 }
 0x172   : > { %v566_v40 = vpop.f32.mrb[2].mxu0  ;;  %v8839_v46 = vadd.f32 %v564_v38, %v481_v39 }
 0x173   : > { %v567_v41 = vadd.f32 %v566_v40, %v477_v34  ;;  %v568_v42 = vpop.f32.mrb[3].mxu0  ;;  %572 = vrot.lane.b32.xlu0 %v563_v37, %s8679_s22 }
 0x174   : > { %v8829_v43 = vadd.f32 %v568_v42, %v481_v39 }
 0x175   : > { %650 = vrot.lane.b32.xlu1 %v567_v41, %s8679_s22 }
 0x1e5   : > { %v573_v44 = vpop.permute.xlu0 %572 }
 0x1e6   : > { %8162 = vmatpush3.xpose.msk.msra.mxu1 %vm574_vm2, %v573_v44 }
 0x1e7   : > { %8166 = vmatprep.subr.mxu1 %v8677_v29  ;;  %v651_v45 = vpop.permute.xlu1 %650 }
 0x1e9   : > { %8164 = vmatmul.mubr.msk.f32.vlgmr.msra.gmra.mrb[0].mxu1 %vm574_vm2, %v563_v37 }
 0x1ea   : > { %8167 = vmatpush3.xpose.msk.msra.mxu1 %vm574_vm2, %v651_v45  ;;  %8168 = vmatprep.mubr.msk.f32.mxu1 %vm8678_vm1, %v8677_v29 }
 0x1eb   : > { %8171 = vmatprep.subr.mxu1 %v8677_v29 }
 0x1ed   : > { %8169 = vmatmul.mubr.msk.f32.vlgmr.msra.gmra.mrb[2].mxu1 %vm574_vm2, %v567_v41 }
 0x1ee   : > { %8172 = vmatpush3.msra.mxu1 %v8839_v46  ;;  %8173 = vmatprep.mubr.msk.f32.mxu1 %vm8678_vm1, %v8677_v29 }
 0x1ef   : > { %8176 = vmatprep.subr.mxu1 %v8677_v29 }
 0x2bc   : > { %v645_v48 = vpop.f32.mrb[0].mxu1 }
 0x2bd   : > { %v726_v51 = vmul.f32 0.17677669, %v645_v48  ;;  %v8165_v52 = vpop.f32.mrb[1].mxu1 }
 0x2bf   : > { %v728_v53 = vadd.f32 %v726_v51, %v8846_v50 }
 0x2c0   : > { %v722_v54 = vpop.f32.mrb[2].mxu1 }
 0x2c1   : > { %v727_v55 = vmul.f32 0.17677669, %v722_v54  ;;  %v8170_v56 = vpop.f32.mrb[3].mxu1  ;;  %v731_v57 = vsel %vm730_vm4, %v728_v53, -inf }
 0x2c2   : > { %732 = vmax.xlane.f32.xlu0 %v731_v57  ;;  %v8342_v57 = vld [vmem:[%s10506_s5 + $0x8] sm:$0xff]  }
 0x2c3   : > { %v729_v58 = vadd.f32 %v727_v55, %v8846_v50 }
 0x2c5   : > { %v734_v59 = vsel %vm730_vm4, %v729_v58, -inf }
 0x2c6   : > { %735 = vmax.xlane.f32.xlu1 %v734_v59  ;;  %v8344_v59 = vld [vmem:[%s10506_s5 + $0x18] sm:$0xff]  }
 0x2d7   : > { %901 = vrot.lane.b32.xlu1 %v563_v37, %s8681_s24 }
 0x2db   : > { %899 = vrot.lane.b32.xlu1 %v563_v37, %s8682_s25 }
 0x2df   : > { %977 = vrot.lane.b32.xlu1 %v567_v41, %s8682_s25 }
 0x34f   : > { %v733_v60 = vpop.xlane.xlu0 %732 }
 0x350   : > { %v737_v61 = vsub.f32 %v728_v53, %v733_v60 }
 0x352   : > { %v739_v62 = vmul.f32 1.442695, %v737_v61 }
 0x353   : > { %v736_v63 = vpop.xlane.xlu1 %735 }
 0x354   : > { %8617 = vpow2.f32 %v739_v62  ;;  %v738_v0 = vsub.f32 %v729_v58, %v736_v63  ;;  %v8343_v58 = vld [vmem:[%s10506_s5 + $0x10] sm:$0xff]  }
 0x356   : > { %v741_v2 = vmul.f32 1.442695, %v738_v0 }
 0x357   : > { %v902_v7 = vpop.permute.xlu1 %901 }
 0x358   : > { %8619 = vpow2.f32 %v741_v2 }
 0x35b   : > { %v900_v10 = vpop.permute.xlu1 %899 }
 0x35e   : > { %v8618_v3 = vpop.eup %8617 }
 0x35f   : > { %v743_v4 = vsel %vm730_vm4, %v8618_v3, 0.0  ;;  %v978_v13 = vpop.permute.xlu1 %977 }
 0x360   : > { %744 = vadd.xlane.f32.xlu0 %v743_v4 }
 0x362   : > { %v8620_v5 = vpop.eup %8619 }
 0x363   : > { %v746_v6 = vsel %vm730_vm4, %v8620_v5, 0.0 }
 0x364   : > { %747 = vadd.xlane.f32.xlu0 %v746_v6 }
 0x37a   : > { %979 = vrot.lane.b32.xlu0 %v567_v41, %s8681_s24 }
 0x3ed   : > { %v745_v8 = vpop.xlane.xlu0 %744 }
 0x3ee   : > { %8621 = vrcp.f32 %v745_v8  ;;  %v8918_v8 = vld [vmem:[%s10510_s9] sm:$0x3f] }
 0x3f1   : > { %v748_v9 = vpop.xlane.xlu0 %747 }
 0x3f2   : > { %8623 = vrcp.f32 %v748_v9  ;;  %v1257_v9 = vrot.slane %v8918_v8, %v8818_v32 }
 0x3f5   : > { %v980_v11 = vpop.permute.xlu0 %979 }
 0x3f6   : > { %8187 = vmatpush3.xpose.msk.msra.mxu0 %vm574_vm2, %v980_v11 }
 0x3f7   : > { %8196 = vmatprep.subr.mxu0 %v8677_v29 }
 0x3f8   : > { %v8622_v12 = vpop.eup %8621 }
 0x3f9   : > { %v751_v14 = vmul.f32 %v8622_v12, %v8618_v3  ;;  %8189 = vmatmul.mubr.msk.f32.vlgmr.msra.gmra.mrb[4].mxu0 %vm574_vm2, %v978_v13 }
 0x3fa   : > { %8198 = vmatprep.mubr.msk.f32.mxu0 %vm8678_vm1, %v8677_v29 }
 0x3fb   : > { %8174 = vmatmul.mubr.msk.f32.vlgmr.msra.gmra.mrb[4].mxu1 %vm730_vm4, %v751_v14 }
 0x3fc   : > { %v8624_v15 = vpop.eup %8623  ;;  %8177 = vmatpush3.msra.mxu1 %v8829_v43  ;;  %8178 = vmatprep.mubr.msk.f32.mxu1 %vm8678_vm1, %v8677_v29 }
 0x3fd   : > { %v752_v16 = vmul.f32 %v8624_v15, %v8620_v5  ;;  %8181 = vmatprep.subr.mxu1 %v8677_v29 }
 0x3ff   : > { %8179 = vmatmul.mubr.msk.f32.vlgmr.msra.gmra.mrb[6].mxu1 %vm730_vm4, %v752_v16 }
 0x400   : > { %8183 = vmatprep.mubr.msk.f32.mxu1 %vm8678_vm1, %v8677_v29 }
 0x403   : > { %8182 = vmatpush3.xpose.msk.msra.mxu1 %vm574_vm2, %v902_v7 }
 0x404   : > { %8191 = vmatprep.subr.mxu1 %v8677_v29 }
 0x406   : > { %8184 = vmatmul.mubr.msk.f32.vlgmr.msra.gmra.mrb[8].mxu1 %vm574_vm2, %v900_v10 }
 0x407   : > { %8193 = vmatprep.mubr.msk.f32.mxu1 %vm8678_vm1, %v8677_v29 }
 0x4cc   : > { %v1051_v17 = vpop.f32.mrb[4].mxu0 }
 0x4cd   : > { %v1056_v18 = vmul.f32 0.17677669, %v1051_v17  ;;  %v8190_v19 = vpop.f32.mrb[5].mxu0 }
 0x4ce   : > { %v8876_v20 = vpop.f32.mrb[4].mxu1 }
 0x4cf   : > { %v8175_v21 = vpop.f32.mrb[5].mxu1  ;;  %v1058_v22 = vadd.f32 %v1056_v18, %v8846_v50 }
 0x4d1   : > { %v1062_v23 = vsel %vm730_vm4, %v1058_v22, -inf }
 0x4d2   : > { %1063 = vmax.xlane.f32.xlu1 %v1062_v23  ;;  %v895_v24 = vpop.f32.mrb[6].mxu1 }
 0x4d3   : > { %v8180_v25 = vpop.f32.mrb[7].mxu1 }
 0x4d9   : > { %v973_v28 = vpop.f32.mrb[8].mxu1 }
 0x4da   : > { %v1055_v30 = vmul.f32 0.17677669, %v973_v28  ;;  %v8185_v33 = vpop.f32.mrb[9].mxu1 }
 0x4db   : > { %v1368_v33 = vld [vmem:[%s10507_s6] sm:$0xff] }
 0x4dc   : > { %v1057_v34 = vadd.f32 %v1055_v30, %v8846_v50 }
 0x4de   : > { %v1059_v36 = vsel %vm730_vm4, %v1057_v34, -inf }
 0x4df   : > { %1060 = vmax.xlane.f32.xlu0 %v1059_v36  ;;  %v1369_v36 = vld [vmem:[%s10507_s6 + $0x8] sm:$0xff] }
 0x4e3   : > { %1082 = vrot.lane.b32.xlu1 %v8839_v46, %s8682_s25 }
 0x55f   : > { %v1064_v37 = vpop.xlane.xlu1 %1063 }
 0x560   : > { %v1066_v38 = vsub.f32 %v1058_v22, %v1064_v37 }
 0x562   : > { %v1069_v39 = vmul.f32 1.442695, %v1066_v38  ;;  %v1377_v38 = vld [vmem:[%s10507_s6 + $0x48] sm:$0xff] }
 0x563   : > { %v1083_v40 = vpop.permute.xlu1 %1082 }
 0x564   : > { %8625 = vpow2.f32 %v1069_v39  ;;  %8192 = vmatpush3.msra.mxu1 %v1083_v40  ;;  %v6988_v40 = vcombine.low %v1369_v36, %v1377_v38 }
 0x565   : > { %8201 = vmatprep.subr.bf16.mxu1 %v8677_v29 }
 0x56c   : > { %v1061_v41 = vpop.xlane.xlu0 %1060 }
 0x56d   : > { %v1065_v42 = vsub.f32 %v1057_v34, %v1061_v41  ;;  %v1376_v34 = vld [vmem:[%s10507_s6 + $0x40] sm:$0xff]  ;;  %v6989_v41 = vcombine.high %v1369_v36, %v1377_v38  ;;  %v1394_v36 = vld [vmem:[%s10507_s6 + $0xd0] sm:$0xff] }
 0x56e   : > { %v8626_v44 = vpop.eup %8625  ;;  %v6987_v37 = vcombine.high %v1368_v33, %v1376_v34  ;;  %v6986_v39 = vcombine.low %v1368_v33, %v1376_v34  ;;  %v1386_v34 = vld [vmem:[%s10507_s6 + $0x90] sm:$0xff] }
 0x56f   : > { %v1067_v45 = vmul.f32 1.442695, %v1065_v42  ;;  %v1074_v47 = vsel %vm730_vm4, %v8626_v44, 0.0  ;;  %v1384_v42 = vld [vmem:[%s10507_s6 + $0x80] sm:$0xff] }
 0x570   : > { %1075 = vadd.xlane.f32.xlu0 %v1074_v47 }
 0x571   : > { %8627 = vpow2.f32 %v1067_v45  ;;  %v1385_v45 = vld [vmem:[%s10507_s6 + $0x88] sm:$0xff] }
 0x57b   : > { %v8628_v48 = vpop.eup %8627 }
 0x57c   : > { %v1071_v49 = vsel %vm730_vm4, %v8628_v48, 0.0 }
 0x57d   : > { %1072 = vadd.xlane.f32.xlu0 %v1071_v49 }
 0x593   : > { %1159 = vrot.lane.b32.xlu0 %v8829_v43, %s8682_s25  ;;  %v8341_v43 = vld [vmem:[%s10506_s5] sm:$0xff]  }
 0x5fd   : > { %v1076_v46 = vpop.xlane.xlu0 %1075 }
 0x5fe   : > { %8629 = vrcp.f32 %v1076_v46 }
 0x608   : > { %v8630_v52 = vpop.eup %8629 }
 0x609   : > { %v1080_v53 = vmul.f32 %v8630_v52, %v8626_v44  ;;  %v1392_v44 = vld [vmem:[%s10507_s6 + $0xc0] sm:$0xff] }
 0x60a   : > { %v1073_v51 = vpop.xlane.xlu0 %1072  ;;  %v7003_v47 = vcombine.high %v1384_v42, %v1392_v44  ;;  %v7002_v49 = vcombine.low %v1384_v42, %v1392_v44  ;;  %v1400_v52 = vld [vmem:[%s10507_s6 + $0x100] sm:$0xff]  ;;  %v1410_v42 = vld [vmem:[%s10507_s6 + $0x150] sm:$0xff]  ;;  %v1403_v44 = vld [vmem:[%s10507_s6 + $0x118] sm:$0xff] }
 0x60b   : > { %8631 = vrcp.f32 %v1073_v51 }
 0x60e   : > { %v1160_v54 = vpop.permute.xlu0 %1159 }
 0x60f   : > { %8197 = vmatpush3.msra.mxu0 %v1160_v54  ;;  %v1401_v54 = vld [vmem:[%s10507_s6 + $0x108] sm:$0xff] }
 0x610   : > { %8199 = vmatmul.mubr.msk.f32.vlgmr.msra.gmra.mrb[6].mxu0 %vm730_vm4, %v1080_v53  ;;  %1839 = vmatprep.subr.bf16.mxu0 %v6987_v37  ;;  %v1408_v53 = vld [vmem:[%s10507_s6 + $0x140] sm:$0xff] }
 0x611   : > { %1871 = vmatprep.mubr.bf16.mxu0 %v8676_v1  ;;  %1840 = vmatpush1.bf16.msra.mxu0 %v6986_v39  ;;  %v7007_v39 = vcombine.high %v1386_v34, %v1394_v36 }
 0x612   : > { %1841 = vmatprep.subr.bf16.mxu0 %v7003_v47  ;;  %v7006_v47 = vcombine.low %v1386_v34, %v1394_v36  ;;  %v1374_v36 = vld [vmem:[%s10507_s6 + $0x30] sm:$0xff] }
 0x615   : > { %v8632_v55 = vpop.eup %8631  ;;  %1842 = vmatpush1.bf16.msra.mxu0 %v7002_v49 }
 0x616   : > { %v1079_v56 = vmul.f32 %v8632_v55, %v8628_v48  ;;  %v1393_v48 = vld [vmem:[%s10507_s6 + $0xc8] sm:$0xff]  ;;  %v7019_v55 = vcombine.high %v1400_v52, %v1408_v53 }
 0x617   : > { %v7004_v46 = vcombine.low %v1385_v45, %v1393_v48  ;;  %v7005_v51 = vcombine.high %v1385_v45, %v1393_v48  ;;  %v1411_v45 = vld [vmem:[%s10507_s6 + $0x158] sm:$0xff] }
 0x618   : > { %8194 = vmatmul.mubr.msk.f32.vlgmr.msra.gmra.mrb[10].mxu1 %vm730_vm4, %v1079_v56  ;;  %v1409_v56 = vld [vmem:[%s10507_s6 + $0x148] sm:$0xff]  ;;  %1843 = vmatprep.subr.bf16.mxu0 %v7019_v55 }
 0x619   : > { %8209 = vmatprep.mubr.msk.bf16.mxu1 %vm8678_vm1, %v8677_v29  ;;  %8202 = vmatpush3.bf16.msra.mxu1 %v8341_v43  ;;  %v7018_v43 = vcombine.low %v1400_v52, %v1408_v53  ;;  %v1426_v52 = vld [vmem:[%s10507_s6 + $0x1d0] sm:$0xff]  ;;  %v1419_v53 = vld [vmem:[%s10507_s6 + $0x198] sm:$0xff] }
 0x61a   : > { %8203 = vmatprep.subr.bf16.mxu1 %v8677_v29 }
 0x61b   : > { %1844 = vmatpush1.bf16.msra.mxu0 %v7018_v43 }
 0x61d   : > { %8204 = vmatpush3.bf16.msra.mxu1 %v8342_v57  ;;  %v7020_v57 = vcombine.low %v1401_v54, %v1409_v56 }
 0x61e   : > { %8205 = vmatprep.subr.bf16.mxu1 %v8677_v29 }
 0x621   : > { %8206 = vmatpush3.bf16.msra.mxu1 %v8343_v58  ;;  %v7021_v58 = vcombine.high %v1401_v54, %v1409_v56  ;;  %v1427_v54 = vld [vmem:[%s10507_s6 + $0x1d8] sm:$0xff]  ;;  %v7024_v56 = vcombine.low %v1403_v44, %v1411_v45 }
 0x622   : > { %8207 = vmatprep.subr.bf16.mxu1 %v8677_v29 }
 0x625   : > { %8208 = vmatpush3.bf16.msra.mxu1 %v8344_v59  ;;  %v1416_v59 = vld [vmem:[%s10507_s6 + $0x180] sm:$0xff] }
 0x626   : > { %1882 = vmatprep.subr.bf16.mxu1 %v6989_v41  ;;  %v1402_v41 = vld [vmem:[%s10507_s6 + $0x110] sm:$0xff] }
 0x627   : > { %v7023_v49 = vcombine.high %v1402_v41, %v1410_v42  ;;  %v7022_v55 = vcombine.low %v1402_v41, %v1410_v42 }
 0x6e3   : > { %v1231_v60 = vpop.f32.mrb[6].mxu0 }
 0x6e4   : > { %v8200_v61 = vpop.f32.mrb[7].mxu0 }
 0x6e5   : > { %v1417_v61 = vld [vmem:[%s10507_s6 + $0x188] sm:$0xff] }
 0x6eb   : > { %v1154_v62 = vpop.f32.mrb[10].mxu1 }
 0x6ec   : > { %v8318_v63 = vpack.i.bf16 %v1231_v60, %v1154_v62  ;;  %v8195_v0 = vpop.f32.mrb[11].mxu1  ;;  %v1424_v60 = vld [vmem:[%s10507_s6 + $0x1c0] sm:$0xff] }
 0x6ed   : > { %v7035_v62 = vcombine.high %v1416_v59, %v1424_v60  ;;  %v7034_v0 = vcombine.low %v1416_v59, %v1424_v60  ;;  %v1380_v59 = vld [vmem:[%s10507_s6 + $0x60] sm:$0xff]  ;;  %v1373_v60 = vld [vmem:[%s10507_s6 + $0x28] sm:$0xff] }
 0x6ee   : > { %8319 = vrot.lane.b32.xlu1 %v8318_v63, %s8681_s24  ;;  %v1425_v63 = vld [vmem:[%s10507_s6 + $0x1c8] sm:$0xff] }
 0x6ef   : > { %1845 = vmatprep.subr.bf16.mxu0 %v7035_v62 }
 0x6f0   : > { %1846 = vmatpush1.bf16.msra.mxu0 %v7034_v0 }
 0x760   : > { %v8320_v2 = vpop.permute.xlu1 %8319 }
 0x761   : > { %v8322_v3 = vunpack.i.h.bf16 %v8320_v2  ;;  %v8321_v4 = vunpack.i.l.bf16 %v8320_v2  ;;  %v7036_v2 = vcombine.low %v1417_v61, %v1425_v63 }
 0x763   : > { %v1244_v5 = vsel %vm574_vm2, %v895_v24, %v8322_v3  ;;  %v1243_v6 = vsel %vm574_vm2, %v8876_v20, %v8321_v4  ;;  %v7037_v3 = vcombine.high %v1417_v61, %v1425_v63  ;;  %v1370_v4 = vld [vmem:[%s10507_s6 + $0x10] sm:$0xff]  ;;  %v1381_v61 = vld [vmem:[%s10507_s6 + $0x68] sm:$0xff]  ;;  %v7040_v63 = vcombine.low %v1419_v53, %v1427_v54 }
 0x764   : > { %v1245_v7 = vpack.c.bf16 %v1244_v5, %v1243_v6  ;;  %v1378_v5 = vld [vmem:[%s10507_s6 + $0x50] sm:$0xff]  ;;  %v1371_v6 = vld [vmem:[%s10507_s6 + $0x18] sm:$0xff] }
 0x766   : > { %8210 = vmatmul.mubr.msk.bf16.vlgmr.msra.gmra.mrb[12].mxu1 %vm524_vm0, %v1245_v7  ;;  %v6991_v7 = vcombine.high %v1370_v4, %v1378_v5 }
 0x767   : > { %1914 = vmatprep.mubr.bf16.mxu1 %v8676_v1  ;;  %1883 = vmatpush1.bf16.msra.mxu1 %v6988_v40 }
 0x768   : > { %1884 = vmatprep.subr.bf16.mxu1 %v7005_v51  ;;  %1925 = vmatprep.subr.bf16.mxu0 %v6991_v7  ;;  %v1418_v51 = vld [vmem:[%s10507_s6 + $0x190] sm:$0xff] }
 0x769   : > { %v7039_v43 = vcombine.high %v1418_v51, %v1426_v52  ;;  %v7038_v62 = vcombine.low %v1418_v51, %v1426_v52 }
 0x76b   : > { %1885 = vmatpush1.bf16.msra.mxu1 %v7004_v46  ;;  %v7025_v46 = vcombine.high %v1403_v44, %v1411_v45  ;;  %v1390_v45 = vld [vmem:[%s10507_s6 + $0xb0] sm:$0xff] }
 0x76c   : > { %1886 = vmatprep.subr.bf16.mxu1 %v7021_v58  ;;  %v1372_v58 = vld [vmem:[%s10507_s6 + $0x20] sm:$0xff] }
 0x76d   : > { %v6995_v0 = vcombine.high %v1372_v58, %v1380_v59  ;;  %v6994_v7 = vcombine.low %v1372_v58, %v1380_v59 }
 0x76f   : > { %1887 = vmatpush1.bf16.msra.mxu1 %v7020_v57  ;;  %v7041_v57 = vcombine.high %v1419_v53, %v1427_v54  ;;  %v1406_v54 = vld [vmem:[%s10507_s6 + $0x130] sm:$0xff] }
 0x770   : > { %1888 = vmatprep.subr.bf16.mxu1 %v7037_v3  ;;  %v1388_v3 = vld [vmem:[%s10507_s6 + $0xa0] sm:$0xff] }
 0x773   : > { %1889 = vmatpush1.bf16.msra.mxu1 %v7036_v2  ;;  %v6997_v2 = vcombine.high %v1373_v60, %v1381_v61 }
 0x839   : > { %v1319_v10 = vpop.f32.mrb[12].mxu1 }
 0x83a   : > { %v1320_v11 = vadd.f32 %v1319_v10, %v1257_v9  ;;  %v8211_v12 = vpop.f32.mrb[13].mxu1  ;;  %v6990_v10 = vcombine.low %v1370_v4, %v1378_v5  ;;  %v1396_v4 = vld [vmem:[%s10507_s6 + $0xe0] sm:$0xff]  ;;  %v1389_v5 = vld [vmem:[%s10507_s6 + $0xa8] sm:$0xff] }
 0x83b   : > { %v1322_v13 = vpop.f32.mrb[14].mxu1 }
 0x83c   : > { %v1323_v14 = vadd.f32 %v1322_v13, %v1257_v9  ;;  %v8212_v15 = vpop.f32.mrb[15].mxu1  ;;  %v1326_v16 = vadd.f32 %v1320_v11, %v8802_v26  ;;  %v1379_v9 = vld [vmem:[%s10507_s6 + $0x58] sm:$0xff] }
 0x83d   : > { %v6992_v11 = vcombine.low %v1371_v6, %v1379_v9  ;;  %v6993_v12 = vcombine.high %v1371_v6, %v1379_v9  ;;  %v1397_v6 = vld [vmem:[%s10507_s6 + $0xe8] sm:$0xff]  ;;  %v6996_v9 = vcombine.low %v1373_v60, %v1381_v61  ;;  %v1422_v61 = vld [vmem:[%s10507_s6 + $0x1b0] sm:$0xff] }
 0x83e   : > { %v1328_v17 = vsel %vm524_vm0, %v1326_v16, 0.0  ;;  %v1327_v18 = vadd.f32 %v1323_v14, %v8804_v27 }
 0x83f   : > { %1329 = vadd.xlane.f32.xlu1 %v1328_v17  ;;  %1968 = vmatprep.subr.bf16.mxu1 %v6993_v12  ;;  %v1404_v12 = vld [vmem:[%s10507_s6 + $0x120] sm:$0xff] }
 0x840   : > { %v1331_v19 = vsel %vm524_vm0, %v1327_v18, 0.0 }
 0x841   : > { %1332 = vadd.xlane.f32.xlu0 %v1331_v19  ;;  %v8997_v19 = vsub.s32 2, %v8811_v31 }
 0x8cc   : > { %v1330_v20 = vpop.xlane.xlu1 %1329 }
 0x8cd   : > { %v1335_v21 = vmul.f32 0.015625, %v1330_v20  ;;  %v1358_v20 = vrot.slane %v8918_v8, %v8997_v19 }
 0x8ce   : > { %v1333_v22 = vpop.xlane.xlu0 %1332 }
 0x8cf   : > { %v8926_v23 = vsub.f32 %v1326_v16, %v1335_v21  ;;  %v1336_v24 = vmul.f32 0.015625, %v1333_v22  ;;  %v9002_v21 = vsub.s32 3, %v8811_v31 }
 0x8d1   : > { %v8928_v25 = vsub.f32 %v1327_v18, %v1336_v24  ;;  %v1339_v28 = vmul.f32 %v8926_v23, %v8926_v23 }
 0x8d3   : > { %v1341_v26 = vsel %vm524_vm0, %v1339_v28, 0.0  ;;  %v1340_v27 = vmul.f32 %v8928_v25, %v8928_v25 }
 0x8d4   : > { %1342 = vadd.xlane.f32.xlu0 %v1341_v26  ;;  %v1364_v26 = vrot.slane %v8918_v8, %v9002_v21  ;;  %v1395_v8 = vld [vmem:[%s10507_s6 + $0xd8] sm:$0xff] }
 0x8d5   : > { %v1344_v30 = vsel %vm524_vm0, %v1340_v27, 0.0 }
 0x8d6   : > { %1345 = vadd.xlane.f32.xlu1 %v1344_v30 }
 0x961   : > { %v1343_v13 = vpop.xlane.xlu0 %1342 }
 0x962   : > { %v1347_v14 = vmul.f32 0.015625, %v1343_v13  ;;  %v1412_v13 = vld [vmem:[%s10507_s6 + $0x160] sm:$0xff] }
 0x963   : > { %v1346_v15 = vpop.xlane.xlu1 %1345 }
 0x964   : > { %v1349_v16 = vadd.f32 1e-05, %v1347_v14  ;;  %v1348_v17 = vmul.f32 0.015625, %v1346_v15  ;;  %v1405_v14 = vld [vmem:[%s10507_s6 + $0x128] sm:$0xff] }
 0x965   : > { %v1413_v15 = vld [vmem:[%s10507_s6 + $0x168] sm:$0xff] }
 0x966   : > { %8633 = vrsqrt.f32 %v1349_v16  ;;  %v1350_v18 = vadd.f32 1e-05, %v1348_v17  ;;  %v7010_v16 = vcombine.low %v1388_v3, %v1396_v4  ;;  %v7012_v17 = vcombine.low %v1389_v5, %v1397_v6 }
 0x968   : > { %8635 = vrsqrt.f32 %v1350_v18  ;;  %v7027_v18 = vcombine.high %v1404_v12, %v1412_v13 }
 0x970   : > { %v8634_v22 = vpop.eup %8633 }
 0x971   : > { %v1353_v24 = vmul.f32 %v8634_v22, %v8926_v23  ;;  %v1387_v23 = vld [vmem:[%s10507_s6 + $0x98] sm:$0xff]  ;;  %v1420_v22 = vld [vmem:[%s10507_s6 + $0x1a0] sm:$0xff] }
 0x972   : > { %v8636_v28 = vpop.eup %8635  ;;  %v7009_v40 = vcombine.high %v1387_v23, %v1395_v8  ;;  %v7008_v48 = vcombine.low %v1387_v23, %v1395_v8  ;;  %v1382_v23 = vld [vmem:[%s10507_s6 + $0x70] sm:$0xff]  ;;  %v1375_v8 = vld [vmem:[%s10507_s6 + $0x38] sm:$0xff] }
 0x973   : > { %v1359_v27 = vmul.f32 %v1358_v20, %v1353_v24  ;;  %v1354_v30 = vmul.f32 %v8636_v28, %v8928_v25  ;;  %v1428_v24 = vld [vmem:[%s10507_s6 + $0x1e0] sm:$0xff]  ;;  %v1421_v28 = vld [vmem:[%s10507_s6 + $0x1a8] sm:$0xff]  ;;  %v6999_v42 = vcombine.high %v1374_v36, %v1382_v23 }
 0x975   : > { %v1360_v33 = vmul.f32 %v1358_v20, %v1354_v30  ;;  %v9020_v37 = vadd.f32 %v1364_v26, %v1359_v27  ;;  %v7029_v20 = vcombine.high %v1405_v14, %v1413_v15  ;;  %v7026_v27 = vcombine.low %v1404_v12, %v1412_v13  ;;  %v8348_v12 = vld [vmem:[%s10509_s8 + $0x80] sm:$0xff]   ;;  %v8349_v13 = vld [vmem:[%s10509_s8 + $0x48] sm:$0xff]  }
 0x976   : > { %v7028_v30 = vcombine.low %v1405_v14, %v1413_v15  ;;  %v8350_v14 = vld [vmem:[%s10509_s8 + $0xc8] sm:$0xff]  }
 0x977   : > { %v9022_v25 = vadd.f32 %v1364_v26, %v1360_v33  ;;  %v1429_v26 = vld [vmem:[%s10507_s6 + $0x1e8] sm:$0xff]  ;;  %v7043_v33 = vcombine.high %v1420_v22, %v1428_v24 }
 0x978   : > { %v7045_v34 = vcombine.high %v1421_v28, %v1429_v26  ;;  %v7044_v41 = vcombine.low %v1421_v28, %v1429_v26  ;;  %v8351_v15 = vld [vmem:[%s10509_s8 + $0x8] sm:$0xff]   ;;  %v8359_v28 = vld [vmem:[%s10509_s8 + $0x18] sm:$0xff]  }
 0x979   : > { %v9026_v38 = vpack.c.bf16 %v9022_v25, %v9020_v37  ;;  %v8360_v26 = vld [vmem:[%s10509_s8 + $0x98] sm:$0xff]  }
 0x97b   : > { %7050 = vmatmul.mubr.msk.bf16.vlgmr.msra.gmra.mrb[8].mxu0 %vm524_vm0, %v9026_v38  ;;  %7051 = vmatmul.mubr.msk.bf16.vlgmr.msra.gmra.mrb[16].mxu1 %vm524_vm0, %v9026_v38 }
 0x97c   : > { %1926 = vmatpush1.bf16.msra.mxu0 %v6990_v10  ;;  %1969 = vmatpush1.bf16.msra.mxu1 %v6992_v11  ;;  %v7011_v10 = vcombine.high %v1388_v3, %v1396_v4  ;;  %v7013_v11 = vcombine.high %v1389_v5, %v1397_v6 }
 0x97d   : > { %1927 = vmatprep.subr.bf16.mxu0 %v7007_v39  ;;  %1970 = vmatprep.subr.bf16.mxu1 %v7009_v40  ;;  %v1383_v39 = vld [vmem:[%s10507_s6 + $0x78] sm:$0xff]  ;;  %v7042_v40 = vcombine.low %v1420_v22, %v1428_v24 }
 0x97e   : > { %1957 = vmatprep.mubr.bf16.mxu0 %v8676_v1  ;;  %2000 = vmatprep.mubr.bf16.mxu1 %v8676_v1  ;;  %v7001_v44 = vcombine.high %v1375_v8, %v1383_v39  ;;  %v7000_v51 = vcombine.low %v1375_v8, %v1383_v39  ;;  %v8357_v22 = vld [vmem:[%s10509_s8 + $0x58] sm:$0xff]   ;;  %v8367_v8 = vld [vmem:[%s10509_s8 + $0x28] sm:$0xff]  }
 0x97f   : > { %v8358_v24 = vld [vmem:[%s10509_s8 + $0xd8] sm:$0xff]   ;;  %v8368_v39 = vld [vmem:[%s10509_s8 + $0xa8] sm:$0xff]  }
 0x980   : > { %1928 = vmatpush1.bf16.msra.mxu0 %v7006_v47  ;;  %1971 = vmatpush1.bf16.msra.mxu1 %v7008_v48  ;;  %v1398_v47 = vld [vmem:[%s10507_s6 + $0xf0] sm:$0xff]  ;;  %v1391_v48 = vld [vmem:[%s10507_s6 + $0xb8] sm:$0xff] }
 0x981   : > { %1929 = vmatprep.subr.bf16.mxu0 %v7023_v49  ;;  %1972 = vmatprep.subr.bf16.mxu1 %v7025_v46  ;;  %v1399_v49 = vld [vmem:[%s10507_s6 + $0xf8] sm:$0xff]  ;;  %v6998_v46 = vcombine.low %v1374_v36, %v1382_v23  ;;  %v7015_v52 = vcombine.high %v1390_v45, %v1398_v47  ;;  %v8365_v36 = vld [vmem:[%s10509_s8 + $0x68] sm:$0xff]  }
 0x982   : > { %v7017_v53 = vcombine.high %v1391_v48, %v1399_v49  ;;  %v7016_v58 = vcombine.low %v1391_v48, %v1399_v49  ;;  %v8366_v23 = vld [vmem:[%s10509_s8 + $0xe8] sm:$0xff]   ;;  %v8375_v48 = vld [vmem:[%s10509_s8 + $0x38] sm:$0xff]  }
 0x983   : > { %v8376_v49 = vld [vmem:[%s10509_s8 + $0xb8] sm:$0xff]  }
 0x984   : > { %1930 = vmatpush1.bf16.msra.mxu0 %v7022_v55  ;;  %1973 = vmatpush1.bf16.msra.mxu1 %v7024_v56  ;;  %v1414_v55 = vld [vmem:[%s10507_s6 + $0x170] sm:$0xff]  ;;  %v1407_v56 = vld [vmem:[%s10507_s6 + $0x138] sm:$0xff] }
 0x985   : > { %1931 = vmatprep.subr.bf16.mxu0 %v7039_v43  ;;  %1974 = vmatprep.subr.bf16.mxu1 %v7041_v57  ;;  %v1415_v43 = vld [vmem:[%s10507_s6 + $0x178] sm:$0xff]  ;;  %v7014_v57 = vcombine.low %v1390_v45, %v1398_v47  ;;  %v7031_v59 = vcombine.high %v1406_v54, %v1414_v55 }
 0x986   : > { %v7033_v60 = vcombine.high %v1407_v56, %v1415_v43  ;;  %v7032_v3 = vcombine.low %v1407_v56, %v1415_v43  ;;  %v8373_v45 = vld [vmem:[%s10509_s8 + $0x78] sm:$0xff]  }
 0x987   : > { %v8374_v47 = vld [vmem:[%s10509_s8 + $0xf8] sm:$0xff]  }
 0x988   : > { %1932 = vmatpush1.bf16.msra.mxu0 %v7038_v62  ;;  %1975 = vmatpush1.bf16.msra.mxu1 %v7040_v63  ;;  %v1430_v62 = vld [vmem:[%s10507_s6 + $0x1f0] sm:$0xff]  ;;  %v1423_v63 = vld [vmem:[%s10507_s6 + $0x1b8] sm:$0xff] }
 0x989   : > { %2011 = vmatprep.subr.bf16.mxu0 %v6995_v0  ;;  %2054 = vmatprep.subr.bf16.mxu1 %v6997_v2  ;;  %v1431_v0 = vld [vmem:[%s10507_s6 + $0x1f8] sm:$0xff]  ;;  %v7030_v2 = vcombine.low %v1406_v54, %v1414_v55  ;;  %v7047_v4 = vcombine.high %v1422_v61, %v1430_v62  ;;  %v7046_v6 = vcombine.low %v1422_v61, %v1430_v62 }
 0x98a   : > { %v7049_v5 = vcombine.high %v1423_v63, %v1431_v0 }
 0x98b   : > { %7052 = vmatmul.mubr.msk.bf16.vlgmr.msra.gmra.mrb[12].mxu0 %vm524_vm0, %v9026_v38  ;;  %7053 = vmatmul.mubr.msk.bf16.vlgmr.msra.gmra.mrb[20].mxu1 %vm524_vm0, %v9026_v38 }
 0x98c   : > { %2012 = vmatpush1.bf16.msra.mxu0 %v6994_v7  ;;  %2055 = vmatpush1.bf16.msra.mxu1 %v6996_v9  ;;  %v7048_v7 = vcombine.low %v1423_v63, %v1431_v0  ;;  %v8345_v9 = vld [vmem:[%s10509_s8 + $0x40] sm:$0xff]  }
 0x98d   : > { %2013 = vmatprep.subr.bf16.mxu0 %v7011_v10  ;;  %2056 = vmatprep.subr.bf16.mxu1 %v7013_v11  ;;  %v8346_v10 = vld [vmem:[%s10509_s8 + $0xc0] sm:$0xff]  }
 0x98e   : > { %2043 = vmatprep.mubr.bf16.mxu0 %v8676_v1  ;;  %2086 = vmatprep.mubr.bf16.mxu1 %v8676_v1  ;;  %v8347_v11 = vld [vmem:[%s10509_s8] sm:$0xff]  }
 0x990   : > { %2014 = vmatpush1.bf16.msra.mxu0 %v7010_v16  ;;  %2057 = vmatpush1.bf16.msra.mxu1 %v7012_v17  ;;  %v8352_v16 = vld [vmem:[%s10509_s8 + $0x88] sm:$0xff]   ;;  %v8353_v17 = vld [vmem:[%s10509_s8 + $0x50] sm:$0xff]  }
 0x991   : > { %2015 = vmatprep.subr.bf16.mxu0 %v7027_v18  ;;  %2058 = vmatprep.subr.bf16.mxu1 %v7029_v20  ;;  %v8355_v18 = vld [vmem:[%s10509_s8 + $0x10] sm:$0xff]  }
 0x992   : > { %v8356_v20 = vld [vmem:[%s10509_s8 + $0x90] sm:$0xff]  }
 0x994   : > { %2016 = vmatpush1.bf16.msra.mxu0 %v7026_v27  ;;  %2059 = vmatpush1.bf16.msra.mxu1 %v7028_v30  ;;  %v8361_v27 = vld [vmem:[%s10509_s8 + $0x60] sm:$0xff]  }
 0x995   : > { %2017 = vmatprep.subr.bf16.mxu0 %v7043_v33  ;;  %2060 = vmatprep.subr.bf16.mxu1 %v7045_v34  ;;  %v8362_v30 = vld [vmem:[%s10509_s8 + $0xe0] sm:$0xff]  }
 0x996   : > { %v8363_v33 = vld [vmem:[%s10509_s8 + $0x20] sm:$0xff]  }
 0x997   : > { %v8364_v34 = vld [vmem:[%s10509_s8 + $0xa0] sm:$0xff]  }
 0x998   : > { %2018 = vmatpush1.bf16.msra.mxu0 %v7042_v40  ;;  %2061 = vmatpush1.bf16.msra.mxu1 %v7044_v41  ;;  %v8369_v40 = vld [vmem:[%s10509_s8 + $0x70] sm:$0xff]  }
 0x999   : > { %2097 = vmatprep.subr.bf16.mxu0 %v6999_v42  ;;  %2140 = vmatprep.subr.bf16.mxu1 %v7001_v44  ;;  %v8370_v41 = vld [vmem:[%s10509_s8 + $0xf0] sm:$0xff]  }
 0x99a   : > { %v8371_v42 = vld [vmem:[%s10509_s8 + $0x30] sm:$0xff]  }
 0x99b   : > { %7054 = vmatmul.mubr.msk.bf16.vlgmr.msra.gmra.mrb[16].mxu0 %vm524_vm0, %v9026_v38  ;;  %7055 = vmatmul.mubr.msk.bf16.vlgmr.msra.gmra.mrb[24].mxu1 %vm524_vm0, %v9026_v38  ;;  %v8372_v44 = vld [vmem:[%s10509_s8 + $0xb0] sm:$0xff]  }
 0x99c   : > { %2098 = vmatpush1.bf16.msra.mxu0 %v6998_v46  ;;  %2141 = vmatpush1.bf16.msra.mxu1 %v7000_v51  ;;  %v8377_v46 = vld [vmem:[%s10509_s8 + $0x140] sm:$0xff]  }
 0x99d   : > { %2099 = vmatprep.subr.bf16.mxu0 %v7015_v52  ;;  %2142 = vmatprep.subr.bf16.mxu1 %v7017_v53  ;;  %v8378_v51 = vld [vmem:[%s10509_s8 + $0x1c0] sm:$0xff]  }
 0x99e   : > { %2129 = vmatprep.mubr.bf16.mxu0 %v8676_v1  ;;  %2172 = vmatprep.mubr.bf16.mxu1 %v8676_v1  ;;  %v1432_v52 = vld [vmem:[%s10508_s7] sm:$0xff] }
 0x99f   : > { %v1439_v53 = vrot.slane %v1432_v52, %v8818_v32  ;;  %v1447_v54 = vrot.slane %v1432_v52, %v8997_v19  ;;  %v1443_v55 = vrot.slane %v1432_v52, %v8825_v35  ;;  %v1451_v56 = vrot.slane %v1432_v52, %v9002_v21 }
 0x9a0   : > { %2100 = vmatpush1.bf16.msra.mxu0 %v7014_v57  ;;  %2143 = vmatpush1.bf16.msra.mxu1 %v7016_v58 }
 0x9a1   : > { %2101 = vmatprep.subr.bf16.mxu0 %v7031_v59  ;;  %2144 = vmatprep.subr.bf16.mxu1 %v7033_v60 }
 0x9a4   : > { %2102 = vmatpush1.bf16.msra.mxu0 %v7030_v2  ;;  %2145 = vmatpush1.bf16.msra.mxu1 %v7032_v3 }
 0x9a5   : > { %2103 = vmatprep.subr.bf16.mxu0 %v7047_v4  ;;  %2146 = vmatprep.subr.bf16.mxu1 %v7049_v5 }
 0x9a8   : > { %2104 = vmatpush1.bf16.msra.mxu0 %v7046_v6  ;;  %2147 = vmatpush1.bf16.msra.mxu1 %v7048_v7 }
 0x9a9   : > { %7778 = vmatprep.subr.bf16.mxu0 %v8345_v9  ;;  %7800 = vmatprep.subr.bf16.mxu1 %v8346_v10 }
 0x9ab   : > { %7056 = vmatmul.mubr.msk.bf16.vlgmr.msra.gmra.mrb[20].mxu0 %vm524_vm0, %v9026_v38  ;;  %7057 = vmatmul.mubr.msk.bf16.vlgmr.msra.gmra.mrb[28].mxu1 %vm524_vm0, %v9026_v38  ;;  %v8354_v38 = vld [vmem:[%s10509_s8 + $0xd0] sm:$0xff]  }
 0x9ac   : > { %7779 = vmatpush3.bf16.msra.mxu0 %v8347_v11  ;;  %7801 = vmatpush3.bf16.msra.mxu1 %v8348_v12 }
 0x9ad   : > { %7780 = vmatprep.subr.bf16.mxu0 %v8349_v13  ;;  %7802 = vmatprep.subr.bf16.mxu1 %v8350_v14 }
 0x9b0   : > { %7781 = vmatpush3.bf16.msra.mxu0 %v8351_v15  ;;  %7803 = vmatpush3.bf16.msra.mxu1 %v8352_v16 }
 0x9b1   : > { %7782 = vmatprep.subr.bf16.mxu0 %v8353_v17  ;;  %7804 = vmatprep.subr.bf16.mxu1 %v8354_v38 }
 0x9b4   : > { %7783 = vmatpush3.bf16.msra.mxu0 %v8355_v18  ;;  %7805 = vmatpush3.bf16.msra.mxu1 %v8356_v20 }
 0x9b5   : > { %7784 = vmatprep.subr.bf16.mxu0 %v8357_v22  ;;  %7806 = vmatprep.subr.bf16.mxu1 %v8358_v24  ;;  %v8379_v24 = vld [vmem:[%s10509_s8 + $0x100] sm:$0xff]  }
 0x9b8   : > { %7785 = vmatpush3.bf16.msra.mxu0 %v8359_v28  ;;  %7807 = vmatpush3.bf16.msra.mxu1 %v8360_v26  ;;  %v8380_v28 = vld [vmem:[%s10509_s8 + $0x180] sm:$0xff]   ;;  %v8381_v26 = vld [vmem:[%s10509_s8 + $0x148] sm:$0xff]  }
 0x9b9   : > { %7786 = vmatprep.subr.bf16.mxu0 %v8361_v27  ;;  %7808 = vmatprep.subr.bf16.mxu1 %v8362_v30  ;;  %v8382_v27 = vld [vmem:[%s10509_s8 + $0x1c8] sm:$0xff]   ;;  %v9292_v30 = vsub.s32 4, %v8811_v31 }
 0x9bc   : > { %7787 = vmatpush3.bf16.msra.mxu0 %v8363_v33  ;;  %7809 = vmatpush3.bf16.msra.mxu1 %v8364_v34  ;;  %v9295_v33 = vsub.s32 6, %v8811_v31  ;;  %v9298_v34 = vsub.s32 5, %v8811_v31 }
 0x9bd   : > { %7788 = vmatprep.subr.bf16.mxu0 %v8365_v36  ;;  %7810 = vmatprep.subr.bf16.mxu1 %v8366_v23  ;;  %v9301_v36 = vsub.s32 7, %v8811_v31  ;;  %v8383_v23 = vld [vmem:[%s10509_s8 + $0x108] sm:$0xff]   ;;  %v8385_v31 = vld [vmem:[%s10509_s8 + $0x150] sm:$0xff]  }
 0x9c0   : > { %7789 = vmatpush3.bf16.msra.mxu0 %v8367_v8  ;;  %7811 = vmatpush3.bf16.msra.mxu1 %v8368_v39  ;;  %v8384_v8 = vld [vmem:[%s10509_s8 + $0x188] sm:$0xff]   ;;  %v1455_v39 = vrot.slane %v1432_v52, %v9292_v30 }
 0x9c1   : > { %7790 = vmatprep.subr.bf16.mxu0 %v8369_v40  ;;  %7812 = vmatprep.subr.bf16.mxu1 %v8370_v41  ;;  %v1463_v40 = vrot.slane %v1432_v52, %v9295_v33  ;;  %v8386_v41 = vld [vmem:[%s10509_s8 + $0x1d0] sm:$0xff]  }
 0x9c4   : > { %7791 = vmatpush3.bf16.msra.mxu0 %v8371_v42  ;;  %7813 = vmatpush3.bf16.msra.mxu1 %v8372_v44  ;;  %v1459_v42 = vrot.slane %v1432_v52, %v9298_v34  ;;  %v1467_v44 = vrot.slane %v1432_v52, %v9301_v36  ;;  %v8389_v52 = vld [vmem:[%s10509_s8 + $0x158] sm:$0xff]  }
 0x9c5   : > { %7792 = vmatprep.subr.bf16.mxu0 %v8373_v45  ;;  %7814 = vmatprep.subr.bf16.mxu1 %v8374_v47 }
 0x9c8   : > { %7793 = vmatpush3.bf16.msra.mxu0 %v8375_v48  ;;  %7815 = vmatpush3.bf16.msra.mxu1 %v8376_v49  ;;  %v8387_v48 = vld [vmem:[%s10509_s8 + $0x110] sm:$0xff]  }
 0x9c9   : > { %7822 = vmatprep.subr.bf16.mxu0 %v8377_v46  ;;  %7844 = vmatprep.subr.bf16.mxu1 %v8378_v51  ;;  %v8388_v49 = vld [vmem:[%s10509_s8 + $0x190] sm:$0xff]  }
 0xa4e   : > { %v1873_v43 = vpop.f32.mrb[8].mxu0  ;;  %v1916_v57 = vpop.f32.mrb[16].mxu1 }
 0xa4f   : > { %v1874_v58 = vadd.f32 %v1873_v43, %v1439_v53  ;;  %v1917_v59 = vadd.f32 %v1916_v57, %v1447_v54  ;;  %v1875_v60 = vpop.f32.mrb[9].mxu0  ;;  %v1918_v61 = vpop.f32.mrb[17].mxu1 }
 0xa50   : > { %v1876_v62 = vadd.f32 %v1875_v60, %v1443_v55  ;;  %v1919_v63 = vadd.f32 %v1918_v61, %v1451_v56  ;;  %v1877_v0 = vpop.f32.mrb[10].mxu0  ;;  %v1920_v2 = vpop.f32.mrb[18].mxu1 }
 0xa51   : > { %v1878_v3 = vadd.f32 %v1877_v0, %v1439_v53  ;;  %v1921_v4 = vadd.f32 %v1920_v2, %v1447_v54  ;;  %v1879_v5 = vpop.f32.mrb[11].mxu0  ;;  %v1922_v6 = vpop.f32.mrb[19].mxu1  ;;  %v2183_v10 = vmax.f32 %v1874_v58, 0.0  ;;  %v2185_v11 = vmax.f32 %v1917_v59, 0.0  ;;  %v8391_v2 = vld [vmem:[%s10509_s8 + $0x118] sm:$0xff]  }
 0xa52   : > { %v1880_v7 = vadd.f32 %v1879_v5, %v1443_v55  ;;  %v1923_v9 = vadd.f32 %v1922_v6, %v1451_v56  ;;  %v2184_v14 = vmax.f32 %v1876_v62, 0.0  ;;  %v2186_v15 = vmax.f32 %v1919_v63, 0.0  ;;  %v8390_v55 = vld [vmem:[%s10509_s8 + $0x1d8] sm:$0xff]  }
 0xa53   : > { %v2199_v12 = vmax.f32 %v1878_v3, 0.0  ;;  %v2201_v13 = vmax.f32 %v1921_v4, 0.0  ;;  %v8392_v3 = vld [vmem:[%s10509_s8 + $0x198] sm:$0xff]  }
 0xa54   : > { %v2200_v16 = vmax.f32 %v1880_v7, 0.0  ;;  %v2202_v17 = vmax.f32 %v1923_v9, 0.0  ;;  %v8393_v9 = vld [vmem:[%s10509_s8 + $0x160] sm:$0xff]  }
 0xa55   : > { %v2215_v38 = vpack.c.bf16 %v2199_v12, %v2183_v10  ;;  %v2217_v18 = vpack.c.bf16 %v2201_v13, %v2185_v11  ;;  %v8394_v10 = vld [vmem:[%s10509_s8 + $0x1e0] sm:$0xff]  }
 0xa56   : > { %v2216_v20 = vpack.c.bf16 %v2200_v16, %v2184_v14  ;;  %v2218_v22 = vpack.c.bf16 %v2202_v17, %v2186_v15 }
 0xa58   : > { %3291 = vmatprep.mubr.bf16.mxu0 %v2216_v20  ;;  %3332 = vmatprep.mubr.bf16.mxu1 %v2218_v22  ;;  %v8396_v20 = vld [vmem:[%s10509_s8 + $0x1a0] sm:$0xff]   ;;  %v8397_v22 = vld [vmem:[%s10509_s8 + $0x168] sm:$0xff]  }
 0xa59   : > { %3292 = vmatmul.mubr.bf16.vlgmr.msra.gmra.mrb[24].mxu0 %v2215_v38  ;;  %3333 = vmatmul.mubr.bf16.vlgmr.msra.gmra.mrb[32].mxu1 %v2217_v18  ;;  %v8395_v18 = vld [vmem:[%s10509_s8 + $0x120] sm:$0xff]  }
 0xa5a   : > { %7823 = vmatpush3.bf16.msra.mxu0 %v8379_v24  ;;  %7845 = vmatpush3.bf16.msra.mxu1 %v8380_v28  ;;  %v8398_v24 = vld [vmem:[%s10509_s8 + $0x1e8] sm:$0xff]  }
 0xa5b   : > { %7824 = vmatprep.subr.bf16.mxu0 %v8381_v26  ;;  %7846 = vmatprep.subr.bf16.mxu1 %v8382_v27  ;;  %v9362_v28 = vld [vmem:[%s10508_s7 + $0x8] sm:$0xff] }
 0xa5c   : > { %v8399_v26 = vld [vmem:[%s10509_s8 + $0x128] sm:$0xff]  }
 0xa5d   : > { %v8400_v27 = vld [vmem:[%s10509_s8 + $0x1a8] sm:$0xff]  }
 0xa5e   : > { %v1959_v45 = vpop.f32.mrb[12].mxu0  ;;  %v2002_v47 = vpop.f32.mrb[20].mxu1  ;;  %7825 = vmatpush3.bf16.msra.mxu0 %v8383_v23  ;;  %7847 = vmatpush3.bf16.msra.mxu1 %v8384_v8  ;;  %v1471_v23 = vrot.slane %v9362_v28, %v8818_v32  ;;  %v1479_v8 = vrot.slane %v9362_v28, %v8997_v19 }
 0xa5f   : > { %v1960_v46 = vadd.f32 %v1959_v45, %v1455_v39  ;;  %v2003_v51 = vadd.f32 %v2002_v47, %v1463_v40  ;;  %v1961_v53 = vpop.f32.mrb[13].mxu0  ;;  %v2004_v54 = vpop.f32.mrb[21].mxu1  ;;  %7826 = vmatprep.subr.bf16.mxu0 %v8385_v31  ;;  %7848 = vmatprep.subr.bf16.mxu1 %v8386_v41  ;;  %v1475_v31 = vrot.slane %v9362_v28, %v8825_v35  ;;  %v8403_v45 = vld [vmem:[%s10509_s8 + $0x130] sm:$0xff]  }
 0xa60   : > { %v1962_v56 = vadd.f32 %v1961_v53, %v1459_v42  ;;  %v2005_v43 = vadd.f32 %v2004_v54, %v1467_v44  ;;  %v1963_v57 = vpop.f32.mrb[14].mxu0  ;;  %v2006_v58 = vpop.f32.mrb[22].mxu1  ;;  %v1483_v41 = vrot.slane %v9362_v28, %v9002_v21  ;;  %v8404_v47 = vld [vmem:[%s10509_s8 + $0x1b0] sm:$0xff]   ;;  %v8405_v53 = vld [vmem:[%s10509_s8 + $0x178] sm:$0xff]  }
 0xa61   : > { %v1964_v59 = vadd.f32 %v1963_v57, %v1455_v39  ;;  %v2007_v60 = vadd.f32 %v2006_v58, %v1463_v40  ;;  %v1965_v61 = vpop.f32.mrb[15].mxu0  ;;  %v2008_v62 = vpop.f32.mrb[23].mxu1  ;;  %v2187_v4 = vmax.f32 %v1960_v46, 0.0  ;;  %v2189_v5 = vmax.f32 %v2003_v51, 0.0  ;;  %v8401_v39 = vld [vmem:[%s10509_s8 + $0x170] sm:$0xff]   ;;  %v8406_v54 = vld [vmem:[%s10509_s8 + $0x1f8] sm:$0xff]  }
 0xa62   : > { %v1966_v63 = vadd.f32 %v1965_v61, %v1459_v42  ;;  %v2009_v0 = vadd.f32 %v2008_v62, %v1467_v44  ;;  %7827 = vmatpush3.bf16.msra.mxu0 %v8387_v48  ;;  %7849 = vmatpush3.bf16.msra.mxu1 %v8388_v49  ;;  %v2188_v11 = vmax.f32 %v1962_v56, 0.0  ;;  %v2190_v12 = vmax.f32 %v2005_v43, 0.0  ;;  %v8402_v40 = vld [vmem:[%s10509_s8 + $0x1f0] sm:$0xff]  }
 0xa63   : > { %v2203_v6 = vmax.f32 %v1964_v59, 0.0  ;;  %v2205_v7 = vmax.f32 %v2007_v60, 0.0  ;;  %7828 = vmatprep.subr.bf16.mxu0 %v8389_v52  ;;  %7850 = vmatprep.subr.bf16.mxu1 %v8390_v55 }
 0xa64   : > { %v2204_v13 = vmax.f32 %v1966_v63, 0.0  ;;  %v2206_v14 = vmax.f32 %v2009_v0, 0.0  ;;  %v8407_v63 = vld [vmem:[%s10509_s8 + $0x138] sm:$0xff]  }
 0xa65   : > { %v9343_v15 = vpack.c.bf16 %v2203_v6, %v2187_v4  ;;  %v9345_v16 = vpack.c.bf16 %v2205_v7, %v2189_v5  ;;  %v8408_v0 = vld [vmem:[%s10509_s8 + $0x1b8] sm:$0xff]   ;;  %v8409_v6 = vld [vmem:[%s10509_s8 + $0x240] sm:$0xff]  }
 0xa66   : > { %v2220_v17 = vpack.c.bf16 %v2204_v13, %v2188_v11  ;;  %v2222_v38 = vpack.c.bf16 %v2206_v14, %v2190_v12  ;;  %7829 = vmatpush3.bf16.msra.mxu0 %v8391_v2  ;;  %7851 = vmatpush3.bf16.msra.mxu1 %v8392_v3  ;;  %v8410_v7 = vld [vmem:[%s10509_s8 + $0x2c0] sm:$0xff]  }
 0xa67   : > { %7830 = vmatprep.subr.bf16.mxu0 %v8393_v9  ;;  %7852 = vmatprep.subr.bf16.mxu1 %v8394_v10 }
 0xa68   : > { %3373 = vmatprep.mubr.bf16.mxu0 %v2220_v17  ;;  %3414 = vmatprep.mubr.bf16.mxu1 %v2222_v38 }
 0xa6a   : > { %7831 = vmatpush3.bf16.msra.mxu0 %v8395_v18  ;;  %7853 = vmatpush3.bf16.msra.mxu1 %v8396_v20  ;;  %v8411_v18 = vld [vmem:[%s10509_s8 + $0x200] sm:$0xff]  }
 0xa6b   : > { %7832 = vmatprep.subr.bf16.mxu0 %v8397_v22  ;;  %7854 = vmatprep.subr.bf16.mxu1 %v8398_v24  ;;  %v8412_v20 = vld [vmem:[%s10509_s8 + $0x280] sm:$0xff]   ;;  %v8413_v22 = vld [vmem:[%s10509_s8 + $0x248] sm:$0xff]  }
 0xa6c   : > { %v8414_v24 = vld [vmem:[%s10509_s8 + $0x2c8] sm:$0xff]  }
 0xa6e   : > { %v2045_v42 = vpop.f32.mrb[16].mxu0  ;;  %v2088_v44 = vpop.f32.mrb[24].mxu1  ;;  %7833 = vmatpush3.bf16.msra.mxu0 %v8399_v26  ;;  %7855 = vmatpush3.bf16.msra.mxu1 %v8400_v27  ;;  %v8415_v26 = vld [vmem:[%s10509_s8 + $0x208] sm:$0xff]   ;;  %v1487_v27 = vrot.slane %v9362_v28, %v9292_v30 }
 0xa6f   : > { %v2046_v48 = vadd.f32 %v2045_v42, %v1471_v23  ;;  %v2089_v49 = vadd.f32 %v2088_v44, %v1479_v8  ;;  %v2047_v46 = vpop.f32.mrb[17].mxu0  ;;  %v2090_v51 = vpop.f32.mrb[25].mxu1  ;;  %7834 = vmatprep.subr.bf16.mxu0 %v8401_v39  ;;  %7856 = vmatprep.subr.bf16.mxu1 %v8402_v40  ;;  %v1499_v39 = vrot.slane %v9362_v28, %v9301_v36  ;;  %v8418_v40 = vld [vmem:[%s10509_s8 + $0x2d0] sm:$0xff]  }
 0xa70   : > { %v2048_v52 = vadd.f32 %v2047_v46, %v1475_v31  ;;  %v2091_v55 = vadd.f32 %v2090_v51, %v1483_v41  ;;  %v2049_v56 = vpop.f32.mrb[18].mxu0  ;;  %v2092_v43 = vpop.f32.mrb[26].mxu1  ;;  %v8419_v42 = vld [vmem:[%s10509_s8 + $0x210] sm:$0xff]  }
 0xa71   : > { %v2050_v57 = vadd.f32 %v2049_v56, %v1471_v23  ;;  %v2093_v58 = vadd.f32 %v2092_v43, %v1479_v8  ;;  %v2051_v59 = vpop.f32.mrb[19].mxu0  ;;  %v2094_v60 = vpop.f32.mrb[27].mxu1  ;;  %v2191_v2 = vmax.f32 %v2046_v48, 0.0  ;;  %v2193_v3 = vmax.f32 %v2089_v49, 0.0  ;;  %v8421_v49 = vld [vmem:[%s10509_s8 + $0x258] sm:$0xff]  }
 0xa72   : > { %v2052_v61 = vadd.f32 %v2051_v59, %v1475_v31  ;;  %v2095_v62 = vadd.f32 %v2094_v60, %v1483_v41  ;;  %7835 = vmatpush3.bf16.msra.mxu0 %v8403_v45  ;;  %7857 = vmatpush3.bf16.msra.mxu1 %v8404_v47  ;;  %v2192_v9 = vmax.f32 %v2048_v52, 0.0  ;;  %v2194_v10 = vmax.f32 %v2091_v55, 0.0  ;;  %v8422_v52 = vld [vmem:[%s10509_s8 + $0x2d8] sm:$0xff]  }
 0xa73   : > { %v2207_v4 = vmax.f32 %v2050_v57, 0.0  ;;  %v2209_v5 = vmax.f32 %v2093_v58, 0.0  ;;  %7836 = vmatprep.subr.bf16.mxu0 %v8405_v53  ;;  %7858 = vmatprep.subr.bf16.mxu1 %v8406_v54  ;;  %v1495_v23 = vrot.slane %v9362_v28, %v9295_v33  ;;  %v1491_v8 = vrot.slane %v9362_v28, %v9298_v34  ;;  %v8420_v28 = vld [vmem:[%s10509_s8 + $0x290] sm:$0xff]   ;;  %v8423_v60 = vld [vmem:[%s10509_s8 + $0x218] sm:$0xff]  }
 0xa74   : > { %v2208_v11 = vmax.f32 %v2052_v61, 0.0  ;;  %v2210_v12 = vmax.f32 %v2095_v62, 0.0 }
 0xa75   : > { %v9408_v13 = vpack.c.bf16 %v2207_v4, %v2191_v2  ;;  %v9410_v14 = vpack.c.bf16 %v2209_v5, %v2193_v3  ;;  %v8424_v2 = vld [vmem:[%s10509_s8 + $0x298] sm:$0xff]   ;;  %v8425_v3 = vld [vmem:[%s10509_s8 + $0x260] sm:$0xff]  }
 0xa76   : > { %v2224_v17 = vpack.c.bf16 %v2208_v11, %v2192_v9  ;;  %v2226_v38 = vpack.c.bf16 %v2210_v12, %v2194_v10  ;;  %7837 = vmatpush3.bf16.msra.mxu0 %v8407_v63  ;;  %7859 = vmatpush3.bf16.msra.mxu1 %v8408_v0  ;;  %v8426_v9 = vld [vmem:[%s10509_s8 + $0x2e0] sm:$0xff]  }
 0xa77   : > { %7866 = vmatprep.subr.bf16.mxu0 %v8409_v6  ;;  %7888 = vmatprep.subr.bf16.mxu1 %v8410_v7 }
 0xa79   : > { %3374 = vmatmul.mubr.bf16.vlgmr.msra.gmra.mrb[28].mxu0 %v9343_v15  ;;  %3415 = vmatmul.mubr.bf16.vlgmr.msra.gmra.mrb[36].mxu1 %v9345_v16  ;;  %v8416_v15 = vld [vmem:[%s10509_s8 + $0x288] sm:$0xff]   ;;  %v8417_v16 = vld [vmem:[%s10509_s8 + $0x250] sm:$0xff]  }
 0xa7a   : > { %7867 = vmatpush3.bf16.msra.mxu0 %v8411_v18  ;;  %3455 = vmatprep.mubr.bf16.mxu0 %v2224_v17  ;;  %v8428_v18 = vld [vmem:[%s10509_s8 + $0x2a0] sm:$0xff]  }
 0xa7b   : > { %7889 = vmatpush3.bf16.msra.mxu1 %v8412_v20  ;;  %3496 = vmatprep.mubr.bf16.mxu1 %v2226_v38  ;;  %v8427_v38 = vld [vmem:[%s10509_s8 + $0x220] sm:$0xff]   ;;  %v8429_v20 = vld [vmem:[%s10509_s8 + $0x268] sm:$0xff]  }
 0xa7c   : > { %7868 = vmatprep.subr.bf16.mxu0 %v8413_v22  ;;  %7890 = vmatprep.subr.bf16.mxu1 %v8414_v24  ;;  %v8430_v22 = vld [vmem:[%s10509_s8 + $0x2e8] sm:$0xff]  }
 0xa7d   : > { %v8431_v24 = vld [vmem:[%s10509_s8 + $0x228] sm:$0xff]  }
 0xa7e   : > { %v2131_v31 = vpop.f32.mrb[20].mxu0  ;;  %v2174_v41 = vpop.f32.mrb[28].mxu1  ;;  %7869 = vmatpush3.bf16.msra.mxu0 %v8415_v26  ;;  %v8432_v26 = vld [vmem:[%s10509_s8 + $0x2a8] sm:$0xff]  }
 0xa7f   : > { %v2132_v44 = vadd.f32 %v2131_v31, %v1487_v27  ;;  %v2175_v45 = vadd.f32 %v2174_v41, %v1495_v23  ;;  %7891 = vmatpush3.bf16.msra.mxu1 %v8416_v15  ;;  %v2133_v47 = vpop.f32.mrb[21].mxu0  ;;  %v2176_v48 = vpop.f32.mrb[29].mxu1  ;;  %7870 = vmatprep.subr.bf16.mxu0 %v8417_v16  ;;  %v8435_v15 = vld [vmem:[%s10509_s8 + $0x230] sm:$0xff]   ;;  %v8440_v31 = vld [vmem:[%s10509_s8 + $0x2b8] sm:$0xff]   ;;  %v8441_v41 = vld [vmem:[%s10509_s8 + $0x340] sm:$0xff]  }
 0xa80   : > { %v2134_v46 = vadd.f32 %v2133_v47, %v1491_v8  ;;  %v2177_v51 = vadd.f32 %v2176_v48, %v1499_v39  ;;  %v2135_v53 = vpop.f32.mrb[22].mxu0  ;;  %v2178_v54 = vpop.f32.mrb[30].mxu1  ;;  %7892 = vmatprep.subr.bf16.mxu1 %v8418_v40  ;;  %v8436_v16 = vld [vmem:[%s10509_s8 + $0x2b0] sm:$0xff]   ;;  %v8439_v40 = vld [vmem:[%s10509_s8 + $0x238] sm:$0xff]   ;;  %v8445_v47 = vld [vmem:[%s10509_s8 + $0x348] sm:$0xff]  }
 0xa81   : > { %v2136_v55 = vadd.f32 %v2135_v53, %v1487_v27  ;;  %v2179_v56 = vadd.f32 %v2178_v54, %v1495_v23  ;;  %v2137_v43 = vpop.f32.mrb[23].mxu0  ;;  %v2180_v57 = vpop.f32.mrb[31].mxu1  ;;  %v2195_v61 = vmax.f32 %v2132_v44, 0.0  ;;  %v2197_v62 = vmax.f32 %v2175_v45, 0.0  ;;  %v8433_v27 = vld [vmem:[%s10509_s8 + $0x270] sm:$0xff]   ;;  %v8443_v44 = vld [vmem:[%s10509_s8 + $0x300] sm:$0xff]  }
 0xa82   : > { %v2138_v58 = vadd.f32 %v2137_v43, %v1491_v8  ;;  %v2181_v59 = vadd.f32 %v2180_v57, %v1499_v39  ;;  %7871 = vmatpush3.bf16.msra.mxu0 %v8419_v42  ;;  %v2196_v4 = vmax.f32 %v2134_v46, 0.0  ;;  %v2198_v5 = vmax.f32 %v2177_v51, 0.0  ;;  %v8434_v23 = vld [vmem:[%s10509_s8 + $0x2f0] sm:$0xff]   ;;  %v8437_v8 = vld [vmem:[%s10509_s8 + $0x278] sm:$0xff]   ;;  %v8442_v42 = vld [vmem:[%s10509_s8 + $0x3c0] sm:$0xff]  }
 0xa83   : > { %v2211_v63 = vmax.f32 %v2136_v55, 0.0  ;;  %v2213_v0 = vmax.f32 %v2179_v56, 0.0  ;;  %7893 = vmatpush3.bf16.msra.mxu1 %v8420_v28  ;;  %7872 = vmatprep.subr.bf16.mxu0 %v8421_v49  ;;  %v8438_v39 = vld [vmem:[%s10509_s8 + $0x2f8] sm:$0xff]   ;;  %v8444_v45 = vld [vmem:[%s10509_s8 + $0x380] sm:$0xff]   ;;  %v8446_v48 = vld [vmem:[%s10509_s8 + $0x3c8] sm:$0xff]  }
 0xa84   : > { %v2212_v6 = vmax.f32 %v2138_v58, 0.0  ;;  %v2214_v7 = vmax.f32 %v2181_v59, 0.0  ;;  %7894 = vmatprep.subr.bf16.mxu1 %v8422_v52  ;;  %v8447_v28 = vld [vmem:[%s10509_s8 + $0x308] sm:$0xff]   ;;  %v8451_v46 = vld [vmem:[%s10509_s8 + $0x310] sm:$0xff]   ;;  %v8453_v53 = vld [vmem:[%s10509_s8 + $0x358] sm:$0xff]  }
 0xa85   : > { %v9470_v10 = vpack.c.bf16 %v2211_v63, %v2195_v61  ;;  %v9472_v11 = vpack.c.bf16 %v2213_v0, %v2197_v62  ;;  %v8448_v49 = vld [vmem:[%s10509_s8 + $0x388] sm:$0xff]   ;;  %v8452_v51 = vld [vmem:[%s10509_s8 + $0x390] sm:$0xff]   ;;  %v8454_v54 = vld [vmem:[%s10509_s8 + $0x3d8] sm:$0xff]  }
 0xa86   : > { %v2228_v12 = vpack.c.bf16 %v2212_v6, %v2196_v4  ;;  %v2230_v17 = vpack.c.bf16 %v2214_v7, %v2198_v5  ;;  %7873 = vmatpush3.bf16.msra.mxu0 %v8423_v60  ;;  %v8455_v52 = vld [vmem:[%s10509_s8 + $0x318] sm:$0xff]   ;;  %v8457_v56 = vld [vmem:[%s10509_s8 + $0x360] sm:$0xff]   ;;  %v8461_v59 = vld [vmem:[%s10509_s8 + $0x368] sm:$0xff]  }
 0xa87   : > { %7895 = vmatpush3.bf16.msra.mxu1 %v8424_v2  ;;  %7874 = vmatprep.subr.bf16.mxu0 %v8425_v3  ;;  %v8456_v55 = vld [vmem:[%s10509_s8 + $0x398] sm:$0xff]   ;;  %v8458_v43 = vld [vmem:[%s10509_s8 + $0x3e0] sm:$0xff]   ;;  %v8462_v60 = vld [vmem:[%s10509_s8 + $0x3e8] sm:$0xff]  }
 0xa88   : > { %7896 = vmatprep.subr.bf16.mxu1 %v8426_v9  ;;  %v8459_v57 = vld [vmem:[%s10509_s8 + $0x320] sm:$0xff]   ;;  %v8463_v61 = vld [vmem:[%s10509_s8 + $0x328] sm:$0xff]   ;;  %v8465_v63 = vld [vmem:[%s10509_s8 + $0x370] sm:$0xff]  }
 0xa89   : > { %v8460_v58 = vld [vmem:[%s10509_s8 + $0x3a0] sm:$0xff]   ;;  %v8464_v62 = vld [vmem:[%s10509_s8 + $0x3a8] sm:$0xff]   ;;  %v8466_v0 = vld [vmem:[%s10509_s8 + $0x3f0] sm:$0xff]  }
 0xa8a   : > { %7875 = vmatpush3.bf16.msra.mxu0 %v8427_v38  ;;  %v8467_v2 = vld [vmem:[%s10509_s8 + $0x330] sm:$0xff]   ;;  %v8469_v4 = vld [vmem:[%s10509_s8 + $0x378] sm:$0xff]  }
 0xa8b   : > { %7897 = vmatpush3.bf16.msra.mxu1 %v8428_v18  ;;  %7876 = vmatprep.subr.bf16.mxu0 %v8429_v20  ;;  %v8468_v3 = vld [vmem:[%s10509_s8 + $0x3b0] sm:$0xff]   ;;  %v8470_v5 = vld [vmem:[%s10509_s8 + $0x3f8] sm:$0xff]  }
 0xa8c   : > { %7898 = vmatprep.subr.bf16.mxu1 %v8430_v22  ;;  %v8471_v6 = vld [vmem:[%s10509_s8 + $0x338] sm:$0xff]  }
 0xa8d   : > { %v8472_v7 = vld [vmem:[%s10509_s8 + $0x3b8] sm:$0xff]  }
 0xa8e   : > { %7877 = vmatpush3.bf16.msra.mxu0 %v8431_v24 }
 0xa8f   : > { %7899 = vmatpush3.bf16.msra.mxu1 %v8432_v26  ;;  %7878 = vmatprep.subr.bf16.mxu0 %v8433_v27 }
 0xa90   : > { %7900 = vmatprep.subr.bf16.mxu1 %v8434_v23 }
 0xa92   : > { %7879 = vmatpush3.bf16.msra.mxu0 %v8435_v15 }
 0xa93   : > { %7901 = vmatpush3.bf16.msra.mxu1 %v8436_v16  ;;  %7880 = vmatprep.subr.bf16.mxu0 %v8437_v8 }
 0xa94   : > { %7902 = vmatprep.subr.bf16.mxu1 %v8438_v39 }
 0xa96   : > { %7881 = vmatpush3.bf16.msra.mxu0 %v8439_v40 }
 0xa97   : > { %7903 = vmatpush3.bf16.msra.mxu1 %v8440_v31  ;;  %7910 = vmatprep.subr.bf16.mxu0 %v8441_v41 }
 0xa98   : > { %7932 = vmatprep.subr.bf16.mxu1 %v8442_v42 }
 0xa99   : > { %3456 = vmatmul.mubr.bf16.vlgmr.msra.gmra.mrb[32].mxu0 %v9408_v13  ;;  %v8449_v13 = vld [vmem:[%s10509_s8 + $0x350] sm:$0xff]  }
 0xa9a   : > { %3497 = vmatmul.mubr.bf16.vlgmr.msra.gmra.mrb[40].mxu1 %v9410_v14  ;;  %7911 = vmatpush3.bf16.msra.mxu0 %v8443_v44  ;;  %v8450_v14 = vld [vmem:[%s10509_s8 + $0x3d0] sm:$0xff]  }
 0xa9b   : > { %3537 = vmatprep.mubr.bf16.mxu0 %v2228_v12  ;;  %7933 = vmatpush3.bf16.msra.mxu1 %v8444_v45 }
 0xa9c   : > { %3578 = vmatprep.mubr.bf16.mxu1 %v2230_v17  ;;  %7912 = vmatprep.subr.bf16.mxu0 %v8445_v47  ;;  %v9623_v17 = vld [vmem:[%s10510_s9] sm:$0x3f] }
 0xa9d   : > { %7934 = vmatprep.subr.bf16.mxu1 %v8446_v48  ;;  %v2490_v38 = vrot.slane %v9623_v17, %v8825_v35 }
 0xa9e   : > { %7913 = vmatpush3.bf16.msra.mxu0 %v8447_v28 }
 0xa9f   : > { %7935 = vmatpush3.bf16.msra.mxu1 %v8448_v49  ;;  %7914 = vmatprep.subr.bf16.mxu0 %v8449_v13 }
 0xaa0   : > { %7936 = vmatprep.subr.bf16.mxu1 %v8450_v14 }
 0xaa2   : > { %7915 = vmatpush3.bf16.msra.mxu0 %v8451_v46 }
 0xaa3   : > { %7937 = vmatpush3.bf16.msra.mxu1 %v8452_v51  ;;  %7916 = vmatprep.subr.bf16.mxu0 %v8453_v53 }
 0xaa4   : > { %7938 = vmatprep.subr.bf16.mxu1 %v8454_v54 }
 0xaa6   : > { %7917 = vmatpush3.bf16.msra.mxu0 %v8455_v52 }
 0xaa7   : > { %7939 = vmatpush3.bf16.msra.mxu1 %v8456_v55  ;;  %7918 = vmatprep.subr.bf16.mxu0 %v8457_v56 }
 0xaa8   : > { %7940 = vmatprep.subr.bf16.mxu1 %v8458_v43 }
 0xaaa   : > { %7919 = vmatpush3.bf16.msra.mxu0 %v8459_v57 }
 0xaab   : > { %7941 = vmatpush3.bf16.msra.mxu1 %v8460_v58  ;;  %7920 = vmatprep.subr.bf16.mxu0 %v8461_v59 }
 0xaac   : > { %7942 = vmatprep.subr.bf16.mxu1 %v8462_v60 }
 0xaae   : > { %7921 = vmatpush3.bf16.msra.mxu0 %v8463_v61 }
 0xaaf   : > { %7943 = vmatpush3.bf16.msra.mxu1 %v8464_v62  ;;  %7922 = vmatprep.subr.bf16.mxu0 %v8465_v63 }
 0xab0   : > { %7944 = vmatprep.subr.bf16.mxu1 %v8466_v0 }
 0xab2   : > { %7923 = vmatpush3.bf16.msra.mxu0 %v8467_v2 }
 0xab3   : > { %7945 = vmatpush3.bf16.msra.mxu1 %v8468_v3  ;;  %7924 = vmatprep.subr.bf16.mxu0 %v8469_v4 }
 0xab4   : > { %7946 = vmatprep.subr.bf16.mxu1 %v8470_v5 }
 0xab6   : > { %7925 = vmatpush3.bf16.msra.mxu0 %v8471_v6 }
 0xab7   : > { %7947 = vmatpush3.bf16.msra.mxu1 %v8472_v7 }
 0xab8   : > { %8213 = vmatprep.subr.mxu1 %v8677_v29 }
 0xab9   : > { %3538 = vmatmul.mubr.bf16.vlgmr.msra.gmra.mrb[36].mxu0 %v9470_v10 }
 0xaba   : > { %3579 = vmatmul.mubr.bf16.vlgmr.msra.gmra.mrb[44].mxu1 %v9472_v11  ;;  %3727 = vmatprep.mubr.bf16.mxu0 %v8676_v1 }
 0xabb   : > { %8215 = vmatprep.mubr.msk.f32.mxu1 %vm8678_vm1, %v8677_v29 }
 0xb2c   : > { %v7794_v9 = vpop.f32.mrb[24].mxu0  ;;  %v7816_v12 = vpop.f32.mrb[32].mxu1 }
 0xb2d   : > { %v7795_v18 = vpop.f32.mrb[25].mxu0  ;;  %v7817_v20 = vpop.f32.mrb[33].mxu1 }
 0xb2e   : > { %v7796_v10 = vadd.f32 %v7795_v18, %v7794_v9  ;;  %v7818_v22 = vadd.f32 %v7817_v20, %v7816_v12  ;;  %v7797_v11 = vpop.f32.mrb[26].mxu0  ;;  %v7819_v24 = vpop.f32.mrb[34].mxu1 }
 0xb2f   : > { %v7798_v26 = vpop.f32.mrb[27].mxu0  ;;  %v7820_v27 = vpop.f32.mrb[35].mxu1 }
 0xb30   : > { %v3294_v23 = vadd.f32 %v7796_v10, %v2490_v38  ;;  %v7799_v15 = vadd.f32 %v7798_v26, %v7797_v11  ;;  %v7821_v16 = vadd.f32 %v7820_v27, %v7819_v24 }
 0xb32   : > { %v3335_v8 = vadd.f32 %v7818_v22, %v3294_v23  ;;  %v3297_v39 = vadd.f32 %v7799_v15, %v2490_v38 }
 0xb34   : > { %v3338_v40 = vadd.f32 %v7821_v16, %v3297_v39 }
 0xb4c   : > { %v7838_v31 = vpop.f32.mrb[28].mxu0  ;;  %v7860_v41 = vpop.f32.mrb[36].mxu1 }
 0xb4d   : > { %v7839_v42 = vpop.f32.mrb[29].mxu0  ;;  %v7861_v44 = vpop.f32.mrb[37].mxu1 }
 0xb4e   : > { %v7840_v45 = vadd.f32 %v7839_v42, %v7838_v31  ;;  %v7862_v47 = vadd.f32 %v7861_v44, %v7860_v41  ;;  %v7841_v48 = vpop.f32.mrb[30].mxu0  ;;  %v7863_v28 = vpop.f32.mrb[38].mxu1 }
 0xb4f   : > { %v7842_v49 = vpop.f32.mrb[31].mxu0  ;;  %v7864_v13 = vpop.f32.mrb[39].mxu1 }
 0xb50   : > { %v3376_v14 = vadd.f32 %v7840_v45, %v3335_v8  ;;  %v7843_v46 = vadd.f32 %v7842_v49, %v7841_v48  ;;  %v7865_v51 = vadd.f32 %v7864_v13, %v7863_v28 }
 0xb52   : > { %v3417_v53 = vadd.f32 %v7862_v47, %v3376_v14  ;;  %v3379_v54 = vadd.f32 %v7843_v46, %v3338_v40  ;;  %v8473_v46 = vld [vmem:[%s10504_s3 + $0x40] ss:$8 sps:$4 sm:$0xff]  }
 0xb54   : > { %v3420_v52 = vadd.f32 %v7865_v51, %v3379_v54  ;;  %v8478_v51 = vld [vmem:[%s10504_s3 + $0x54] ss:$8 sps:$4 sm:$0xff]   ;;  %v8481_v54 = vld [vmem:[%s10504_s3 + $0x64] ss:$8 sps:$4 sm:$0xff]  }
 0xb6c   : > { %v7882_v55 = vpop.f32.mrb[32].mxu0 }
 0xb6d   : > { %v7904_v56 = vpop.f32.mrb[40].mxu1  ;;  %v7883_v43 = vpop.f32.mrb[33].mxu0 }
 0xb6e   : > { %v7884_v57 = vadd.f32 %v7883_v43, %v7882_v55  ;;  %v7905_v58 = vpop.f32.mrb[41].mxu1  ;;  %v7885_v59 = vpop.f32.mrb[34].mxu0  ;;  %v8484_v55 = vld [vmem:[%s10504_s3 + $0x74] ss:$8 sps:$4 sm:$0xff]  }
 0xb6f   : > { %v7906_v60 = vadd.f32 %v7905_v58, %v7904_v56  ;;  %v7907_v61 = vpop.f32.mrb[42].mxu1  ;;  %v7886_v62 = vpop.f32.mrb[35].mxu0  ;;  %v8482_v56 = vld [vmem:[%s10504_s3 + $0x70] ss:$8 sps:$4 sm:$0xff]  }
 0xb70   : > { %v3458_v63 = vadd.f32 %v7884_v57, %v3417_v53  ;;  %v7887_v0 = vadd.f32 %v7886_v62, %v7885_v59  ;;  %v7908_v2 = vpop.f32.mrb[43].mxu1  ;;  %v8476_v53 = vld [vmem:[%s10504_s3 + $0x50] ss:$8 sps:$4 sm:$0xff]   ;;  %v3618_v62 = vrot.slane %v9623_v17, %v9292_v30 }
 0xb71   : > { %v7909_v3 = vadd.f32 %v7908_v2, %v7907_v61 }
 0xb72   : > { %v3499_v4 = vadd.f32 %v7906_v60, %v3458_v63  ;;  %v3461_v5 = vadd.f32 %v7887_v0, %v3420_v52  ;;  %v8479_v52 = vld [vmem:[%s10504_s3 + $0x60] ss:$8 sps:$4 sm:$0xff]  }
 0xb74   : > { %v3502_v6 = vadd.f32 %v7909_v3, %v3461_v5  ;;  %v3624_v5 = vrot.slane %v9623_v17, %v9298_v34 }
 0xb8c   : > { %v7926_v7 = vpop.f32.mrb[36].mxu0 }
 0xb8d   : > { %v7948_v9 = vpop.f32.mrb[44].mxu1  ;;  %v7927_v12 = vpop.f32.mrb[37].mxu0 }
 0xb8e   : > { %v7928_v38 = vadd.f32 %v7927_v12, %v7926_v7  ;;  %v7949_v18 = vpop.f32.mrb[45].mxu1  ;;  %v7929_v20 = vpop.f32.mrb[38].mxu0 }
 0xb8f   : > { %v7950_v10 = vadd.f32 %v7949_v18, %v7948_v9  ;;  %v7951_v22 = vpop.f32.mrb[46].mxu1  ;;  %v7930_v11 = vpop.f32.mrb[39].mxu0 }
 0xb90   : > { %v3540_v24 = vadd.f32 %v7928_v38, %v3499_v4  ;;  %v7931_v26 = vadd.f32 %v7930_v11, %v7929_v20  ;;  %v7952_v27 = vpop.f32.mrb[47].mxu1  ;;  %v7195_v38 = vld [vmem:[%s10505_s4 + $0x2] sm:$0x3] }
 0xb91   : > { %v7953_v23 = vadd.f32 %v7952_v27, %v7951_v22  ;;  %v3645_v18 = vrot.slane %v7195_v38, %v8818_v32 }
 0xb92   : > { %v3581_v15 = vadd.f32 %v7950_v10, %v3540_v24  ;;  %v3543_v16 = vadd.f32 %v7931_v26, %v3502_v6  ;;  %v3649_v26 = vrot.slane %v7195_v38, %v8825_v35 }
 0xb94   : > { %v3584_v8 = vadd.f32 %v7953_v23, %v3543_v16  ;;  %v3587_v39 = vadd.f32 %v3581_v15, %v9020_v37 }
 0xb96   : > { %v3589_v40 = vsel %vm524_vm0, %v3587_v39, 0.0  ;;  %v3588_v31 = vadd.f32 %v3584_v8, %v9022_v25  ;;  %v8475_v25 = vld [vmem:[%s10504_s3 + $0x44] ss:$8 sps:$4 sm:$0xff]  }
 0xb97   : > { %3590 = vadd.xlane.f32.xlu0 %v3589_v40  ;;  %3695 = vmatprep.subr.bf16.mxu0 %v8475_v25 }
 0xb98   : > { %v3592_v41 = vsel %vm524_vm0, %v3588_v31, 0.0  ;;  %3696 = vmatpush1.bf16.msra.mxu0 %v8473_v46 }
 0xb99   : > { %3593 = vadd.xlane.f32.xlu1 %v3592_v41  ;;  %3697 = vmatprep.subr.bf16.mxu0 %v8478_v51 }
 0xb9c   : > { %3698 = vmatpush1.bf16.msra.mxu0 %v8476_v53 }
 0xb9d   : > { %3699 = vmatprep.subr.bf16.mxu0 %v8481_v54 }
 0xba0   : > { %3700 = vmatpush1.bf16.msra.mxu0 %v8479_v52 }
 0xba1   : > { %3701 = vmatprep.subr.bf16.mxu0 %v8484_v55 }
 0xba4   : > { %3702 = vmatpush1.bf16.msra.mxu0 %v8482_v56 }
 0xba5   : > { %8218 = vmatprep.subr.mxu0 %v8677_v29 }
 0xc24   : > { %v3591_v42 = vpop.xlane.xlu0 %3590 }
 0xc25   : > { %v3595_v44 = vmul.f32 0.015625, %v3591_v42 }
 0xc26   : > { %v3594_v45 = vpop.xlane.xlu1 %3593 }
 0xc27   : > { %v3597_v47 = vsub.f32 %v3587_v39, %v3595_v44  ;;  %v3596_v48 = vmul.f32 0.015625, %v3594_v45 }
 0xc29   : > { %v3598_v28 = vsub.f32 %v3588_v31, %v3596_v48  ;;  %v3599_v49 = vmul.f32 %v3597_v47, %v3597_v47 }
 0xc2b   : > { %v3601_v13 = vsel %vm524_vm0, %v3599_v49, 0.0  ;;  %v3600_v14 = vmul.f32 %v3598_v28, %v3598_v28 }
 0xc2c   : > { %3602 = vadd.xlane.f32.xlu0 %v3601_v13 }
 0xc2d   : > { %v3604_v37 = vsel %vm524_vm0, %v3600_v14, 0.0 }
 0xc2e   : > { %3605 = vadd.xlane.f32.xlu1 %v3604_v37 }
 0xcb9   : > { %v3603_v43 = vpop.xlane.xlu0 %3602 }
 0xcba   : > { %v3607_v57 = vmul.f32 0.015625, %v3603_v43 }
 0xcbb   : > { %v3606_v58 = vpop.xlane.xlu1 %3605 }
 0xcbc   : > { %v3609_v59 = vadd.f32 1e-05, %v3607_v57  ;;  %v3608_v60 = vmul.f32 0.015625, %v3606_v58 }
 0xcbe   : > { %8637 = vrsqrt.f32 %v3609_v59  ;;  %v3610_v61 = vadd.f32 1e-05, %v3608_v60 }
 0xcc0   : > { %8639 = vrsqrt.f32 %v3610_v61 }
 0xcc8   : > { %v8638_v63 = vpop.eup %8637 }
 0xcc9   : > { %v3613_v0 = vmul.f32 %v8638_v63, %v3597_v47 }
 0xcca   : > { %v8640_v2 = vpop.eup %8639 }
 0xccb   : > { %v3619_v3 = vmul.f32 %v3618_v62, %v3613_v0  ;;  %v3614_v4 = vmul.f32 %v8640_v2, %v3598_v28 }
 0xccd   : > { %v3620_v6 = vmul.f32 %v3618_v62, %v3614_v4  ;;  %v9662_v7 = vadd.f32 %v3624_v5, %v3619_v3 }
 0xccf   : > { %v9664_v9 = vadd.f32 %v3624_v5, %v3620_v6 }
 0xcd1   : > { %v3629_v12 = vpack.c.bf16 %v9664_v9, %v9662_v7 }
 0xcd3   : > { %7204 = vmatmul.mubr.msk.bf16.vlgmr.msra.gmra.mrb[40].mxu0 %vm524_vm0, %v3629_v12 }
 0xcd4   : > { %8220 = vmatprep.mubr.msk.f32.mxu0 %vm8678_vm1, %v8677_v29 }
 0xda6   : > { %v3729_v17 = vpop.f32.mrb[40].mxu0 }
 0xda7   : > { %v3730_v20 = vadd.f32 %v3729_v17, %v3645_v18  ;;  %v3731_v10 = vpop.f32.mrb[41].mxu0 }
 0xda8   : > { %v3733_v22 = vpop.f32.mrb[42].mxu0  ;;  %v9680_v15 = vadd.f32 %v3731_v10, %v3649_v26 }
 0xda9   : > { %v3734_v11 = vadd.f32 %v3733_v22, %v3645_v18  ;;  %v3735_v24 = vpop.f32.mrb[43].mxu0  ;;  %3739 = vrot.lane.b32.xlu0 %v3730_v20, %s8679_s22 }
 0xdaa   : > { %v9685_v16 = vadd.f32 %v3735_v24, %v3649_v26 }
 0xdab   : > { %3816 = vrot.lane.b32.xlu1 %v3734_v11, %s8679_s22  ;;  %s415_s22 = scalar_lea.vmem %s10513_s12, %s6955_s28 }
 0xe1b   : > { %v3740_v27 = vpop.permute.xlu0 %3739 }
 0xe1c   : > { %8214 = vmatpush3.xpose.msk.msra.mxu1 %vm574_vm2, %v3740_v27 }
 0xe1d   : > { %v3817_v23 = vpop.permute.xlu1 %3816  ;;  %8223 = vmatprep.subr.mxu1 %v8677_v29 }
 0xe1e   : > { %8219 = vmatpush3.xpose.msk.msra.mxu0 %vm574_vm2, %v3817_v23 }
 0xe1f   : > { %8216 = vmatmul.mubr.msk.f32.vlgmr.msra.gmra.mrb[48].mxu1 %vm574_vm2, %v3730_v20  ;;  %8228 = vmatprep.subr.mxu0 %v8677_v29 }
 0xe20   : > { %8224 = vmatpush3.msra.mxu1 %v9680_v15  ;;  %8225 = vmatprep.mubr.msk.f32.mxu1 %vm8678_vm1, %v8677_v29 }
 0xe21   : > { %8221 = vmatmul.mubr.msk.f32.vlgmr.msra.gmra.mrb[44].mxu0 %vm574_vm2, %v3734_v11  ;;  %8233 = vmatprep.subr.mxu1 %v8677_v29 }
 0xe22   : > { %8229 = vmatpush3.msra.mxu0 %v9685_v16  ;;  %8230 = vmatprep.mubr.msk.f32.mxu0 %vm8678_vm1, %v8677_v29 }
 0xe23   : > { %8238 = vmatprep.subr.mxu0 %v8677_v29 }
 0xef2   : > { %v3811_v8 = vpop.f32.mrb[48].mxu1 }
 0xef3   : > { %v3892_v39 = vmul.f32 0.17677669, %v3811_v8  ;;  %v8217_v40 = vpop.f32.mrb[49].mxu1 }
 0xef4   : > { %v3888_v31 = vpop.f32.mrb[44].mxu0 }
 0xef5   : > { %v3893_v41 = vmul.f32 0.17677669, %v3888_v31  ;;  %v8222_v42 = vpop.f32.mrb[45].mxu0  ;;  %v3894_v44 = vadd.f32 %v3892_v39, %v8846_v50 }
 0xef7   : > { %v3896_v45 = vsel %vm730_vm4, %v3894_v44, -inf  ;;  %v3895_v47 = vadd.f32 %v3893_v41, %v8846_v50 }
 0xef8   : > { %3897 = vmax.xlane.f32.xlu1 %v3896_v45 }
 0xef9   : > { %v3899_v48 = vsel %vm730_vm4, %v3895_v47, -inf }
 0xefa   : > { %3900 = vmax.xlane.f32.xlu0 %v3899_v48 }
 0xf09   : > { %4144 = vrot.lane.b32.xlu1 %v3734_v11, %s8681_s24 }
 0xf10   : > { %4066 = vrot.lane.b32.xlu0 %v3730_v20, %s8681_s24 }
 0xf85   : > { %v3898_v28 = vpop.xlane.xlu1 %3897 }
 0xf86   : > { %v3902_v49 = vsub.f32 %v3894_v44, %v3898_v28 }
 0xf87   : > { %v3901_v13 = vpop.xlane.xlu0 %3900 }
 0xf88   : > { %v3904_v14 = vmul.f32 1.442695, %v3902_v49  ;;  %v3903_v37 = vsub.f32 %v3895_v47, %v3901_v13  ;;  %v8487_v13 = vld [vmem:[%s10506_s5 + $0x30] sm:$0xff]  }
 0xf89   : > { %v4145_v55 = vpop.permute.xlu1 %4144 }
 0xf8a   : > { %8641 = vpow2.f32 %v3904_v14  ;;  %v3906_v25 = vmul.f32 1.442695, %v3903_v37  ;;  %v8488_v14 = vld [vmem:[%s10506_s5 + $0x38] sm:$0xff]  }
 0xf8b   : > { %v4067_v52 = vpop.permute.xlu0 %4066 }
 0xf8c   : > { %8643 = vpow2.f32 %v3906_v25 }
 0xf94   : > { %v8642_v46 = vpop.eup %8641 }
 0xf95   : > { %v3908_v51 = vsel %vm730_vm4, %v8642_v46, 0.0 }
 0xf96   : > { %v8644_v53 = vpop.eup %8643  ;;  %3909 = vadd.xlane.f32.xlu0 %v3908_v51 }
 0xf97   : > { %v3911_v54 = vsel %vm730_vm4, %v8644_v53, 0.0 }
 0xf98   : > { %3912 = vadd.xlane.f32.xlu1 %v3911_v54 }
 0xfa9   : > { %4064 = vrot.lane.b32.xlu1 %v3730_v20, %s8682_s25 }
 0xfac   : > { %4142 = vrot.lane.b32.xlu0 %v3734_v11, %s8682_s25 }
0x1023   : > { %v3910_v56 = vpop.xlane.xlu0 %3909 }
0x1024   : > { %8645 = vrcp.f32 %v3910_v56 }
0x1025   : > { %v3913_v43 = vpop.xlane.xlu1 %3912 }
0x1026   : > { %8647 = vrcp.f32 %v3913_v43 }
0x1027   : > { %v4143_v62 = vpop.permute.xlu0 %4142 }
0x1029   : > { %v4065_v61 = vpop.permute.xlu1 %4064 }
0x102e   : > { %v8646_v57 = vpop.eup %8645 }
0x102f   : > { %v3916_v58 = vmul.f32 %v8646_v57, %v8642_v46  ;;  %v9767_v57 = vld [vmem:[%s10510_s9 + $0x8] sm:$0x3f] }
0x1030   : > { %v8648_v59 = vpop.eup %8647 }
0x1031   : > { %v3917_v60 = vmul.f32 %v8648_v59, %v8644_v53  ;;  %8226 = vmatmul.mubr.msk.f32.vlgmr.msra.gmra.mrb[50].mxu1 %vm730_vm4, %v3916_v58  ;;  %v4423_v58 = vrot.slane %v9767_v57, %v8818_v32 }
0x1032   : > { %8234 = vmatpush3.xpose.msk.msra.mxu1 %vm574_vm2, %v4067_v52  ;;  %8235 = vmatprep.mubr.msk.f32.mxu1 %vm8678_vm1, %v8677_v29 }
0x1033   : > { %8231 = vmatmul.mubr.msk.f32.vlgmr.msra.gmra.mrb[46].mxu0 %vm730_vm4, %v3917_v60  ;;  %8243 = vmatprep.subr.mxu1 %v8677_v29 }
0x1034   : > { %8239 = vmatpush3.xpose.msk.msra.mxu0 %vm574_vm2, %v4145_v55  ;;  %8240 = vmatprep.mubr.msk.f32.mxu0 %vm8678_vm1, %v8677_v29 }
0x1035   : > { %8236 = vmatmul.mubr.msk.f32.vlgmr.msra.gmra.mrb[52].mxu1 %vm574_vm2, %v4065_v61  ;;  %8248 = vmatprep.subr.mxu0 %v8677_v29 }
0x1036   : > { %8245 = vmatprep.mubr.msk.f32.mxu1 %vm8678_vm1, %v8677_v29 }
0x1037   : > { %8241 = vmatmul.mubr.msk.f32.vlgmr.msra.gmra.mrb[48].mxu0 %vm574_vm2, %v4143_v62 }
0x1038   : > { %8250 = vmatprep.mubr.msk.f32.mxu0 %vm8678_vm1, %v8677_v29 }
0x1104   : > { %v9722_v63 = vpop.f32.mrb[50].mxu1 }
0x1105   : > { %v8227_v0 = vpop.f32.mrb[51].mxu1 }
0x1106   : > { %v9724_v2 = vpop.f32.mrb[46].mxu0 }
0x1107   : > { %v8232_v3 = vpop.f32.mrb[47].mxu0 }
0x1108   : > { %v4138_v4 = vpop.f32.mrb[52].mxu1 }
0x1109   : > { %v4220_v5 = vmul.f32 0.17677669, %v4138_v4  ;;  %v8237_v6 = vpop.f32.mrb[53].mxu1 }
0x110a   : > { %v4216_v12 = vpop.f32.mrb[48].mxu0 }
0x110b   : > { %v4221_v38 = vmul.f32 0.17677669, %v4216_v12  ;;  %v8242_v18 = vpop.f32.mrb[49].mxu0  ;;  %v4222_v17 = vadd.f32 %v4220_v5, %v8846_v50 }
0x110d   : > { %v4224_v20 = vsel %vm730_vm4, %v4222_v17, -inf  ;;  %v4223_v10 = vadd.f32 %v4221_v38, %v8846_v50 }
0x110e   : > { %4225 = vmax.xlane.f32.xlu1 %v4224_v20 }
0x110f   : > { %v4227_v22 = vsel %vm730_vm4, %v4223_v10, -inf }
0x1110   : > { %4228 = vmax.xlane.f32.xlu0 %v4227_v22 }
0x119b   : > { %v4226_v11 = vpop.xlane.xlu1 %4225 }
0x119c   : > { %v4230_v24 = vsub.f32 %v4222_v17, %v4226_v11  ;;  %v7230_v11 = vld [vmem:[%s10507_s6 + $0x200] sm:$0xff] }
0x119d   : > { %v4229_v26 = vpop.xlane.xlu0 %4228 }
0x119e   : > { %v4232_v27 = vmul.f32 1.442695, %v4230_v24  ;;  %v4231_v23 = vsub.f32 %v4223_v10, %v4229_v26  ;;  %v7238_v24 = vld [vmem:[%s10507_s6 + $0x240] sm:$0xff]  ;;  %v7231_v26 = vld [vmem:[%s10507_s6 + $0x208] sm:$0xff] }
0x11a0   : > { %8649 = vpow2.f32 %v4232_v27  ;;  %v4234_v8 = vmul.f32 1.442695, %v4231_v23  ;;  %v7297_v27 = vcombine.high %v7230_v11, %v7238_v24  ;;  %v7239_v23 = vld [vmem:[%s10507_s6 + $0x248] sm:$0xff] }
0x11a2   : > { %8651 = vpow2.f32 %v4234_v8  ;;  %v7296_v8 = vcombine.low %v7230_v11, %v7238_v24 }
0x11aa   : > { %v8650_v39 = vpop.eup %8649 }
0x11ab   : > { %v4236_v40 = vsel %vm730_vm4, %v8650_v39, 0.0 }
0x11ac   : > { %v8652_v31 = vpop.eup %8651  ;;  %4237 = vadd.xlane.f32.xlu0 %v4236_v40  ;;  %v7299_v40 = vcombine.high %v7231_v26, %v7239_v23 }
0x11ad   : > { %v4239_v41 = vsel %vm730_vm4, %v8652_v31, 0.0 }
0x11ae   : > { %4240 = vadd.xlane.f32.xlu1 %v4239_v41  ;;  %v7254_v41 = vld [vmem:[%s10507_s6 + $0x2c0] sm:$0xff] }
0x11bf   : > { %4324 = vrot.lane.b32.xlu1 %v9685_v16, %s8682_s25  ;;  %v8486_v16 = vld [vmem:[%s10506_s5 + $0x28] sm:$0xff]  }
0x11c2   : > { %4247 = vrot.lane.b32.xlu0 %v9680_v15, %s8682_s25  ;;  %v8485_v15 = vld [vmem:[%s10506_s5 + $0x20] sm:$0xff]  }
0x1239   : > { %v4238_v50 = vpop.xlane.xlu0 %4237 }
0x123a   : > { %8653 = vrcp.f32 %v4238_v50  ;;  %v7247_v50 = vld [vmem:[%s10507_s6 + $0x288] sm:$0xff] }
0x123b   : > { %v4241_v42 = vpop.xlane.xlu1 %4240 }
0x123c   : > { %8655 = vrcp.f32 %v4241_v42 }
0x123d   : > { %v4248_v44 = vpop.permute.xlu0 %4247 }
0x123e   : > { %8244 = vmatpush3.msra.mxu1 %v4248_v44  ;;  %v7255_v44 = vld [vmem:[%s10507_s6 + $0x2c8] sm:$0xff] }
0x123f   : > { %v4325_v45 = vpop.permute.xlu1 %4324  ;;  %8253 = vmatprep.subr.bf16.mxu1 %v8677_v29 }
0x1240   : > { %8249 = vmatpush3.msra.mxu0 %v4325_v45 }
0x1241   : > { %5006 = vmatprep.subr.bf16.mxu0 %v7297_v27  ;;  %v7256_v27 = vld [vmem:[%s10507_s6 + $0x2d0] sm:$0xff] }
0x1244   : > { %v8654_v47 = vpop.eup %8653 }
0x1245   : > { %v4244_v48 = vmul.f32 %v8654_v47, %v8650_v39  ;;  %v7298_v39 = vcombine.low %v7231_v26, %v7239_v23  ;;  %v7314_v47 = vcombine.low %v7247_v50, %v7255_v44  ;;  %v7248_v26 = vld [vmem:[%s10507_s6 + $0x290] sm:$0xff] }
0x1246   : > { %v8656_v28 = vpop.eup %8655 }
0x1247   : > { %v4245_v49 = vmul.f32 %v8656_v28, %v8652_v31  ;;  %8246 = vmatmul.mubr.msk.f32.vlgmr.msra.gmra.mrb[54].mxu1 %vm730_vm4, %v4244_v48  ;;  %v7246_v31 = vld [vmem:[%s10507_s6 + $0x280] sm:$0xff]  ;;  %v7315_v48 = vcombine.high %v7247_v50, %v7255_v44  ;;  %v7265_v50 = vld [vmem:[%s10507_s6 + $0x318] sm:$0xff]  ;;  %v7316_v44 = vcombine.low %v7248_v26, %v7256_v27 }
0x1248   : > { %8261 = vmatprep.mubr.msk.bf16.mxu1 %vm8678_vm1, %v8677_v29  ;;  %8254 = vmatpush3.bf16.msra.mxu1 %v8485_v15  ;;  %v7313_v42 = vcombine.high %v7246_v31, %v7254_v41  ;;  %v7312_v45 = vcombine.low %v7246_v31, %v7254_v41  ;;  %v7262_v28 = vld [vmem:[%s10507_s6 + $0x300] sm:$0xff]  ;;  %v7263_v15 = vld [vmem:[%s10507_s6 + $0x308] sm:$0xff]  ;;  %v7264_v31 = vld [vmem:[%s10507_s6 + $0x310] sm:$0xff] }
0x1249   : > { %8251 = vmatmul.mubr.msk.f32.vlgmr.msra.gmra.mrb[50].mxu0 %vm730_vm4, %v4245_v49  ;;  %8255 = vmatprep.subr.bf16.mxu1 %v8677_v29  ;;  %v7270_v49 = vld [vmem:[%s10507_s6 + $0x340] sm:$0xff]  ;;  %v7272_v41 = vld [vmem:[%s10507_s6 + $0x350] sm:$0xff] }
0x124a   : > { %5038 = vmatprep.mubr.bf16.mxu0 %v8676_v1  ;;  %5007 = vmatpush1.bf16.msra.mxu0 %v7296_v8 }
0x124b   : > { %5008 = vmatprep.subr.bf16.mxu0 %v7313_v42  ;;  %v7273_v42 = vld [vmem:[%s10507_s6 + $0x358] sm:$0xff] }
0x124c   : > { %8256 = vmatpush3.bf16.msra.mxu1 %v8486_v16  ;;  %v7329_v16 = vcombine.high %v7262_v28, %v7270_v49 }
0x124d   : > { %8257 = vmatprep.subr.bf16.mxu1 %v8677_v29 }
0x124e   : > { %5009 = vmatpush1.bf16.msra.mxu0 %v7312_v45 }
0x124f   : > { %5010 = vmatprep.subr.bf16.mxu0 %v7329_v16  ;;  %v7289_v16 = vld [vmem:[%s10507_s6 + $0x3d8] sm:$0xff] }
0x1250   : > { %8258 = vmatpush3.bf16.msra.mxu1 %v8487_v13  ;;  %v7271_v13 = vld [vmem:[%s10507_s6 + $0x348] sm:$0xff] }
0x1251   : > { %8259 = vmatprep.subr.bf16.mxu1 %v8677_v29 }
0x1254   : > { %8260 = vmatpush3.bf16.msra.mxu1 %v8488_v14  ;;  %v7328_v14 = vcombine.low %v7262_v28, %v7270_v49  ;;  %v7280_v28 = vld [vmem:[%s10507_s6 + $0x390] sm:$0xff] }
0x1255   : > { %5049 = vmatprep.subr.bf16.mxu1 %v7299_v40  ;;  %v7288_v49 = vld [vmem:[%s10507_s6 + $0x3d0] sm:$0xff] }
0x1256   : > { %5011 = vmatpush1.bf16.msra.mxu0 %v7328_v14  ;;  %v7334_v14 = vcombine.low %v7265_v50, %v7273_v42 }
0x131a   : > { %v4319_v37 = vpop.f32.mrb[54].mxu1 }
0x131b   : > { %v8247_v25 = vpop.f32.mrb[55].mxu1 }
0x131c   : > { %v4396_v46 = vpop.f32.mrb[50].mxu0  ;;  %v7331_v25 = vcombine.high %v7263_v15, %v7271_v13 }
0x131d   : > { %v8323_v51 = vpack.i.bf16 %v4396_v46, %v4319_v37  ;;  %v8252_v53 = vpop.f32.mrb[51].mxu0  ;;  %v7330_v37 = vcombine.low %v7263_v15, %v7271_v13  ;;  %v7278_v46 = vld [vmem:[%s10507_s6 + $0x380] sm:$0xff]  ;;  %v7281_v15 = vld [vmem:[%s10507_s6 + $0x398] sm:$0xff]  ;;  %v7332_v13 = vcombine.low %v7264_v31, %v7272_v41 }
0x131e   : > { %v7279_v53 = vld [vmem:[%s10507_s6 + $0x388] sm:$0xff] }
0x131f   : > { %8324 = vrot.lane.b32.xlu1 %v8323_v51, %s8681_s24  ;;  %v7286_v51 = vld [vmem:[%s10507_s6 + $0x3c0] sm:$0xff] }
0x1391   : > { %v8325_v54 = vpop.permute.xlu1 %8324 }
0x1392   : > { %v8327_v52 = vunpack.i.h.bf16 %v8325_v54  ;;  %v8326_v55 = vunpack.i.l.bf16 %v8325_v54  ;;  %v7345_v54 = vcombine.high %v7278_v46, %v7286_v51 }
0x1394   : > { %v4409_v56 = vsel %vm574_vm2, %v9724_v2, %v8327_v52  ;;  %v4408_v29 = vsel %vm574_vm2, %v9722_v63, %v8326_v55  ;;  %v7287_v52 = vld [vmem:[%s10507_s6 + $0x3c8] sm:$0xff]  ;;  %v7344_v55 = vcombine.low %v7278_v46, %v7286_v51  ;;  %5012 = vmatprep.subr.bf16.mxu0 %v7345_v54  ;;  %v7234_v46 = vld [vmem:[%s10507_s6 + $0x220] sm:$0xff] }
0x1395   : > { %v4410_v43 = vpack.c.bf16 %v4409_v56, %v4408_v29  ;;  %v7346_v56 = vcombine.low %v7279_v53, %v7287_v52  ;;  %v7347_v29 = vcombine.high %v7279_v53, %v7287_v52  ;;  %v7242_v51 = vld [vmem:[%s10507_s6 + $0x260] sm:$0xff]  ;;  %v7235_v53 = vld [vmem:[%s10507_s6 + $0x228] sm:$0xff]  ;;  %v7348_v52 = vcombine.low %v7280_v28, %v7288_v49 }
0x1396   : > { %5013 = vmatpush1.bf16.msra.mxu0 %v7344_v55  ;;  %v7243_v54 = vld [vmem:[%s10507_s6 + $0x268] sm:$0xff]  ;;  %v7350_v55 = vcombine.low %v7281_v15, %v7289_v16 }
0x1397   : > { %8262 = vmatmul.mubr.msk.bf16.vlgmr.msra.gmra.mrb[56].mxu1 %vm524_vm0, %v4410_v43  ;;  %v7232_v43 = vld [vmem:[%s10507_s6 + $0x210] sm:$0xff] }
0x1398   : > { %5081 = vmatprep.mubr.bf16.mxu1 %v8676_v1  ;;  %5050 = vmatpush1.bf16.msra.mxu1 %v7298_v39  ;;  %v7317_v39 = vcombine.high %v7248_v26, %v7256_v27 }
0x1399   : > { %5051 = vmatprep.subr.bf16.mxu1 %v7315_v48  ;;  %v7335_v48 = vcombine.high %v7265_v50, %v7273_v42 }
0x139c   : > { %5052 = vmatpush1.bf16.msra.mxu1 %v7314_v47  ;;  %v7333_v47 = vcombine.high %v7264_v31, %v7272_v41 }
0x139d   : > { %5053 = vmatprep.subr.bf16.mxu1 %v7331_v25  ;;  %v7351_v25 = vcombine.high %v7281_v15, %v7289_v16 }
0x13a0   : > { %5054 = vmatpush1.bf16.msra.mxu1 %v7330_v37  ;;  %v7349_v37 = vcombine.high %v7280_v28, %v7288_v49 }
0x13a1   : > { %5055 = vmatprep.subr.bf16.mxu1 %v7347_v29  ;;  %v7307_v29 = vcombine.high %v7235_v53, %v7243_v54 }
0x13a4   : > { %5056 = vmatpush1.bf16.msra.mxu1 %v7346_v56  ;;  %v7305_v56 = vcombine.high %v7234_v46, %v7242_v51 }
0x146a   : > { %v4485_v59 = vpop.f32.mrb[56].mxu1 }
0x146b   : > { %v4486_v60 = vadd.f32 %v4485_v59, %v4423_v58  ;;  %v8263_v61 = vpop.f32.mrb[57].mxu1  ;;  %v7233_v59 = vld [vmem:[%s10507_s6 + $0x218] sm:$0xff] }
0x146c   : > { %v4488_v62 = vpop.f32.mrb[58].mxu1 }
0x146d   : > { %v4489_v0 = vadd.f32 %v4488_v62, %v4423_v58  ;;  %v8264_v2 = vpop.f32.mrb[59].mxu1  ;;  %v4492_v63 = vadd.f32 %v4486_v60, %v9662_v7  ;;  %v7240_v58 = vld [vmem:[%s10507_s6 + $0x250] sm:$0xff]  ;;  %v7241_v62 = vld [vmem:[%s10507_s6 + $0x258] sm:$0xff] }
0x146e   : > { %v7300_v60 = vcombine.low %v7232_v43, %v7240_v58  ;;  %v7301_v61 = vcombine.high %v7232_v43, %v7240_v58  ;;  %v7303_v2 = vcombine.high %v7233_v59, %v7241_v62  ;;  %v7250_v43 = vld [vmem:[%s10507_s6 + $0x2a0] sm:$0xff] }
0x146f   : > { %v4494_v3 = vsel %vm524_vm0, %v4492_v63, 0.0  ;;  %v4493_v4 = vadd.f32 %v4489_v0, %v9664_v9  ;;  %v7302_v0 = vcombine.low %v7233_v59, %v7241_v62  ;;  %v7258_v58 = vld [vmem:[%s10507_s6 + $0x2e0] sm:$0xff]  ;;  %v7251_v59 = vld [vmem:[%s10507_s6 + $0x2a8] sm:$0xff]  ;;  %v7306_v62 = vcombine.low %v7235_v53, %v7243_v54 }
0x1470   : > { %4495 = vadd.xlane.f32.xlu0 %v4494_v3  ;;  %5092 = vmatprep.subr.bf16.mxu0 %v7301_v61  ;;  %v7304_v61 = vcombine.low %v7234_v46, %v7242_v51 }
0x1471   : > { %v4497_v5 = vsel %vm524_vm0, %v4493_v4, 0.0  ;;  %5135 = vmatprep.subr.bf16.mxu1 %v7303_v2 }
0x1472   : > { %4498 = vadd.xlane.f32.xlu1 %v4497_v5 }
0x14fd   : > { %v4496_v6 = vpop.xlane.xlu0 %4495 }
0x14fe   : > { %v4500_v12 = vmul.f32 0.015625, %v4496_v6 }
0x14ff   : > { %v4499_v38 = vpop.xlane.xlu1 %4498 }
0x1500   : > { %v9775_v18 = vsub.f32 %v4492_v63, %v4500_v12  ;;  %v4501_v17 = vmul.f32 0.015625, %v4499_v38 }
0x1502   : > { %v9777_v20 = vsub.f32 %v4493_v4, %v4501_v17  ;;  %v4504_v10 = vmul.f32 %v9775_v18, %v9775_v18  ;;  %v4523_v17 = vrot.slane %v9767_v57, %v8997_v19 }
0x1504   : > { %v4506_v7 = vsel %vm524_vm0, %v4504_v10, 0.0  ;;  %v4505_v9 = vmul.f32 %v9777_v20, %v9777_v20 }
0x1505   : > { %4507 = vadd.xlane.f32.xlu0 %v4506_v7 }
0x1506   : > { %v4509_v22 = vsel %vm524_vm0, %v4505_v9, 0.0  ;;  %v4529_v9 = vrot.slane %v9767_v57, %v9002_v21  ;;  %v7257_v57 = vld [vmem:[%s10507_s6 + $0x2d8] sm:$0xff] }
0x1509   : > { %4510 = vadd.xlane.f32.xlu0 %v4509_v22 }
0x1592   : > { %v4508_v63 = vpop.xlane.xlu0 %4507 }
0x1593   : > { %v4512_v3 = vmul.f32 0.015625, %v4508_v63  ;;  %v7266_v63 = vld [vmem:[%s10507_s6 + $0x320] sm:$0xff] }
0x1595   : > { %v4514_v4 = vadd.f32 1e-05, %v4512_v3  ;;  %v7274_v3 = vld [vmem:[%s10507_s6 + $0x360] sm:$0xff] }
0x1596   : > { %v4511_v5 = vpop.xlane.xlu0 %4510 }
0x1597   : > { %8657 = vrsqrt.f32 %v4514_v4  ;;  %v4513_v6 = vmul.f32 0.015625, %v4511_v5  ;;  %v7267_v4 = vld [vmem:[%s10507_s6 + $0x328] sm:$0xff] }
0x1598   : > { %v7275_v5 = vld [vmem:[%s10507_s6 + $0x368] sm:$0xff] }
0x1599   : > { %v4515_v12 = vadd.f32 1e-05, %v4513_v6  ;;  %v7320_v6 = vcombine.low %v7250_v43, %v7258_v58 }
0x159b   : > { %8659 = vrsqrt.f32 %v4515_v12 }
0x15a1   : > { %v8658_v38 = vpop.eup %8657 }
0x15a2   : > { %v4518_v10 = vmul.f32 %v8658_v38, %v9775_v18  ;;  %v7249_v18 = vld [vmem:[%s10507_s6 + $0x298] sm:$0xff]  ;;  %v7337_v38 = vcombine.high %v7266_v63, %v7274_v3 }
0x15a3   : > { %v7319_v40 = vcombine.high %v7249_v18, %v7257_v57  ;;  %v7318_v45 = vcombine.low %v7249_v18, %v7257_v57  ;;  %v7236_v18 = vld [vmem:[%s10507_s6 + $0x230] sm:$0xff] }
0x15a4   : > { %v4524_v22 = vmul.f32 %v4523_v17, %v4518_v10  ;;  %v7282_v10 = vld [vmem:[%s10507_s6 + $0x3a0] sm:$0xff]  ;;  %v7244_v57 = vld [vmem:[%s10507_s6 + $0x270] sm:$0xff] }
0x15a5   : > { %v8660_v7 = vpop.eup %8659  ;;  %v7309_v50 = vcombine.high %v7236_v18, %v7244_v57  ;;  %v7308_v28 = vcombine.low %v7236_v18, %v7244_v57  ;;  %v8509_v18 = vld [vmem:[%s10509_s8 + $0x468] sm:$0xff]  }
0x15a6   : > { %v4519_v11 = vmul.f32 %v8660_v7, %v9777_v20  ;;  %v9863_v23 = vadd.f32 %v4529_v9, %v4524_v22  ;;  %v7290_v7 = vld [vmem:[%s10507_s6 + $0x3e0] sm:$0xff]  ;;  %v7291_v22 = vld [vmem:[%s10507_s6 + $0x3e8] sm:$0xff] }
0x15a7   : > { %v7353_v26 = vcombine.high %v7282_v10, %v7290_v7  ;;  %v7352_v31 = vcombine.low %v7282_v10, %v7290_v7  ;;  %v8501_v10 = vld [vmem:[%s10509_s8 + $0x458] sm:$0xff]   ;;  %v8510_v57 = vld [vmem:[%s10509_s8 + $0x4e8] sm:$0xff]  }
0x15a8   : > { %v4525_v24 = vmul.f32 %v4523_v17, %v4519_v11  ;;  %v7339_v17 = vcombine.high %v7267_v4, %v7275_v5  ;;  %v7336_v11 = vcombine.low %v7266_v63, %v7274_v3  ;;  %v8492_v63 = vld [vmem:[%s10509_s8 + $0x480] sm:$0xff]   ;;  %v8493_v3 = vld [vmem:[%s10509_s8 + $0x448] sm:$0xff]   ;;  %v8502_v7 = vld [vmem:[%s10509_s8 + $0x4d8] sm:$0xff]  }
0x15aa   : > { %v9865_v20 = vadd.f32 %v4529_v9, %v4525_v24  ;;  %v7283_v9 = vld [vmem:[%s10507_s6 + $0x3a8] sm:$0xff]  ;;  %v7338_v24 = vcombine.low %v7267_v4, %v7275_v5 }
0x15ab   : > { %v7355_v27 = vcombine.high %v7283_v9, %v7291_v22  ;;  %v7354_v41 = vcombine.low %v7283_v9, %v7291_v22  ;;  %v8494_v4 = vld [vmem:[%s10509_s8 + $0x4c8] sm:$0xff]   ;;  %v8503_v9 = vld [vmem:[%s10509_s8 + $0x418] sm:$0xff]  }
0x15ac   : > { %v9869_v8 = vpack.c.bf16 %v9865_v20, %v9863_v23  ;;  %v8495_v5 = vld [vmem:[%s10509_s8 + $0x408] sm:$0xff]   ;;  %v8504_v22 = vld [vmem:[%s10509_s8 + $0x498] sm:$0xff]  }
0x15ae   : > { %7360 = vmatmul.mubr.msk.bf16.vlgmr.msra.gmra.mrb[52].mxu0 %vm524_vm0, %v9869_v8  ;;  %7361 = vmatmul.mubr.msk.bf16.vlgmr.msra.gmra.mrb[60].mxu1 %vm524_vm0, %v9869_v8 }
0x15af   : > { %5093 = vmatpush1.bf16.msra.mxu0 %v7300_v60  ;;  %5136 = vmatpush1.bf16.msra.mxu1 %v7302_v0  ;;  %v7259_v60 = vld [vmem:[%s10507_s6 + $0x2e8] sm:$0xff]  ;;  %v7321_v0 = vcombine.high %v7250_v43, %v7258_v58 }
0x15b0   : > { %5094 = vmatprep.subr.bf16.mxu0 %v7317_v39  ;;  %5137 = vmatprep.subr.bf16.mxu1 %v7319_v40  ;;  %v7323_v2 = vcombine.high %v7251_v59, %v7259_v60  ;;  %v7322_v12 = vcombine.low %v7251_v59, %v7259_v60  ;;  %v7237_v39 = vld [vmem:[%s10507_s6 + $0x238] sm:$0xff] }
0x15b1   : > { %5124 = vmatprep.mubr.bf16.mxu0 %v8676_v1  ;;  %5167 = vmatprep.mubr.bf16.mxu1 %v8676_v1  ;;  %v7245_v40 = vld [vmem:[%s10507_s6 + $0x278] sm:$0xff] }
0x15b2   : > { %v7311_v42 = vcombine.high %v7237_v39, %v7245_v40  ;;  %v7310_v49 = vcombine.low %v7237_v39, %v7245_v40  ;;  %v8511_v39 = vld [vmem:[%s10509_s8 + $0x428] sm:$0xff]  }
0x15b3   : > { %5095 = vmatpush1.bf16.msra.mxu0 %v7316_v44  ;;  %5138 = vmatpush1.bf16.msra.mxu1 %v7318_v45  ;;  %v7252_v44 = vld [vmem:[%s10507_s6 + $0x2b0] sm:$0xff]  ;;  %v8512_v40 = vld [vmem:[%s10509_s8 + $0x4a8] sm:$0xff]  }
0x15b4   : > { %5096 = vmatprep.subr.bf16.mxu0 %v7333_v47  ;;  %5139 = vmatprep.subr.bf16.mxu1 %v7335_v48  ;;  %v7260_v45 = vld [vmem:[%s10507_s6 + $0x2f0] sm:$0xff]  ;;  %v7253_v47 = vld [vmem:[%s10507_s6 + $0x2b8] sm:$0xff] }
0x15b5   : > { %v7261_v48 = vld [vmem:[%s10507_s6 + $0x2f8] sm:$0xff]  ;;  %v7325_v15 = vcombine.high %v7252_v44, %v7260_v45  ;;  %v7324_v46 = vcombine.low %v7252_v44, %v7260_v45 }
0x15b6   : > { %v7327_v16 = vcombine.high %v7253_v47, %v7261_v48  ;;  %v7326_v51 = vcombine.low %v7253_v47, %v7261_v48  ;;  %v8517_v44 = vld [vmem:[%s10509_s8 + $0x478] sm:$0xff]  }
0x15b7   : > { %5097 = vmatpush1.bf16.msra.mxu0 %v7332_v13  ;;  %5140 = vmatpush1.bf16.msra.mxu1 %v7334_v14  ;;  %v7268_v13 = vld [vmem:[%s10507_s6 + $0x330] sm:$0xff]  ;;  %v8518_v45 = vld [vmem:[%s10509_s8 + $0x4f8] sm:$0xff]  }
0x15b8   : > { %5098 = vmatprep.subr.bf16.mxu0 %v7349_v37  ;;  %5141 = vmatprep.subr.bf16.mxu1 %v7351_v25  ;;  %v7276_v14 = vld [vmem:[%s10507_s6 + $0x370] sm:$0xff]  ;;  %v7269_v37 = vld [vmem:[%s10507_s6 + $0x338] sm:$0xff] }
0x15b9   : > { %v7277_v25 = vld [vmem:[%s10507_s6 + $0x378] sm:$0xff]  ;;  %v7341_v53 = vcombine.high %v7268_v13, %v7276_v14  ;;  %v7340_v43 = vcombine.low %v7268_v13, %v7276_v14 }
0x15ba   : > { %v7343_v54 = vcombine.high %v7269_v37, %v7277_v25  ;;  %v7342_v58 = vcombine.low %v7269_v37, %v7277_v25  ;;  %v8519_v47 = vld [vmem:[%s10509_s8 + $0x438] sm:$0xff]  }
0x15bb   : > { %5099 = vmatpush1.bf16.msra.mxu0 %v7348_v52  ;;  %5142 = vmatpush1.bf16.msra.mxu1 %v7350_v55  ;;  %v7284_v52 = vld [vmem:[%s10507_s6 + $0x3b0] sm:$0xff]  ;;  %v8520_v48 = vld [vmem:[%s10509_s8 + $0x4b8] sm:$0xff]  }
0x15bc   : > { %5178 = vmatprep.subr.bf16.mxu0 %v7305_v56  ;;  %5221 = vmatprep.subr.bf16.mxu1 %v7307_v29  ;;  %v7292_v55 = vld [vmem:[%s10507_s6 + $0x3f0] sm:$0xff]  ;;  %v7285_v56 = vld [vmem:[%s10507_s6 + $0x3b8] sm:$0xff] }
0x15bd   : > { %v7293_v29 = vld [vmem:[%s10507_s6 + $0x3f8] sm:$0xff]  ;;  %v7357_v59 = vcombine.high %v7284_v52, %v7292_v55 }
0x15be   : > { %7362 = vmatmul.mubr.msk.bf16.vlgmr.msra.gmra.mrb[56].mxu0 %vm524_vm0, %v9869_v8  ;;  %7363 = vmatmul.mubr.msk.bf16.vlgmr.msra.gmra.mrb[64].mxu1 %vm524_vm0, %v9869_v8  ;;  %v7359_v60 = vcombine.high %v7285_v56, %v7293_v29 }
0x15bf   : > { %5179 = vmatpush1.bf16.msra.mxu0 %v7304_v61  ;;  %5222 = vmatpush1.bf16.msra.mxu1 %v7306_v62  ;;  %v7356_v61 = vcombine.low %v7284_v52, %v7292_v55  ;;  %v7358_v62 = vcombine.low %v7285_v56, %v7293_v29 }
0x15c0   : > { %5180 = vmatprep.subr.bf16.mxu0 %v7321_v0  ;;  %5223 = vmatprep.subr.bf16.mxu1 %v7323_v2  ;;  %v8489_v0 = vld [vmem:[%s10509_s8 + $0x440] sm:$0xff]  }
0x15c1   : > { %5210 = vmatprep.mubr.bf16.mxu0 %v8676_v1  ;;  %5253 = vmatprep.mubr.bf16.mxu1 %v8676_v1  ;;  %v8491_v2 = vld [vmem:[%s10509_s8 + $0x400] sm:$0xff]  }
0x15c3   : > { %5181 = vmatpush1.bf16.msra.mxu0 %v7320_v6  ;;  %5224 = vmatpush1.bf16.msra.mxu1 %v7322_v12  ;;  %v8496_v6 = vld [vmem:[%s10509_s8 + $0x488] sm:$0xff]   ;;  %v8497_v12 = vld [vmem:[%s10509_s8 + $0x450] sm:$0xff]  }
0x15c4   : > { %5182 = vmatprep.subr.bf16.mxu0 %v7337_v38  ;;  %5225 = vmatprep.subr.bf16.mxu1 %v7339_v17  ;;  %v8499_v38 = vld [vmem:[%s10509_s8 + $0x410] sm:$0xff]  }
0x15c5   : > { %v8500_v17 = vld [vmem:[%s10509_s8 + $0x490] sm:$0xff]  }
0x15c7   : > { %5183 = vmatpush1.bf16.msra.mxu0 %v7336_v11  ;;  %5226 = vmatpush1.bf16.msra.mxu1 %v7338_v24  ;;  %v8505_v11 = vld [vmem:[%s10509_s8 + $0x460] sm:$0xff]  }
0x15c8   : > { %5184 = vmatprep.subr.bf16.mxu0 %v7353_v26  ;;  %5227 = vmatprep.subr.bf16.mxu1 %v7355_v27  ;;  %v8506_v24 = vld [vmem:[%s10509_s8 + $0x4e0] sm:$0xff]  }
0x15c9   : > { %v8507_v26 = vld [vmem:[%s10509_s8 + $0x420] sm:$0xff]  }
0x15ca   : > { %v8508_v27 = vld [vmem:[%s10509_s8 + $0x4a0] sm:$0xff]  }
0x15cb   : > { %5185 = vmatpush1.bf16.msra.mxu0 %v7352_v31  ;;  %5228 = vmatpush1.bf16.msra.mxu1 %v7354_v41  ;;  %v8513_v31 = vld [vmem:[%s10509_s8 + $0x470] sm:$0xff]  }
0x15cc   : > { %5264 = vmatprep.subr.bf16.mxu0 %v7309_v50  ;;  %5307 = vmatprep.subr.bf16.mxu1 %v7311_v42  ;;  %v8514_v41 = vld [vmem:[%s10509_s8 + $0x4f0] sm:$0xff]  }
0x15cd   : > { %v8515_v50 = vld [vmem:[%s10509_s8 + $0x430] sm:$0xff]  }
0x15ce   : > { %7364 = vmatmul.mubr.msk.bf16.vlgmr.msra.gmra.mrb[60].mxu0 %vm524_vm0, %v9869_v8  ;;  %7365 = vmatmul.mubr.msk.bf16.vlgmr.msra.gmra.mrb[68].mxu1 %vm524_vm0, %v9869_v8  ;;  %v8516_v42 = vld [vmem:[%s10509_s8 + $0x4b0] sm:$0xff]  }
0x15cf   : > { %5265 = vmatpush1.bf16.msra.mxu0 %v7308_v28  ;;  %5308 = vmatpush1.bf16.msra.mxu1 %v7310_v49  ;;  %v8521_v28 = vld [vmem:[%s10509_s8 + $0x540] sm:$0xff]  }
0x15d0   : > { %5266 = vmatprep.subr.bf16.mxu0 %v7325_v15  ;;  %5309 = vmatprep.subr.bf16.mxu1 %v7327_v16  ;;  %v8522_v49 = vld [vmem:[%s10509_s8 + $0x5c0] sm:$0xff]   ;;  %v7294_v15 = vld [vmem:[%s10508_s7 + $0x10] sm:$0xff] }
0x15d1   : > { %5296 = vmatprep.mubr.bf16.mxu0 %v8676_v1  ;;  %5339 = vmatprep.mubr.bf16.mxu1 %v8676_v1  ;;  %v8490_v1 = vld [vmem:[%s10509_s8 + $0x4c0] sm:$0xff]   ;;  %v4606_v16 = vrot.slane %v7294_v15, %v8818_v32  ;;  %v4614_v13 = vrot.slane %v7294_v15, %v8997_v19  ;;  %v4610_v14 = vrot.slane %v7294_v15, %v8825_v35 }
0x15d2   : > { %v4618_v37 = vrot.slane %v7294_v15, %v9002_v21 }
0x15d3   : > { %5267 = vmatpush1.bf16.msra.mxu0 %v7324_v46  ;;  %5310 = vmatpush1.bf16.msra.mxu1 %v7326_v51 }
0x15d4   : > { %5268 = vmatprep.subr.bf16.mxu0 %v7341_v53  ;;  %5311 = vmatprep.subr.bf16.mxu1 %v7343_v54 }
0x15d7   : > { %5269 = vmatpush1.bf16.msra.mxu0 %v7340_v43  ;;  %5312 = vmatpush1.bf16.msra.mxu1 %v7342_v58 }
0x15d8   : > { %5270 = vmatprep.subr.bf16.mxu0 %v7357_v59  ;;  %5313 = vmatprep.subr.bf16.mxu1 %v7359_v60 }
0x15db   : > { %5271 = vmatpush1.bf16.msra.mxu0 %v7356_v61  ;;  %5314 = vmatpush1.bf16.msra.mxu1 %v7358_v62 }
0x15dc   : > { %7975 = vmatprep.subr.bf16.mxu0 %v8489_v0  ;;  %7997 = vmatprep.subr.bf16.mxu1 %v8490_v1 }
0x15de   : > { %7366 = vmatmul.mubr.msk.bf16.vlgmr.msra.gmra.mrb[64].mxu0 %vm524_vm0, %v9869_v8  ;;  %7367 = vmatmul.mubr.msk.bf16.vlgmr.msra.gmra.mrb[72].mxu1 %vm524_vm0, %v9869_v8  ;;  %v8498_v8 = vld [vmem:[%s10509_s8 + $0x4d0] sm:$0xff]  }
0x15df   : > { %7976 = vmatpush3.bf16.msra.mxu0 %v8491_v2  ;;  %7998 = vmatpush3.bf16.msra.mxu1 %v8492_v63 }
0x15e0   : > { %7977 = vmatprep.subr.bf16.mxu0 %v8493_v3  ;;  %7999 = vmatprep.subr.bf16.mxu1 %v8494_v4 }
0x15e3   : > { %7978 = vmatpush3.bf16.msra.mxu0 %v8495_v5  ;;  %8000 = vmatpush3.bf16.msra.mxu1 %v8496_v6 }
0x15e4   : > { %7979 = vmatprep.subr.bf16.mxu0 %v8497_v12  ;;  %8001 = vmatprep.subr.bf16.mxu1 %v8498_v8 }
0x15e7   : > { %7980 = vmatpush3.bf16.msra.mxu0 %v8499_v38  ;;  %8002 = vmatpush3.bf16.msra.mxu1 %v8500_v17 }
0x15e8   : > { %7981 = vmatprep.subr.bf16.mxu0 %v8501_v10  ;;  %8003 = vmatprep.subr.bf16.mxu1 %v8502_v7  ;;  %v8523_v7 = vld [vmem:[%s10509_s8 + $0x500] sm:$0xff]  }
0x15eb   : > { %7982 = vmatpush3.bf16.msra.mxu0 %v8503_v9  ;;  %8004 = vmatpush3.bf16.msra.mxu1 %v8504_v22  ;;  %v8524_v9 = vld [vmem:[%s10509_s8 + $0x580] sm:$0xff]   ;;  %v8525_v22 = vld [vmem:[%s10509_s8 + $0x548] sm:$0xff]  }
0x15ec   : > { %7983 = vmatprep.subr.bf16.mxu0 %v8505_v11  ;;  %8005 = vmatprep.subr.bf16.mxu1 %v8506_v24  ;;  %v8526_v11 = vld [vmem:[%s10509_s8 + $0x5c8] sm:$0xff]  }
0x15ed   : > { %v8527_v24 = vld [vmem:[%s10509_s8 + $0x508] sm:$0xff]  }
0x15ef   : > { %7984 = vmatpush3.bf16.msra.mxu0 %v8507_v26  ;;  %8006 = vmatpush3.bf16.msra.mxu1 %v8508_v27  ;;  %v8528_v26 = vld [vmem:[%s10509_s8 + $0x588] sm:$0xff]   ;;  %v4622_v27 = vrot.slane %v7294_v15, %v9292_v30 }
0x15f0   : > { %7985 = vmatprep.subr.bf16.mxu0 %v8509_v18  ;;  %8007 = vmatprep.subr.bf16.mxu1 %v8510_v57  ;;  %v4630_v18 = vrot.slane %v7294_v15, %v9295_v33  ;;  %v8529_v57 = vld [vmem:[%s10509_s8 + $0x550] sm:$0xff]  }
0x15f3   : > { %7986 = vmatpush3.bf16.msra.mxu0 %v8511_v39  ;;  %8008 = vmatpush3.bf16.msra.mxu1 %v8512_v40  ;;  %v8530_v39 = vld [vmem:[%s10509_s8 + $0x5d0] sm:$0xff]   ;;  %v4626_v40 = vrot.slane %v7294_v15, %v9298_v34 }
0x15f4   : > { %7987 = vmatprep.subr.bf16.mxu0 %v8513_v31  ;;  %8009 = vmatprep.subr.bf16.mxu1 %v8514_v41  ;;  %v4634_v31 = vrot.slane %v7294_v15, %v9301_v36  ;;  %v8534_v15 = vld [vmem:[%s10509_s8 + $0x5d8] sm:$0xff]  }
0x15f7   : > { %7988 = vmatpush3.bf16.msra.mxu0 %v8515_v50  ;;  %8010 = vmatpush3.bf16.msra.mxu1 %v8516_v42  ;;  %v8531_v42 = vld [vmem:[%s10509_s8 + $0x510] sm:$0xff]  }
0x15f8   : > { %7989 = vmatprep.subr.bf16.mxu0 %v8517_v44  ;;  %8011 = vmatprep.subr.bf16.mxu1 %v8518_v45  ;;  %v8532_v44 = vld [vmem:[%s10509_s8 + $0x590] sm:$0xff]  }
0x15fb   : > { %7990 = vmatpush3.bf16.msra.mxu0 %v8519_v47  ;;  %8012 = vmatpush3.bf16.msra.mxu1 %v8520_v48 }
0x15fc   : > { %8019 = vmatprep.subr.bf16.mxu0 %v8521_v28  ;;  %8041 = vmatprep.subr.bf16.mxu1 %v8522_v49  ;;  %v8533_v49 = vld [vmem:[%s10509_s8 + $0x558] sm:$0xff]  }
0x1681   : > { %v5040_v25 = vpop.f32.mrb[52].mxu0  ;;  %v5083_v46 = vpop.f32.mrb[60].mxu1 }
0x1682   : > { %v5041_v51 = vadd.f32 %v5040_v25, %v4606_v16  ;;  %v5084_v53 = vadd.f32 %v5083_v46, %v4614_v13  ;;  %v5042_v54 = vpop.f32.mrb[53].mxu0  ;;  %v5085_v52 = vpop.f32.mrb[61].mxu1 }
0x1683   : > { %v5043_v55 = vadd.f32 %v5042_v54, %v4610_v14  ;;  %v5086_v56 = vadd.f32 %v5085_v52, %v4618_v37  ;;  %v5044_v29 = vpop.f32.mrb[54].mxu0  ;;  %v5087_v43 = vpop.f32.mrb[62].mxu1 }
0x1684   : > { %v5045_v58 = vadd.f32 %v5044_v29, %v4606_v16  ;;  %v5088_v59 = vadd.f32 %v5087_v43, %v4614_v13  ;;  %v5046_v60 = vpop.f32.mrb[55].mxu0  ;;  %v5089_v61 = vpop.f32.mrb[63].mxu1  ;;  %v5350_v1 = vmax.f32 %v5041_v51, 0.0  ;;  %v5352_v2 = vmax.f32 %v5084_v53, 0.0 }
0x1685   : > { %v5047_v62 = vadd.f32 %v5046_v60, %v4610_v14  ;;  %v5090_v0 = vadd.f32 %v5089_v61, %v4618_v37  ;;  %v5351_v4 = vmax.f32 %v5043_v55, 0.0  ;;  %v5353_v5 = vmax.f32 %v5086_v56, 0.0  ;;  %v8535_v55 = vld [vmem:[%s10509_s8 + $0x518] sm:$0xff]   ;;  %v8537_v60 = vld [vmem:[%s10509_s8 + $0x560] sm:$0xff]  }
0x1686   : > { %v5366_v63 = vmax.f32 %v5045_v58, 0.0  ;;  %v5368_v3 = vmax.f32 %v5088_v59, 0.0  ;;  %v8536_v56 = vld [vmem:[%s10509_s8 + $0x598] sm:$0xff]   ;;  %v8538_v61 = vld [vmem:[%s10509_s8 + $0x5e0] sm:$0xff]  }
0x1687   : > { %v5367_v6 = vmax.f32 %v5047_v62, 0.0  ;;  %v5369_v12 = vmax.f32 %v5090_v0, 0.0 }
0x1688   : > { %v5382_v8 = vpack.c.bf16 %v5366_v63, %v5350_v1  ;;  %v5384_v38 = vpack.c.bf16 %v5368_v3, %v5352_v2 }
0x1689   : > { %v5383_v17 = vpack.c.bf16 %v5367_v6, %v5351_v4  ;;  %v5385_v10 = vpack.c.bf16 %v5369_v12, %v5353_v5  ;;  %v8539_v6 = vld [vmem:[%s10509_s8 + $0x520] sm:$0xff]  }
0x168a   : > { %v8540_v12 = vld [vmem:[%s10509_s8 + $0x5a0] sm:$0xff]  }
0x168b   : > { %6459 = vmatprep.mubr.bf16.mxu0 %v5383_v17  ;;  %6500 = vmatprep.mubr.bf16.mxu1 %v5385_v10  ;;  %v10193_v17 = vld [vmem:[%s10508_s7 + $0x18] sm:$0xff]  ;;  %v8543_v10 = vld [vmem:[%s10509_s8 + $0x528] sm:$0xff]  }
0x168c   : > { %6460 = vmatmul.mubr.bf16.vlgmr.msra.gmra.mrb[68].mxu0 %v5382_v8  ;;  %6501 = vmatmul.mubr.bf16.vlgmr.msra.gmra.mrb[76].mxu1 %v5384_v38  ;;  %v8541_v8 = vld [vmem:[%s10509_s8 + $0x568] sm:$0xff]  }
0x168d   : > { %8020 = vmatpush3.bf16.msra.mxu0 %v8523_v7  ;;  %8042 = vmatpush3.bf16.msra.mxu1 %v8524_v9  ;;  %v8542_v38 = vld [vmem:[%s10509_s8 + $0x5e8] sm:$0xff]   ;;  %v4638_v9 = vrot.slane %v10193_v17, %v8818_v32  ;;  %v8547_v32 = vld [vmem:[%s10509_s8 + $0x530] sm:$0xff]  }
0x168e   : > { %8021 = vmatprep.subr.bf16.mxu0 %v8525_v22  ;;  %8043 = vmatprep.subr.bf16.mxu1 %v8526_v11  ;;  %v8544_v7 = vld [vmem:[%s10509_s8 + $0x5a8] sm:$0xff]   ;;  %v4646_v22 = vrot.slane %v10193_v17, %v8997_v19  ;;  %v8545_v11 = vld [vmem:[%s10509_s8 + $0x570] sm:$0xff]  }
0x168f   : > { %v8548_v19 = vld [vmem:[%s10509_s8 + $0x5b0] sm:$0xff]  }
0x1691   : > { %v5126_v41 = vpop.f32.mrb[56].mxu0  ;;  %v5169_v50 = vpop.f32.mrb[64].mxu1  ;;  %8022 = vmatpush3.bf16.msra.mxu0 %v8527_v24  ;;  %8044 = vmatpush3.bf16.msra.mxu1 %v8528_v26  ;;  %v8546_v24 = vld [vmem:[%s10509_s8 + $0x5f0] sm:$0xff]   ;;  %v4642_v26 = vrot.slane %v10193_v17, %v8825_v35 }
0x1692   : > { %v5127_v45 = vadd.f32 %v5126_v41, %v4622_v27  ;;  %v5170_v47 = vadd.f32 %v5169_v50, %v4630_v18  ;;  %v5128_v48 = vpop.f32.mrb[57].mxu0  ;;  %v5171_v28 = vpop.f32.mrb[65].mxu1  ;;  %8023 = vmatprep.subr.bf16.mxu0 %v8529_v57  ;;  %8045 = vmatprep.subr.bf16.mxu1 %v8530_v39  ;;  %v8550_v50 = vld [vmem:[%s10509_s8 + $0x5f8] sm:$0xff]  }
0x1693   : > { %v5129_v16 = vadd.f32 %v5128_v48, %v4626_v40  ;;  %v5172_v13 = vadd.f32 %v5171_v28, %v4634_v31  ;;  %v5130_v14 = vpop.f32.mrb[58].mxu0  ;;  %v5173_v37 = vpop.f32.mrb[66].mxu1 }
0x1694   : > { %v5131_v25 = vadd.f32 %v5130_v14, %v4622_v27  ;;  %v5174_v46 = vadd.f32 %v5173_v37, %v4630_v18  ;;  %v5132_v51 = vpop.f32.mrb[59].mxu0  ;;  %v5175_v53 = vpop.f32.mrb[67].mxu1  ;;  %v5354_v29 = vmax.f32 %v5127_v45, 0.0  ;;  %v5356_v43 = vmax.f32 %v5170_v47, 0.0  ;;  %v8551_v14 = vld [vmem:[%s10509_s8 + $0x538] sm:$0xff]  }
0x1695   : > { %v5133_v54 = vadd.f32 %v5132_v51, %v4626_v40  ;;  %v5176_v52 = vadd.f32 %v5175_v53, %v4634_v31  ;;  %8024 = vmatpush3.bf16.msra.mxu0 %v8531_v42  ;;  %8046 = vmatpush3.bf16.msra.mxu1 %v8532_v44  ;;  %v5355_v62 = vmax.f32 %v5129_v16, 0.0  ;;  %v5357_v0 = vmax.f32 %v5172_v13, 0.0  ;;  %v8552_v37 = vld [vmem:[%s10509_s8 + $0x5b8] sm:$0xff]  }
0x1696   : > { %v5370_v58 = vmax.f32 %v5131_v25, 0.0  ;;  %v5372_v59 = vmax.f32 %v5174_v46, 0.0  ;;  %8025 = vmatprep.subr.bf16.mxu0 %v8533_v49  ;;  %8047 = vmatprep.subr.bf16.mxu1 %v8534_v15  ;;  %v4650_v27 = vrot.slane %v10193_v17, %v9002_v21  ;;  %v8549_v21 = vld [vmem:[%s10509_s8 + $0x578] sm:$0xff]  }
0x1697   : > { %v5371_v1 = vmax.f32 %v5133_v54, 0.0  ;;  %v5373_v2 = vmax.f32 %v5176_v52, 0.0  ;;  %v8553_v54 = vld [vmem:[%s10509_s8 + $0x640] sm:$0xff]  }
0x1698   : > { %v10174_v63 = vpack.c.bf16 %v5370_v58, %v5354_v29  ;;  %v10176_v3 = vpack.c.bf16 %v5372_v59, %v5356_v43  ;;  %v8554_v52 = vld [vmem:[%s10509_s8 + $0x6c0] sm:$0xff]  }
0x1699   : > { %v5387_v4 = vpack.c.bf16 %v5371_v1, %v5355_v62  ;;  %v5389_v5 = vpack.c.bf16 %v5373_v2, %v5357_v0  ;;  %8026 = vmatpush3.bf16.msra.mxu0 %v8535_v55  ;;  %8048 = vmatpush3.bf16.msra.mxu1 %v8536_v56  ;;  %v8555_v62 = vld [vmem:[%s10509_s8 + $0x600] sm:$0xff]   ;;  %v8557_v1 = vld [vmem:[%s10509_s8 + $0x648] sm:$0xff]  }
0x169a   : > { %8027 = vmatprep.subr.bf16.mxu0 %v8537_v60  ;;  %8049 = vmatprep.subr.bf16.mxu1 %v8538_v61  ;;  %v8556_v0 = vld [vmem:[%s10509_s8 + $0x680] sm:$0xff]   ;;  %v8558_v2 = vld [vmem:[%s10509_s8 + $0x6c8] sm:$0xff]  }
0x169b   : > { %6541 = vmatprep.mubr.bf16.mxu0 %v5387_v4  ;;  %6582 = vmatprep.mubr.bf16.mxu1 %v5389_v5  ;;  %v8559_v4 = vld [vmem:[%s10509_s8 + $0x608] sm:$0xff]   ;;  %v4654_v5 = vrot.slane %v10193_v17, %v9292_v30 }
0x169d   : > { %8028 = vmatpush3.bf16.msra.mxu0 %v8539_v6  ;;  %8050 = vmatpush3.bf16.msra.mxu1 %v8540_v12  ;;  %v4662_v6 = vrot.slane %v10193_v17, %v9295_v33  ;;  %v4658_v12 = vrot.slane %v10193_v17, %v9298_v34  ;;  %v8562_v33 = vld [vmem:[%s10509_s8 + $0x6d0] sm:$0xff]  }
0x169e   : > { %8029 = vmatprep.subr.bf16.mxu0 %v8541_v8  ;;  %8051 = vmatprep.subr.bf16.mxu1 %v8542_v38  ;;  %v4666_v8 = vrot.slane %v10193_v17, %v9301_v36  ;;  %v8564_v36 = vld [vmem:[%s10509_s8 + $0x690] sm:$0xff]   ;;  %v8565_v17 = vld [vmem:[%s10509_s8 + $0x658] sm:$0xff]  }
0x16a1   : > { %v5212_v18 = vpop.f32.mrb[60].mxu0  ;;  %v5255_v57 = vpop.f32.mrb[68].mxu1  ;;  %8030 = vmatpush3.bf16.msra.mxu0 %v8543_v10  ;;  %8052 = vmatpush3.bf16.msra.mxu1 %v8544_v7  ;;  %v8563_v7 = vld [vmem:[%s10509_s8 + $0x610] sm:$0xff]  }
0x16a2   : > { %v5213_v39 = vadd.f32 %v5212_v18, %v4638_v9  ;;  %v5256_v40 = vadd.f32 %v5255_v57, %v4646_v22  ;;  %v5214_v31 = vpop.f32.mrb[61].mxu0  ;;  %v5257_v41 = vpop.f32.mrb[69].mxu1  ;;  %8031 = vmatprep.subr.bf16.mxu0 %v8545_v11  ;;  %8053 = vmatprep.subr.bf16.mxu1 %v8546_v24 }
0x16a3   : > { %v5215_v42 = vadd.f32 %v5214_v31, %v4642_v26  ;;  %v5258_v44 = vadd.f32 %v5257_v41, %v4650_v27  ;;  %v5216_v45 = vpop.f32.mrb[62].mxu0  ;;  %v5259_v47 = vpop.f32.mrb[70].mxu1 }
0x16a4   : > { %v5217_v48 = vadd.f32 %v5216_v45, %v4638_v9  ;;  %v5260_v28 = vadd.f32 %v5259_v47, %v4646_v22  ;;  %v5218_v49 = vpop.f32.mrb[63].mxu0  ;;  %v5261_v15 = vpop.f32.mrb[71].mxu1  ;;  %v5358_v25 = vmax.f32 %v5213_v39, 0.0  ;;  %v5360_v46 = vmax.f32 %v5256_v40, 0.0 }
0x16a5   : > { %v5219_v16 = vadd.f32 %v5218_v49, %v4642_v26  ;;  %v5262_v13 = vadd.f32 %v5261_v15, %v4650_v27  ;;  %8032 = vmatpush3.bf16.msra.mxu0 %v8547_v32  ;;  %8054 = vmatpush3.bf16.msra.mxu1 %v8548_v19  ;;  %v5359_v55 = vmax.f32 %v5215_v42, 0.0  ;;  %v5361_v56 = vmax.f32 %v5258_v44, 0.0  ;;  %v8566_v32 = vld [vmem:[%s10509_s8 + $0x6d8] sm:$0xff]  }
0x16a6   : > { %v5374_v51 = vmax.f32 %v5217_v48, 0.0  ;;  %v5376_v53 = vmax.f32 %v5260_v28, 0.0  ;;  %8033 = vmatprep.subr.bf16.mxu0 %v8549_v21  ;;  %8055 = vmatprep.subr.bf16.mxu1 %v8550_v50  ;;  %v8567_v50 = vld [vmem:[%s10509_s8 + $0x618] sm:$0xff]   ;;  %v8569_v28 = vld [vmem:[%s10509_s8 + $0x660] sm:$0xff]  }
0x16a7   : > { %v5375_v29 = vmax.f32 %v5219_v16, 0.0  ;;  %v5377_v43 = vmax.f32 %v5262_v13, 0.0  ;;  %v8568_v48 = vld [vmem:[%s10509_s8 + $0x698] sm:$0xff]  }
0x16a8   : > { %v10239_v58 = vpack.c.bf16 %v5374_v51, %v5358_v25  ;;  %v10241_v59 = vpack.c.bf16 %v5376_v53, %v5360_v46  ;;  %v8571_v53 = vld [vmem:[%s10509_s8 + $0x620] sm:$0xff]  }
0x16a9   : > { %v5391_v60 = vpack.c.bf16 %v5375_v29, %v5359_v55  ;;  %v5393_v61 = vpack.c.bf16 %v5377_v43, %v5361_v56  ;;  %8034 = vmatpush3.bf16.msra.mxu0 %v8551_v14  ;;  %8056 = vmatpush3.bf16.msra.mxu1 %v8552_v37  ;;  %v8570_v14 = vld [vmem:[%s10509_s8 + $0x6e0] sm:$0xff]   ;;  %v8574_v55 = vld [vmem:[%s10509_s8 + $0x6e8] sm:$0xff]   ;;  %v8577_v43 = vld [vmem:[%s10509_s8 + $0x670] sm:$0xff]  }
0x16aa   : > { %8063 = vmatprep.subr.bf16.mxu0 %v8553_v54  ;;  %8085 = vmatprep.subr.bf16.mxu1 %v8554_v52  ;;  %v8572_v54 = vld [vmem:[%s10509_s8 + $0x6a0] sm:$0xff]   ;;  %v8573_v52 = vld [vmem:[%s10509_s8 + $0x668] sm:$0xff]  }
0x16ab   : > { %v8575_v56 = vld [vmem:[%s10509_s8 + $0x628] sm:$0xff]  }
0x16ac   : > { %6542 = vmatmul.mubr.bf16.vlgmr.msra.gmra.mrb[72].mxu0 %v10174_v63  ;;  %6583 = vmatmul.mubr.bf16.vlgmr.msra.gmra.mrb[80].mxu1 %v10176_v3  ;;  %v8560_v63 = vld [vmem:[%s10509_s8 + $0x688] sm:$0xff]   ;;  %v8561_v3 = vld [vmem:[%s10509_s8 + $0x650] sm:$0xff]  }
0x16ad   : > { %8064 = vmatpush3.bf16.msra.mxu0 %v8555_v62  ;;  %6623 = vmatprep.mubr.bf16.mxu0 %v5391_v60  ;;  %v8576_v29 = vld [vmem:[%s10509_s8 + $0x6a8] sm:$0xff]   ;;  %v8578_v60 = vld [vmem:[%s10509_s8 + $0x6f0] sm:$0xff]  }
0x16ae   : > { %8086 = vmatpush3.bf16.msra.mxu1 %v8556_v0  ;;  %6664 = vmatprep.mubr.bf16.mxu1 %v5393_v61  ;;  %v8579_v61 = vld [vmem:[%s10509_s8 + $0x630] sm:$0xff]   ;;  %v8581_v0 = vld [vmem:[%s10509_s8 + $0x678] sm:$0xff]  }
0x16af   : > { %8065 = vmatprep.subr.bf16.mxu0 %v8557_v1  ;;  %8087 = vmatprep.subr.bf16.mxu1 %v8558_v2  ;;  %v8580_v62 = vld [vmem:[%s10509_s8 + $0x6b0] sm:$0xff]   ;;  %v8582_v1 = vld [vmem:[%s10509_s8 + $0x6f8] sm:$0xff]  }
0x16b0   : > { %v8583_v2 = vld [vmem:[%s10509_s8 + $0x638] sm:$0xff]  }
0x16b1   : > { %v5298_v38 = vpop.f32.mrb[64].mxu0  ;;  %v5341_v10 = vpop.f32.mrb[72].mxu1  ;;  %8066 = vmatpush3.bf16.msra.mxu0 %v8559_v4  ;;  %v8584_v4 = vld [vmem:[%s10509_s8 + $0x6b8] sm:$0xff]  }
0x16b2   : > { %v5299_v9 = vadd.f32 %v5298_v38, %v4654_v5  ;;  %v5342_v22 = vadd.f32 %v5341_v10, %v4662_v6  ;;  %8088 = vmatpush3.bf16.msra.mxu1 %v8560_v63  ;;  %v5300_v11 = vpop.f32.mrb[65].mxu0  ;;  %v5343_v24 = vpop.f32.mrb[73].mxu1  ;;  %8067 = vmatprep.subr.bf16.mxu0 %v8561_v3  ;;  %v8587_v63 = vld [vmem:[%s10509_s8 + $0x700] sm:$0xff]   ;;  %v8592_v38 = vld [vmem:[%s10509_s8 + $0x788] sm:$0xff]   ;;  %v8595_v10 = vld [vmem:[%s10509_s8 + $0x710] sm:$0xff]  }
0x16b3   : > { %v5301_v26 = vadd.f32 %v5300_v11, %v4658_v12  ;;  %v5344_v27 = vadd.f32 %v5343_v24, %v4666_v8  ;;  %v5302_v18 = vpop.f32.mrb[66].mxu0  ;;  %v5345_v57 = vpop.f32.mrb[74].mxu1  ;;  %8089 = vmatprep.subr.bf16.mxu1 %v8562_v33  ;;  %v8588_v3 = vld [vmem:[%s10509_s8 + $0x780] sm:$0xff]   ;;  %v8591_v33 = vld [vmem:[%s10509_s8 + $0x708] sm:$0xff]   ;;  %v8599_v11 = vld [vmem:[%s10509_s8 + $0x718] sm:$0xff]  }
0x16b4   : > { %v5303_v19 = vadd.f32 %v5302_v18, %v4654_v5  ;;  %v5346_v39 = vadd.f32 %v5345_v57, %v4662_v6  ;;  %v5304_v40 = vpop.f32.mrb[67].mxu0  ;;  %v5347_v31 = vpop.f32.mrb[75].mxu1  ;;  %v5362_v42 = vmax.f32 %v5299_v9, 0.0  ;;  %v5364_v44 = vmax.f32 %v5342_v22, 0.0  ;;  %v8585_v5 = vld [vmem:[%s10509_s8 + $0x740] sm:$0xff]   ;;  %v8597_v9 = vld [vmem:[%s10509_s8 + $0x758] sm:$0xff]  }
0x16b5   : > { %v5305_v41 = vadd.f32 %v5304_v40, %v4658_v12  ;;  %v5348_v21 = vadd.f32 %v5347_v31, %v4666_v8  ;;  %8068 = vmatpush3.bf16.msra.mxu0 %v8563_v7  ;;  %v5363_v49 = vmax.f32 %v5301_v26, 0.0  ;;  %v5365_v15 = vmax.f32 %v5344_v27, 0.0  ;;  %v8586_v6 = vld [vmem:[%s10509_s8 + $0x7c0] sm:$0xff]   ;;  %v8589_v12 = vld [vmem:[%s10509_s8 + $0x748] sm:$0xff]   ;;  %v8596_v7 = vld [vmem:[%s10509_s8 + $0x790] sm:$0xff]  }
0x16b6   : > { %v5378_v45 = vmax.f32 %v5303_v19, 0.0  ;;  %v5380_v47 = vmax.f32 %v5346_v39, 0.0  ;;  %8090 = vmatpush3.bf16.msra.mxu1 %v8564_v36  ;;  %8069 = vmatprep.subr.bf16.mxu0 %v8565_v17  ;;  %v8590_v8 = vld [vmem:[%s10509_s8 + $0x7c8] sm:$0xff]   ;;  %v8598_v22 = vld [vmem:[%s10509_s8 + $0x7d8] sm:$0xff]   ;;  %v8601_v36 = vld [vmem:[%s10509_s8 + $0x760] sm:$0xff]  }
0x16b7   : > { %v5379_v16 = vmax.f32 %v5305_v41, 0.0  ;;  %v5381_v13 = vmax.f32 %v5348_v21, 0.0  ;;  %8091 = vmatprep.subr.bf16.mxu1 %v8566_v32  ;;  %v8600_v24 = vld [vmem:[%s10509_s8 + $0x798] sm:$0xff]   ;;  %v8602_v17 = vld [vmem:[%s10509_s8 + $0x7e0] sm:$0xff]   ;;  %v8605_v18 = vld [vmem:[%s10509_s8 + $0x768] sm:$0xff]  }
0x16b8   : > { %v10301_v37 = vpack.c.bf16 %v5378_v45, %v5362_v42  ;;  %v10303_v25 = vpack.c.bf16 %v5380_v47, %v5364_v44  ;;  %v8603_v26 = vld [vmem:[%s10509_s8 + $0x720] sm:$0xff]   ;;  %v8606_v57 = vld [vmem:[%s10509_s8 + $0x7e8] sm:$0xff]   ;;  %v8609_v39 = vld [vmem:[%s10509_s8 + $0x770] sm:$0xff]  }
0x16b9   : > { %v5395_v46 = vpack.c.bf16 %v5379_v16, %v5363_v49  ;;  %v5397_v51 = vpack.c.bf16 %v5381_v13, %v5365_v15  ;;  %8070 = vmatpush3.bf16.msra.mxu0 %v8567_v50  ;;  %v8604_v27 = vld [vmem:[%s10509_s8 + $0x7a0] sm:$0xff]   ;;  %v8607_v32 = vld [vmem:[%s10509_s8 + $0x728] sm:$0xff]   ;;  %v8610_v40 = vld [vmem:[%s10509_s8 + $0x7f0] sm:$0xff]  }
0x16ba   : > { %8092 = vmatpush3.bf16.msra.mxu1 %v8568_v48  ;;  %8071 = vmatprep.subr.bf16.mxu0 %v8569_v28  ;;  %v8608_v19 = vld [vmem:[%s10509_s8 + $0x7a8] sm:$0xff]   ;;  %v8611_v31 = vld [vmem:[%s10509_s8 + $0x730] sm:$0xff]   ;;  %v8613_v21 = vld [vmem:[%s10509_s8 + $0x778] sm:$0xff]  }
0x16bb   : > { %8093 = vmatprep.subr.bf16.mxu1 %v8570_v14  ;;  %v8612_v41 = vld [vmem:[%s10509_s8 + $0x7b0] sm:$0xff]   ;;  %v8614_v50 = vld [vmem:[%s10509_s8 + $0x7f8] sm:$0xff]   ;;  %v10450_v48 = vld [vmem:[%s10510_s9 + $0x8] sm:$0x3f] }
0x16bc   : > { %v8615_v42 = vld [vmem:[%s10509_s8 + $0x738] sm:$0xff]   ;;  %v5658_v28 = vrot.slane %v10450_v48, %v8825_v35 }
0x16bd   : > { %8072 = vmatpush3.bf16.msra.mxu0 %v8571_v53  ;;  %v8616_v44 = vld [vmem:[%s10509_s8 + $0x7b8] sm:$0xff]  }
0x16be   : > { %8094 = vmatpush3.bf16.msra.mxu1 %v8572_v54  ;;  %8073 = vmatprep.subr.bf16.mxu0 %v8573_v52 }
0x16bf   : > { %8095 = vmatprep.subr.bf16.mxu1 %v8574_v55 }
0x16c1   : > { %8074 = vmatpush3.bf16.msra.mxu0 %v8575_v56 }
0x16c2   : > { %8096 = vmatpush3.bf16.msra.mxu1 %v8576_v29  ;;  %8075 = vmatprep.subr.bf16.mxu0 %v8577_v43 }
0x16c3   : > { %8097 = vmatprep.subr.bf16.mxu1 %v8578_v60 }
0x16c5   : > { %8076 = vmatpush3.bf16.msra.mxu0 %v8579_v61 }
0x16c6   : > { %8098 = vmatpush3.bf16.msra.mxu1 %v8580_v62  ;;  %8077 = vmatprep.subr.bf16.mxu0 %v8581_v0 }
0x16c7   : > { %8099 = vmatprep.subr.bf16.mxu1 %v8582_v1 }
0x16c9   : > { %8078 = vmatpush3.bf16.msra.mxu0 %v8583_v2 }
0x16ca   : > { %8100 = vmatpush3.bf16.msra.mxu1 %v8584_v4  ;;  %8107 = vmatprep.subr.bf16.mxu0 %v8585_v5 }
0x16cb   : > { %8129 = vmatprep.subr.bf16.mxu1 %v8586_v6 }
0x16cc   : > { %6624 = vmatmul.mubr.bf16.vlgmr.msra.gmra.mrb[76].mxu0 %v10239_v58  ;;  %v8593_v58 = vld [vmem:[%s10509_s8 + $0x750] sm:$0xff]  }
0x16cd   : > { %6665 = vmatmul.mubr.bf16.vlgmr.msra.gmra.mrb[84].mxu1 %v10241_v59  ;;  %8108 = vmatpush3.bf16.msra.mxu0 %v8587_v63  ;;  %v8594_v59 = vld [vmem:[%s10509_s8 + $0x7d0] sm:$0xff]  }
0x16ce   : > { %6705 = vmatprep.mubr.bf16.mxu0 %v5395_v46  ;;  %8130 = vmatpush3.bf16.msra.mxu1 %v8588_v3 }
0x16cf   : > { %6746 = vmatprep.mubr.bf16.mxu1 %v5397_v51  ;;  %8109 = vmatprep.subr.bf16.mxu0 %v8589_v12 }
0x16d0   : > { %8131 = vmatprep.subr.bf16.mxu1 %v8590_v8 }
0x16d1   : > { %8110 = vmatpush3.bf16.msra.mxu0 %v8591_v33 }
0x16d2   : > { %8132 = vmatpush3.bf16.msra.mxu1 %v8592_v38  ;;  %8111 = vmatprep.subr.bf16.mxu0 %v8593_v58 }
0x16d3   : > { %8133 = vmatprep.subr.bf16.mxu1 %v8594_v59 }
0x16d5   : > { %8112 = vmatpush3.bf16.msra.mxu0 %v8595_v10 }
0x16d6   : > { %8134 = vmatpush3.bf16.msra.mxu1 %v8596_v7  ;;  %8113 = vmatprep.subr.bf16.mxu0 %v8597_v9 }
0x16d7   : > { %8135 = vmatprep.subr.bf16.mxu1 %v8598_v22 }
0x16d9   : > { %8114 = vmatpush3.bf16.msra.mxu0 %v8599_v11 }
0x16da   : > { %8136 = vmatpush3.bf16.msra.mxu1 %v8600_v24  ;;  %8115 = vmatprep.subr.bf16.mxu0 %v8601_v36 }
0x16db   : > { %8137 = vmatprep.subr.bf16.mxu1 %v8602_v17 }
0x16dd   : > { %8116 = vmatpush3.bf16.msra.mxu0 %v8603_v26 }
0x16de   : > { %8138 = vmatpush3.bf16.msra.mxu1 %v8604_v27  ;;  %8117 = vmatprep.subr.bf16.mxu0 %v8605_v18 }
0x16df   : > { %8139 = vmatprep.subr.bf16.mxu1 %v8606_v57 }
0x16e1   : > { %8118 = vmatpush3.bf16.msra.mxu0 %v8607_v32 }
0x16e2   : > { %8140 = vmatpush3.bf16.msra.mxu1 %v8608_v19  ;;  %8119 = vmatprep.subr.bf16.mxu0 %v8609_v39 }
0x16e3   : > { %8141 = vmatprep.subr.bf16.mxu1 %v8610_v40 }
0x16e5   : > { %8120 = vmatpush3.bf16.msra.mxu0 %v8611_v31 }
0x16e6   : > { %8142 = vmatpush3.bf16.msra.mxu1 %v8612_v41  ;;  %8121 = vmatprep.subr.bf16.mxu0 %v8613_v21 }
0x16e7   : > { %8143 = vmatprep.subr.bf16.mxu1 %v8614_v50 }
0x16e9   : > { %8122 = vmatpush3.bf16.msra.mxu0 %v8615_v42 }
0x16ea   : > { %8144 = vmatpush3.bf16.msra.mxu1 %v8616_v44 }
0x16ec   : > { %6706 = vmatmul.mubr.bf16.vlgmr.msra.gmra.mrb[80].mxu0 %v10301_v37 }
0x16ed   : > { %6747 = vmatmul.mubr.bf16.vlgmr.msra.gmra.mrb[88].mxu1 %v10303_v25 }
0x175f   : > { %v7991_v45 = vpop.f32.mrb[68].mxu0  ;;  %v8013_v47 = vpop.f32.mrb[76].mxu1 }
0x1760   : > { %v7992_v49 = vpop.f32.mrb[69].mxu0  ;;  %v8014_v15 = vpop.f32.mrb[77].mxu1 }
0x1761   : > { %v7993_v16 = vadd.f32 %v7992_v49, %v7991_v45  ;;  %v8015_v13 = vadd.f32 %v8014_v15, %v8013_v47  ;;  %v7994_v14 = vpop.f32.mrb[70].mxu0  ;;  %v8016_v46 = vpop.f32.mrb[78].mxu1 }
0x1762   : > { %v7995_v51 = vpop.f32.mrb[71].mxu0  ;;  %v8017_v37 = vpop.f32.mrb[79].mxu1 }
0x1763   : > { %v6462_v53 = vadd.f32 %v7993_v16, %v5658_v28  ;;  %v7996_v25 = vadd.f32 %v7995_v51, %v7994_v14  ;;  %v8018_v54 = vadd.f32 %v8017_v37, %v8016_v46 }
0x1765   : > { %v6503_v52 = vadd.f32 %v8015_v13, %v6462_v53  ;;  %v6465_v55 = vadd.f32 %v7996_v25, %v5658_v28 }
0x1767   : > { %v6506_v56 = vadd.f32 %v8018_v54, %v6465_v55 }
0x177f   : > { %v8035_v29 = vpop.f32.mrb[72].mxu0  ;;  %v8057_v43 = vpop.f32.mrb[80].mxu1 }
0x1780   : > { %v8036_v60 = vpop.f32.mrb[73].mxu0  ;;  %v8058_v61 = vpop.f32.mrb[81].mxu1 }
0x1781   : > { %v8037_v62 = vadd.f32 %v8036_v60, %v8035_v29  ;;  %v8059_v35 = vadd.f32 %v8058_v61, %v8057_v43  ;;  %v8038_v0 = vpop.f32.mrb[74].mxu0  ;;  %v8060_v1 = vpop.f32.mrb[82].mxu1  ;;  %v6796_v60 = vld [vmem:[%s10511_s10 + $0x8] sm:$0xff] }
0x1782   : > { %v8039_v2 = vpop.f32.mrb[75].mxu0  ;;  %v8061_v4 = vpop.f32.mrb[83].mxu1 }
0x1783   : > { %v6544_v5 = vadd.f32 %v8037_v62, %v6503_v52  ;;  %v8040_v6 = vadd.f32 %v8039_v2, %v8038_v0  ;;  %v8062_v63 = vadd.f32 %v8061_v4, %v8060_v1  ;;  %v6797_v62 = vld [vmem:[%s10511_s10 + $0x10] sm:$0xff]  ;;  %v6799_v1 = vld [vmem:[%s10511_s10 + $0x20] sm:$0xff]  ;;  %v6800_v2 = vld [vmem:[%s10511_s10 + $0x28] sm:$0xff] }
0x1784   : > { %v8292_v4 = vpack.c.bf16 %v6800_v2, %v6799_v1 }
0x1785   : > { %v6585_v3 = vadd.f32 %v8059_v35, %v6544_v5  ;;  %v6547_v12 = vadd.f32 %v8040_v6, %v6506_v56  ;;  %v6798_v35 = vld [vmem:[%s10511_s10 + $0x18] sm:$0xff]  ;;  %v6801_v5 = vld [vmem:[%s10511_s10 + $0x30] sm:$0xff] }
0x1786   : > { %v8288_v0 = vpack.c.bf16 %v6798_v35, %v6797_v62  ;;  %v6802_v6 = vld [vmem:[%s10511_s10 + $0x38] sm:$0xff] }
0x1787   : > { %v6588_v8 = vadd.f32 %v8062_v63, %v6547_v12  ;;  %v8296_v63 = vpack.c.bf16 %v6802_v6, %v6801_v5 }
0x179f   : > { %v8079_v33 = vpop.f32.mrb[76].mxu0 }
0x17a0   : > { %v8101_v38 = vpop.f32.mrb[84].mxu1  ;;  %v8080_v58 = vpop.f32.mrb[77].mxu0 }
0x17a1   : > { %v8081_v59 = vadd.f32 %v8080_v58, %v8079_v33  ;;  %v8102_v10 = vpop.f32.mrb[85].mxu1  ;;  %v8082_v7 = vpop.f32.mrb[78].mxu0 }
0x17a2   : > { %v8103_v9 = vadd.f32 %v8102_v10, %v8101_v38  ;;  %v8104_v22 = vpop.f32.mrb[86].mxu1  ;;  %v8083_v11 = vpop.f32.mrb[79].mxu0 }
0x17a3   : > { %v6626_v24 = vadd.f32 %v8081_v59, %v6585_v3  ;;  %v8084_v36 = vadd.f32 %v8083_v11, %v8082_v7  ;;  %v8105_v17 = vpop.f32.mrb[87].mxu1  ;;  %v6786_v59 = vrot.slane %v10450_v48, %v9292_v30 }
0x17a4   : > { %v8106_v26 = vadd.f32 %v8105_v17, %v8104_v22 }
0x17a5   : > { %v6667_v27 = vadd.f32 %v8103_v9, %v6626_v24  ;;  %v6629_v18 = vadd.f32 %v8084_v36, %v6588_v8  ;;  %v6792_v9 = vrot.slane %v10450_v48, %v9298_v34 }
0x17a7   : > { %v6670_v57 = vadd.f32 %v8106_v26, %v6629_v18 }
0x17bf   : > { %v8123_v32 = vpop.f32.mrb[80].mxu0 }
0x17c0   : > { %v8145_v19 = vpop.f32.mrb[88].mxu1  ;;  %v8124_v39 = vpop.f32.mrb[81].mxu0 }
0x17c1   : > { %v8125_v40 = vadd.f32 %v8124_v39, %v8123_v32  ;;  %v8146_v31 = vpop.f32.mrb[89].mxu1  ;;  %v8126_v41 = vpop.f32.mrb[82].mxu0 }
0x17c2   : > { %v8147_v21 = vadd.f32 %v8146_v31, %v8145_v19  ;;  %v8148_v50 = vpop.f32.mrb[90].mxu1  ;;  %v8127_v42 = vpop.f32.mrb[83].mxu0 }
0x17c3   : > { %v6708_v44 = vadd.f32 %v8125_v40, %v6667_v27  ;;  %v8128_v45 = vadd.f32 %v8127_v42, %v8126_v41  ;;  %v8149_v47 = vpop.f32.mrb[91].mxu1  ;;  %v7752_v27 = vld [vmem:[%s10512_s11] ss:$0 sm:$0xff] }
0x17c4   : > { %v8150_v28 = vadd.f32 %v8149_v47, %v8148_v50 }
0x17c5   : > { %v6749_v49 = vadd.f32 %v8147_v21, %v6708_v44  ;;  %v6711_v15 = vadd.f32 %v8128_v45, %v6670_v57 }
0x17c7   : > { %v6752_v16 = vadd.f32 %v8150_v28, %v6711_v15  ;;  %v6755_v13 = vadd.f32 %v6749_v49, %v9863_v23 }
0x17c9   : > { %v6757_v14 = vsel %vm524_vm0, %v6755_v13, 0.0  ;;  %v6756_v46 = vadd.f32 %v6752_v16, %v9865_v20  ;;  %v6795_v20 = vld [vmem:[%s10511_s10] sm:$0xff] }
0x17ca   : > { %6758 = vadd.xlane.f32.xlu1 %v6757_v14  ;;  %v8284_v61 = vpack.c.bf16 %v6796_v60, %v6795_v20 }
0x17cb   : > { %v6760_v51 = vsel %vm524_vm0, %v6756_v46, 0.0 }
0x17cc   : > { %6761 = vadd.xlane.f32.xlu0 %v6760_v51  ;;  %8285 = vmatprep.subr.bf16.mxu0 %v8284_v61 }
0x17cd   : > { %8287 = vmatpush3.bf16.msra.mxu0 %v8284_v61 }
0x17ce   : > { %8289 = vmatprep.subr.bf16.mxu0 %v8288_v0 }
0x17d1   : > { %8291 = vmatpush3.bf16.msra.mxu0 %v8288_v0 }
0x17d2   : > { %8293 = vmatprep.subr.bf16.mxu0 %v8292_v4 }
0x17d5   : > { %8295 = vmatpush3.bf16.msra.mxu0 %v8292_v4 }
0x17d6   : > { %8297 = vmatprep.subr.bf16.mxu0 %v8296_v63 }
0x17d9   : > { %8299 = vmatpush3.bf16.msra.mxu0 %v8296_v63 }
0x1857   : > { %v6759_v37 = vpop.xlane.xlu1 %6758 }
0x1858   : > { %v6763_v53 = vmul.f32 0.015625, %v6759_v37 }
0x1859   : > { %v6762_v25 = vpop.xlane.xlu0 %6761 }
0x185a   : > { %v6765_v54 = vsub.f32 %v6755_v13, %v6763_v53  ;;  %v6764_v52 = vmul.f32 0.015625, %v6762_v25 }
0x185c   : > { %v6766_v55 = vsub.f32 %v6756_v46, %v6764_v52  ;;  %v6767_v56 = vmul.f32 %v6765_v54, %v6765_v54 }
0x185e   : > { %v6769_v29 = vsel %vm524_vm0, %v6767_v56, 0.0  ;;  %v6768_v43 = vmul.f32 %v6766_v55, %v6766_v55 }
0x185f   : > { %6770 = vadd.xlane.f32.xlu1 %v6769_v29 }
0x1860   : > { %v6772_v23 = vsel %vm524_vm0, %v6768_v43, 0.0 }
0x1861   : > { %6773 = vadd.xlane.f32.xlu0 %v6772_v23 }
0x18ec   : > { %v6771_v3 = vpop.xlane.xlu1 %6770 }
0x18ed   : > { %v6775_v12 = vmul.f32 0.015625, %v6771_v3 }
0x18ee   : > { %v6774_v8 = vpop.xlane.xlu0 %6773 }
0x18ef   : > { %v6777_v33 = vadd.f32 1e-05, %v6775_v12  ;;  %v6776_v38 = vmul.f32 0.015625, %v6774_v8 }
0x18f1   : > { %8661 = vrsqrt.f32 %v6777_v33  ;;  %v6778_v58 = vadd.f32 1e-05, %v6776_v38 }
0x18f3   : > { %8663 = vrsqrt.f32 %v6778_v58 }
0x18fb   : > { %v8662_v10 = vpop.eup %8661 }
0x18fc   : > { %v6781_v7 = vmul.f32 %v8662_v10, %v6765_v54 }
0x18fd   : > { %v8664_v22 = vpop.eup %8663 }
0x18fe   : > { %v6782_v11 = vmul.f32 %v8664_v22, %v6766_v55  ;;  %v6787_v24 = vmul.f32 %v6786_v59, %v6781_v7 }
0x1900   : > { %v6788_v36 = vmul.f32 %v6786_v59, %v6782_v11  ;;  %v6793_v17 = vadd.f32 %v6792_v9, %v6787_v24 }
0x1902   : > { %v6794_v26 = vadd.f32 %v6792_v9, %v6788_v36  ;;  %8281 = vmatprep.mubr.msk.f32.mxu0 %vm524_vm0, %v6793_v17 }
0x1904   : > { %8282 = vmatmul.mubr.msk.f32.vlgmr.msra.gmra.mrb[84].mxu0 %vm524_vm0, %v6794_v26 }
0x19d7   : > { %v8283_v30 = vpop.f32.mrb[84].mxu0 }
0x19d8   : > { %v6882_v34 = vpop.f32.mrb[85].mxu0  ;;  %v6888_v18 = vadd.f32 %v8283_v30, %v7752_v27 }
0x19d9   : > { %v6883_v48 = vadd.f32 %v7752_v27, %v6882_v34 }
0x19da   : > { %6892 = vst [vmem:[%s415_s22 + $0x8] sm:$0xff] %v6888_v18 }
0x19db   : > { %6891 = vst [vmem:[%s415_s22] sm:$0xff] %v6883_v48 }
0x19dc PF: > { %s22_s21 = sadd.s32 1, %s8673_s21  }
0x19dd   : > { %p19_p4 = scmp.ge.s32.totalorder %s22_s21, 4  }
0x19df   :  { %21 = sbr.rel (!%p19_p4) target bundleno = 1 (0x1), region = 105 }

</bundles_post_ra>
